<compile_context>
chip_gen: v5e
topology: v5e:2x2
jax: 0.10.0
libtpu: 0.0.40
codegen_flags: <defaults>
</compile_context>

<pallas_src>
import jax
import jax.numpy as jnp
from jax.experimental import pallas as pl
from jax.experimental.pallas import tpu as pltpu

IN0, HID, OUT = 784, 200, 10   # fixed by the module definition
HID_P = 256                    # hidden padded to a lane multiple (zeros)


def _mlp_kernel(x_ref, w1_ref, b1_ref, w2_ref, b2_ref, w3_ref, b3_ref, o_ref):
    # All refs carry a leading "sample chunk" dim of size C selected by the grid.
    x = x_ref[...]                                              # (C, E, 784) bf16
    h1 = jnp.einsum("cef,cfh->ceh", x, w1_ref[...],
                    preferred_element_type=jnp.float32) + b1_ref[...]
    h1 = jnp.maximum(h1, 0.0).astype(jnp.bfloat16)              # ReLU, bf16 for MXU
    h2 = jnp.einsum("ceh,chk->cek", h1, w2_ref[...],
                    preferred_element_type=jnp.float32) + b2_ref[...]
    h2 = jnp.maximum(h2, 0.0).astype(jnp.bfloat16)
    logits = jnp.einsum("cek,cko->ceo", h2, w3_ref[...],
                        preferred_element_type=jnp.float32) + b3_ref[...]
    # log_softmax over last dim (f32)
    m = jnp.max(logits, axis=-1, keepdims=True)
    z = logits - m
    lse = jnp.log(jnp.sum(jnp.exp(z), axis=-1, keepdims=True))
    o_ref[...] = (z - lse).astype(o_ref.dtype)


def _sample_chunk(S):
    """Largest chunk in {4,2} that divides S while keeping grid >= 2."""
    for c in (4, 2):
        if S % c == 0 and S // c >= 2:
            return c
    return 1


def svi_mnist_mlp_forward(x, params):
    """x: [E, S, ...] (e.g. [E, S, 1, 28, 28]); returns [E, S, 10] log-probs."""
    E, S = x.shape[0], x.shape[1]
    w1, b1, w2, b2, w3, b3 = params

    x_flat = x.reshape(E, S, -1)
    assert x_flat.shape[-1] == IN0
    # sample-major + bf16; under jit this fuses into a single small copy.
    x_se = jnp.transpose(x_flat, (1, 0, 2)).astype(jnp.bfloat16)   # [S, E, 784]

    C = _sample_chunk(S)
    grid = (S // C,)

    out = pl.pallas_call(
        _mlp_kernel,
        out_shape=jax.ShapeDtypeStruct((S, E, OUT), jnp.float32),
        grid_spec=pltpu.PrefetchScalarGridSpec(
            num_scalar_prefetch=0,
            grid=grid,
            in_specs=[
                pl.BlockSpec((C, E, IN0), lambda c: (c, 0, 0)),      # x
                pl.BlockSpec((C, IN0, HID_P), lambda c: (c, 0, 0)),  # W1
                pl.BlockSpec((C, 1, HID_P), lambda c: (c, 0, 0)),    # b1
                pl.BlockSpec((C, HID_P, HID_P), lambda c: (c, 0, 0)),# W2
                pl.BlockSpec((C, 1, HID_P), lambda c: (c, 0, 0)),    # b2
                pl.BlockSpec((C, HID_P, OUT), lambda c: (c, 0, 0)),  # W3
                pl.BlockSpec((C, 1, OUT), lambda c: (c, 0, 0)),      # b3
            ],
            out_specs=pl.BlockSpec((C, E, OUT), lambda c: (c, 0, 0)),
        ),
        compiler_params=pltpu.CompilerParams(
            dimension_semantics=("parallel",)),
    )(x_se, w1, b1, w2, b2, w3, b3)

    return jnp.transpose(out, (1, 0, 2))                           # [E, S, 10]


# ---------------- parameter init + radial variational sampling (glue) -------

def _init_and_sample_svi_linear(key, in_f, out_f, n_samples, initial_rho=-4.0):
    """He-init mus, constant rho=-4, radial variational samples.

    Returns W: [S, in_f, out_f] f32, b: [S, 1, out_f] f32, already sampled per
    variational sample (weight = mu + softplus(rho) * (eps/||eps||) * r)."""
    k_wmu, k_bmu, k_weps, k_wr, k_beps, k_br = jax.random.split(key, 6)
    he_std = jnp.sqrt(2.0 / in_f).astype(jnp.float32)
    w_mu = jax.random.normal(k_wmu, (in_f, out_f), jnp.float32) * he_std
    b_mu = jax.random.normal(k_bmu, (out_f,), jnp.float32) * he_std
    sigma = jax.nn.softplus(jnp.float32(initial_rho))

    # radial noise for weights
    w_eps = jax.random.normal(k_weps, (n_samples, in_f, out_f), jnp.float32)
    w_norm = jnp.linalg.norm(w_eps.reshape(n_samples, -1), axis=1)
    w_eps = w_eps / w_norm[:, None, None]
    w_r = jax.random.normal(k_wr, (n_samples, 1, 1), jnp.float32)
    w = w_mu[None] + sigma * w_eps * w_r                            # [S, in, out]

    # radial noise for bias
    b_eps = jax.random.normal(k_beps, (n_samples, out_f), jnp.float32)
    b_eps = b_eps / jnp.linalg.norm(b_eps, axis=1, keepdims=True)
    b_r = jax.random.normal(k_br, (n_samples, 1), jnp.float32)
    b = (b_mu[None] + sigma * b_eps * b_r)[:, None, :]              # [S, 1, out]
    return w, b


def make_params(key, n_samples):
    k1, k2, k3 = jax.random.split(key, 3)
    w1, b1 = _init_and_sample_svi_linear(k1, IN0, HID, n_samples)
    w2, b2 = _init_and_sample_svi_linear(k2, HID, HID, n_samples)
    w3, b3 = _init_and_sample_svi_linear(k3, HID, OUT, n_samples)

    pad = HID_P - HID
    # Zero-pad hidden dim 200 -> 256 for lane-dense DMA / aligned MXU tiles.
    w1 = jnp.pad(w1, ((0, 0), (0, 0), (0, pad)))
    b1 = jnp.pad(b1, ((0, 0), (0, 0), (0, pad)))
    w2 = jnp.pad(w2, ((0, 0), (0, pad), (0, pad)))
    b2 = jnp.pad(b2, ((0, 0), (0, 0), (0, pad)))
    w3 = jnp.pad(w3, ((0, 0), (0, pad), (0, 0)))

    # bf16 for HBM storage / DMA (dominant traffic); biases stay f32 (tiny).
    w1 = w1.astype(jnp.bfloat16)
    w2 = w2.astype(jnp.bfloat16)
    w3 = w3.astype(jnp.bfloat16)
    return (w1, b1, w2, b2, w3, b3)


# ---------------- pure-JAX reference (same bf16 math) for validation --------

def _reference_forward(x, params):
    E, S = x.shape[0], x.shape[1]
    w1, b1, w2, b2, w3, b3 = params
    xs = jnp.transpose(x.reshape(E, S, -1), (1, 0, 2)).astype(jnp.bfloat16)
    h1 = jnp.maximum(jnp.einsum("sef,sfh->seh", xs, w1,
                                preferred_element_type=jnp.float32) + b1, 0.0)
    h2 = jnp.maximum(jnp.einsum("seh,shk->sek", h1.astype(jnp.bfloat16), w2,
                                preferred_element_type=jnp.float32) + b2, 0.0)
    lg = jnp.einsum("sek,sko->seo", h2.astype(jnp.bfloat16), w3,
                    preferred_element_type=jnp.float32) + b3
    out = jax.nn.log_softmax(lg, axis=-1)
    return jnp.transpose(out, (1, 0, 2))                            # [E, S, 10]


if __name__ == "__main__":
    key = jax.random.PRNGKey(0)
    k_x, k_p = jax.random.split(key)

    E, S = 2, 8                                   # batch=2, variational samples=8
    x = jax.random.normal(k_x, (E, S, 1, 28, 28), jnp.float32)  # MNIST-like
    params = make_params(k_p, S)

    fwd = jax.jit(svi_mnist_mlp_forward)
    out = jax.block_until_ready(fwd(x, params))

    assert out.shape == (E, S, OUT)
    # log_softmax sanity: rows sum to 1 in prob space
    assert bool(jnp.all(jnp.abs(jnp.sum(jnp.exp(out), axis=-1) - 1.0) < 1e-4))
    # match the pure-JAX bf16 reference
    ref = _reference_forward(x, params)
    assert bool(jnp.max(jnp.abs(out - ref)) < 1e-2)
    print("KERNEL_OK")
</pallas_src>

<mosaic_0001>
module attributes {stable_mosaic.version = 11 : i64} {
  func.func @_mlp_kernel(%arg0: i32, %arg1: memref<4x2x784xbf16, #tpu.memory_space<vmem>>, %arg2: memref<4x784x256xbf16, #tpu.memory_space<vmem>>, %arg3: memref<4x1x256xf32, #tpu.memory_space<vmem>>, %arg4: memref<4x256x256xbf16, #tpu.memory_space<vmem>>, %arg5: memref<4x1x256xf32, #tpu.memory_space<vmem>>, %arg6: memref<4x256x10xbf16, #tpu.memory_space<vmem>>, %arg7: memref<4x1x10xf32, #tpu.memory_space<vmem>>, %arg8: memref<4x2x10xf32, #tpu.memory_space<vmem>>) attributes {dimension_semantics = [#tpu.dimension_semantics<parallel>], iteration_bounds = array<i64: 2>, scalar_prefetch = 0 : i64, scratch_operands = 0 : i64, tpu.core_type = #tpu.core_type<tc>, window_params = [{transform_indices = @transform_0, window_bounds = array<i64: 4, 2, 784>}, {transform_indices = @transform_1, window_bounds = array<i64: 4, 784, 256>}, {transform_indices = @transform_2, window_bounds = array<i64: 4, 1, 256>}, {transform_indices = @transform_3, window_bounds = array<i64: 4, 256, 256>}, {transform_indices = @transform_4, window_bounds = array<i64: 4, 1, 256>}, {transform_indices = @transform_5, window_bounds = array<i64: 4, 256, 10>}, {transform_indices = @transform_6, window_bounds = array<i64: 4, 1, 10>}, {transform_indices = @transform_7, window_bounds = array<i64: 4, 2, 10>}]} {
    %c0 = arith.constant 0 : index
    %c0_0 = arith.constant 0 : index
    %c0_1 = arith.constant 0 : index
    %0 = vector.load %arg1[%c0, %c0_0, %c0_1] : memref<4x2x784xbf16, #tpu.memory_space<vmem>>, vector<4x2x784xbf16>
    %c0_2 = arith.constant 0 : index
    %c0_3 = arith.constant 0 : index
    %c0_4 = arith.constant 0 : index
    %1 = vector.load %arg2[%c0_2, %c0_3, %c0_4] : memref<4x784x256xbf16, #tpu.memory_space<vmem>>, vector<4x784x256xbf16>
    "tpu.trace_start"() <{level = 10 : i32, message = "cef,cfh->ceh"}> : () -> ()
    %cst = arith.constant dense<0.000000e+00> : vector<4x2x256xf32>
    %2 = tpu.matmul %0, %1, %cst {dimension_numbers = #tpu.dot_dimension_numbers<[2], [1], [1], [2], [0, 0, 0, 1, 1, 2], [0], [0]>} : vector<4x2x784xbf16>, vector<4x784x256xbf16>, vector<4x2x256xf32> -> vector<4x2x256xf32>
    "tpu.trace_stop"() : () -> ()
    %c0_5 = arith.constant 0 : index
    %c0_6 = arith.constant 0 : index
    %c0_7 = arith.constant 0 : index
    %3 = vector.load %arg3[%c0_5, %c0_6, %c0_7] : memref<4x1x256xf32, #tpu.memory_space<vmem>>, vector<4x1x256xf32>
    %4 = vector.broadcast %3 : vector<4x1x256xf32> to vector<4x2x256xf32>
    %5 = arith.addf %2, %4 : vector<4x2x256xf32>
    %cst_8 = arith.constant 0.000000e+00 : f32
    %6 = vector.broadcast %cst_8 : f32 to vector<4x2x256xf32>
    %7 = arith.maximumf %5, %6 : vector<4x2x256xf32>
    %8 = arith.truncf %7 : vector<4x2x256xf32> to vector<4x2x256xbf16>
    %c0_9 = arith.constant 0 : index
    %c0_10 = arith.constant 0 : index
    %c0_11 = arith.constant 0 : index
    %9 = vector.load %arg4[%c0_9, %c0_10, %c0_11] : memref<4x256x256xbf16, #tpu.memory_space<vmem>>, vector<4x256x256xbf16>
    "tpu.trace_start"() <{level = 10 : i32, message = "ceh,chk->cek"}> : () -> ()
    %cst_12 = arith.constant dense<0.000000e+00> : vector<4x2x256xf32>
    %10 = tpu.matmul %8, %9, %cst_12 {dimension_numbers = #tpu.dot_dimension_numbers<[2], [1], [1], [2], [0, 0, 0, 1, 1, 2], [0], [0]>} : vector<4x2x256xbf16>, vector<4x256x256xbf16>, vector<4x2x256xf32> -> vector<4x2x256xf32>
    "tpu.trace_stop"() : () -> ()
    %c0_13 = arith.constant 0 : index
    %c0_14 = arith.constant 0 : index
    %c0_15 = arith.constant 0 : index
    %11 = vector.load %arg5[%c0_13, %c0_14, %c0_15] : memref<4x1x256xf32, #tpu.memory_space<vmem>>, vector<4x1x256xf32>
    %12 = vector.broadcast %11 : vector<4x1x256xf32> to vector<4x2x256xf32>
    %13 = arith.addf %10, %12 : vector<4x2x256xf32>
    %cst_16 = arith.constant 0.000000e+00 : f32
    %14 = vector.broadcast %cst_16 : f32 to vector<4x2x256xf32>
    %15 = arith.maximumf %13, %14 : vector<4x2x256xf32>
    %16 = arith.truncf %15 : vector<4x2x256xf32> to vector<4x2x256xbf16>
    %c0_17 = arith.constant 0 : index
    %c0_18 = arith.constant 0 : index
    %c0_19 = arith.constant 0 : index
    %17 = vector.load %arg6[%c0_17, %c0_18, %c0_19] : memref<4x256x10xbf16, #tpu.memory_space<vmem>>, vector<4x256x10xbf16>
    "tpu.trace_start"() <{level = 10 : i32, message = "cek,cko->ceo"}> : () -> ()
    %cst_20 = arith.constant dense<0.000000e+00> : vector<4x2x10xf32>
    %18 = tpu.matmul %16, %17, %cst_20 {dimension_numbers = #tpu.dot_dimension_numbers<[2], [1], [1], [2], [0, 0, 0, 1, 1, 2], [0], [0]>} : vector<4x2x256xbf16>, vector<4x256x10xbf16>, vector<4x2x10xf32> -> vector<4x2x10xf32>
    "tpu.trace_stop"() : () -> ()
    %c0_21 = arith.constant 0 : index
    %c0_22 = arith.constant 0 : index
    %c0_23 = arith.constant 0 : index
    %19 = vector.load %arg7[%c0_21, %c0_22, %c0_23] : memref<4x1x10xf32, #tpu.memory_space<vmem>>, vector<4x1x10xf32>
    %20 = vector.broadcast %19 : vector<4x1x10xf32> to vector<4x2x10xf32>
    %21 = arith.addf %18, %20 : vector<4x2x10xf32>
    %cst_24 = arith.constant dense<0xFF800000> : vector<4x2xf32>
    %22 = vector.multi_reduction <maximumf>, %21, %cst_24 [2] : vector<4x2x10xf32> to vector<4x2xf32>
    %23 = vector.shape_cast %22 : vector<4x2xf32> to vector<4x2x1xf32>
    %24 = vector.broadcast %23 : vector<4x2x1xf32> to vector<4x2x10xf32>
    %25 = arith.subf %21, %24 : vector<4x2x10xf32>
    %26 = math.exp %25 : vector<4x2x10xf32>
    %cst_25 = arith.constant dense<0.000000e+00> : vector<4x2xf32>
    %27 = vector.multi_reduction <add>, %26, %cst_25 [2] : vector<4x2x10xf32> to vector<4x2xf32>
    %28 = vector.shape_cast %27 : vector<4x2xf32> to vector<4x2x1xf32>
    %29 = math.log %28 : vector<4x2x1xf32>
    %30 = vector.broadcast %29 : vector<4x2x1xf32> to vector<4x2x10xf32>
    %31 = arith.subf %25, %30 : vector<4x2x10xf32>
    %c0_26 = arith.constant 0 : index
    %c0_27 = arith.constant 0 : index
    %c0_28 = arith.constant 0 : index
    %32 = vector.load %arg8[%c0_26, %c0_27, %c0_28] : memref<4x2x10xf32, #tpu.memory_space<vmem>>, vector<4x2x10xf32>
    tpu.vector_store %arg8[%c0_26, %c0_27, %c0_28], %31 {strides = array<i32>} : memref<4x2x10xf32, #tpu.memory_space<vmem>>, vector<4x2x10xf32>,
    return
  }
  func.func @transform_0(%arg0: i32) -> (i32, i32, i32) {
    %c0_i32 = arith.constant 0 : i32
    %c0_i32_0 = arith.constant 0 : i32
    %c0_i32_1 = arith.constant 0 : i32
    return %arg0, %c0_i32, %c0_i32_0 : i32, i32, i32
  }
  func.func @transform_1(%arg0: i32) -> (i32, i32, i32) {
    %c0_i32 = arith.constant 0 : i32
    %c0_i32_0 = arith.constant 0 : i32
    %c0_i32_1 = arith.constant 0 : i32
    return %arg0, %c0_i32, %c0_i32_0 : i32, i32, i32
  }
  func.func @transform_2(%arg0: i32) -> (i32, i32, i32) {
    %c0_i32 = arith.constant 0 : i32
    %c0_i32_0 = arith.constant 0 : i32
    %c0_i32_1 = arith.constant 0 : i32
    return %arg0, %c0_i32, %c0_i32_0 : i32, i32, i32
  }
  func.func @transform_3(%arg0: i32) -> (i32, i32, i32) {
    %c0_i32 = arith.constant 0 : i32
    %c0_i32_0 = arith.constant 0 : i32
    %c0_i32_1 = arith.constant 0 : i32
    return %arg0, %c0_i32, %c0_i32_0 : i32, i32, i32
  }
  func.func @transform_4(%arg0: i32) -> (i32, i32, i32) {
    %c0_i32 = arith.constant 0 : i32
    %c0_i32_0 = arith.constant 0 : i32
    %c0_i32_1 = arith.constant 0 : i32
    return %arg0, %c0_i32, %c0_i32_0 : i32, i32, i32
  }
  func.func @transform_5(%arg0: i32) -> (i32, i32, i32) {
    %c0_i32 = arith.constant 0 : i32
    %c0_i32_0 = arith.constant 0 : i32
    %c0_i32_1 = arith.constant 0 : i32
    return %arg0, %c0_i32, %c0_i32_0 : i32, i32, i32
  }
  func.func @transform_6(%arg0: i32) -> (i32, i32, i32) {
    %c0_i32 = arith.constant 0 : i32
    %c0_i32_0 = arith.constant 0 : i32
    %c0_i32_1 = arith.constant 0 : i32
    return %arg0, %c0_i32, %c0_i32_0 : i32, i32, i32
  }
  func.func @transform_7(%arg0: i32) -> (i32, i32, i32) {
    %c0_i32 = arith.constant 0 : i32
    %c0_i32_0 = arith.constant 0 : i32
    %c0_i32_1 = arith.constant 0 : i32
    return %arg0, %c0_i32, %c0_i32_0 : i32, i32, i32
  }
}

</mosaic_0001>

<bundles_post_ra>
// kernel: svi_mnist_mlp_forward.1
= control target key start
LH: loop header
LB: loop body
LE: loop exit
PB: predicated region body
PF: predicated region fallthrough
CT: control target
= control target key end

     0   :  { %s10509_s0 = inlined_call_operand.vmem [shape: bf16[8,2,784], index: 0, kind: input, shape index: {}]   ;;  %s10510_s1 = inlined_call_operand.hbm [shape: bf16[8,784,256], index: 1, kind: input, shape index: {}]   ;;  %s10511_s2 = inlined_call_operand.hbm [shape: f32[8,1,256], index: 2, kind: input, shape index: {}]   ;;  %s10512_s3 = inlined_call_operand.hbm [shape: bf16[8,256,256], index: 3, kind: input, shape index: {}]   ;;  %s10513_s4 = inlined_call_operand.hbm [shape: f32[8,1,256], index: 4, kind: input, shape index: {}]   ;;  %s10514_s5 = inlined_call_operand.vmem [shape: bf16[8,256,10], index: 5, kind: input, shape index: {}]   ;;  %s10515_s6 = inlined_call_operand.hbm [shape: f32[8,1,10], index: 6, kind: input, shape index: {}]   ;;  %s10516_s7 = inlined_call_operand.vmem [shape: f32[8,2,10], index: 7, kind: output, shape index: {}]  }
   0x1   :  { %10522 = sst [smem:[#allocation16_spill]] %s10510_s1 }
   0x2   :  { %10523 = sst [smem:[#allocation17_spill]] %s10511_s2 }
   0x3   :  { %10524 = sst [smem:[#allocation18_spill]] %s10513_s4 }
   0x4   :  { %10525 = sst [smem:[#allocation19_spill]] %s10516_s7 }
   0x5   :  { %12 = vsyncpa [#allocation3], 0 }
   0x6   :  { %14 = vsyncpa [#allocation3 + $0x1], 0 }
   0x7   :  { %15 = vsyncpa [#allocation5], 0 }
   0x8   :  { %17 = vsyncpa [#allocation5 + $0x1], 0 }
   0x9   :  { %18 = vsyncpa [#allocation8], 0 }
   0xa   :  { %20 = vsyncpa [#allocation8 + $0x1], 0  ;;  %s8931_s24 = smov 0   ;;  %s8933_s25 = smov 0  }
   0xb   :  { %s8935_s26 = smov 0   ;;  %s8937_s27 = smov 0  }
   0xc LB: > { %10526 = sst [smem:[#allocation13_spill]] %s8879_s26  ;;  %s8950_s28 = sadd.s32 4294967295, %s8883_s27   ;;  %s8883_s27 = sphi %s8937_s27, %s10540_s27   ;;  %s8879_s26 = sphi %s8935_s26, %s10542_s26   ;;  %s8875_s25 = sphi %s8933_s25, %s10544_s25   ;;  %s8871_s24 = sphi %s8931_s24, %s10543_s24  }
   0xd   : > { %s8953_s29 = sadd.s32 1, %s8883_s27   ;;  %s59_s8 = sadd.s32 1, %s8879_s26 }
   0xe   : > { %10527 = sst [smem:[#allocation14_spill]] %s8953_s29  ;;  %s56_s30 = ssub.s32 %s8883_s27, %s8953_s29 }
   0xf   : > { %p57_p0 = scmp.eq.s32.totalorder %s56_s30, 0  ;;  %p66_p1 = scmp.ne.s32.totalorder %s8879_s26, %s8875_s25 }
  0x10   : > { %p67_p2 = scmp.eq.s32.totalorder %s8883_s27, 0  ;;  %p72_p3 = scmp.ne.s32.totalorder %s8875_s25, %s8871_s24 }
  0x11   : > { %s8963_s9 = scalar_select %p57_p0, %s8879_s26, %s59_s8  }
  0x12   : > { %p68_p4 = por %p67_p2, %p66_p1  ;;  %p73_p5 = scmp.eq.s32.totalorder %s8950_s28, 0 }
  0x13   : > { %10528 = sst [smem:[#allocation15_spill]] %s8963_s9  ;;  %p8632_p6 = scmp.lt.s32.totalorder %s8883_s27, 2 }
  0x14   : > { %p8967_p7 = por %p73_p5, %p72_p3  ;;  %s8972_s11 = sand.u32 1, %s8879_s26  }
  0x15   : > { %p8974_p8 = pnand %p8632_p6, %p68_p4  ;;  %s10517_s13 = sand.u32 1, %s8883_s27  }
  0x16   : > { %s10518_s14 = sshll.u32 %s8972_s11, 3  ;;  %s8013_s15 = sshll.u32 %s8883_s27, 3 }
  0x17   : > { %s288_s16 = scalar_lea.vmem [#allocation4], %s10518_s14  ;;  %s10531_s2 = sld [smem:[#allocation17_spill]] }
  0x18   : > { %s296_s17 = sshll.u32 %s288_s16, 4  ;;  %s8988_s22 = scalar_lea.sflag [#allocation5], %s10517_s13  ;;  %s297_s17 = int_to_ptr.vmem [resolvable:$true] %s296_s17 }
  0x19   : > { %p8992_p10 = pneg %p8974_p8 }
  0x1d   : > { %s293_s20 = scalar_lea.hbm %s10531_s2, %s8013_s15  ;;  %s8698_s18 = scalar_lea.hbm %s10531_s2, 16 }
  0x1e   : > { %s294_s21 = sshll.u32 %s293_s20, 4  ;;  %s295_s21 = int_to_ptr.hbm [resolvable:$true] %s294_s21 }
  0x1f   : > { %s8691_s23 = sshra.s32 %s295_s21, 4  ;;  %s8692_s23 = int_to_ptr.hbm [resolvable:$true] %s8691_s23 }
  0x20   : > { %s8693_s24 = scalar_lea.hbm %s8692_s23, 8  ;;  %p8699_p13 = scmp.lt.s32.totalorder %s8692_s23, %s10531_s2 }
  0x21   : > { %p8694_p9 = scmp.ne.s32.totalorder %s8692_s23, %s8693_s24  ;;  %p8700_p0 = scmp.lt.s32.totalorder %s8698_s18, %s8693_s24 }
  0x23   : > { %p8696_p11 = pnand %p8992_p10, %p8694_p9  ;;  %p8701_p1 = por %p8700_p0, %p8699_p13 }
  0x25   : > { %p8697_p12 = pneg %p8696_p11 }
  0x27   : > { %p8702_p2 = pnand %p8701_p1, %p8697_p12 }
  0x29   : > { %8705 = shalt.err (!%p8702_p2)
}
  0x2a   : > { %s8885_s13 = smov 32   ;;  %s8886_s14 = smov 2  }
  0x2b   : > { %8622 = dma.hbm_to_vmem [thread:$0]  (!%p8974_p8), %s295_s21, 128, %s297_s17, %s8988_s22, %s8885_s13, %s8885_s13, %s8886_s14  }
  0x2c   : > { %p5656_p3 = scmp.ge.s32.totalorder %s8883_s27, 1  ;;  %p380_p4 = scmp.lt.s32.totalorder %s8883_s27, 3 }
  0x2d   : > { %s10534_s4 = sld [smem:[#allocation18_spill]]  ;;  %s10535_s19 = sshll.u32 %s8972_s11, 3 }
  0x2e   : > { %p9009_p5 = pnand %p5656_p3, %p380_p4  ;;  %s333_s20 = scalar_lea.vmem [#allocation7], %s10535_s19 }
  0x2f   : > { %s341_s2 = sshll.u32 %s333_s20, 4  ;;  %s10536_s9 = sand.u32 1, %s8883_s27   ;;  %s342_s2 = int_to_ptr.vmem [resolvable:$true] %s341_s2 }
  0x30   : > { %s9020_s26 = scalar_lea.sflag [#allocation8], %s10536_s9 }
  0x33   : > { %s338_s16 = scalar_lea.hbm %s10534_s4, %s8013_s15  ;;  %s8728_s15 = scalar_lea.hbm %s10534_s4, 16 }
  0x34   : > { %s339_s18 = sshll.u32 %s338_s16, 4  ;;  %s340_s18 = int_to_ptr.hbm [resolvable:$true] %s339_s18 }
  0x35   : > { %s8721_s17 = sshra.s32 %s340_s18, 4  ;;  %s8722_s17 = int_to_ptr.hbm [resolvable:$true] %s8721_s17 }
  0x36   : > { %s8723_s21 = scalar_lea.hbm %s8722_s17, 8  ;;  %p8729_p12 = scmp.lt.s32.totalorder %s8722_s17, %s10534_s4 }
  0x37   : > { %p8724_p6 = scmp.ne.s32.totalorder %s8722_s17, %s8723_s21  ;;  %p8730_p13 = scmp.lt.s32.totalorder %s8728_s15, %s8723_s21 }
  0x39   : > { %p8726_p9 = pnand %p8724_p6, %p8992_p10  ;;  %p8731_p0 = por %p8730_p13, %p8729_p12 }
  0x3b   : > { %p8727_p11 = pneg %p8726_p9 }
  0x3d   : > { %p8732_p1 = pnand %p8731_p0, %p8727_p11 }
  0x3f   : > { %8735 = shalt.err (!%p8732_p1)
}
  0x40   : > { %8628 = dma.hbm_to_vmem [thread:$0]  (!%p8974_p8), %s340_s18, 128, %s342_s2, %s9020_s26, %s8885_s13, %s8885_s13, %s8886_s14  }
  0x41   : > { %s8602_s9 = smul.u32 3136, %s8972_s11  ;;  %s10537_s1 = sld [smem:[#allocation16_spill]] }
  0x42   : > { %s8603_s7 = smul.u32 3136, %s8883_s27  ;;  %s5647_s15 = sshll.u32 %s8972_s11, 10 }
  0x43   : > { %s265_s20 = scalar_lea.vmem [#allocation2], %s8602_s9  ;;  %s262_s23 = scalar_lea.sflag [#allocation3], %s8972_s11 }
  0x44   : > { %s274_s17 = sshll.u32 %s265_s20, 4  ;;  %s275_s17 = int_to_ptr.vmem [resolvable:$true] %s274_s17 }
  0x47   : > { %s271_s19 = scalar_lea.hbm %s10537_s1, %s8603_s7  ;;  %s8758_s14 = scalar_lea.hbm %s10537_s1, 6272 }
  0x48   : > { %s272_s21 = sshll.u32 %s271_s19, 4  ;;  %s273_s21 = int_to_ptr.hbm [resolvable:$true] %s272_s21 }
  0x49   : > { %s8751_s24 = sshra.s32 %s273_s21, 4  ;;  %s8752_s24 = int_to_ptr.hbm [resolvable:$true] %s8751_s24 }
  0x4a   : > { %s8753_s4 = scalar_lea.hbm %s8752_s24, 3136  ;;  %p8759_p6 = scmp.lt.s32.totalorder %s8752_s24, %s10537_s1 }
  0x4b   : > { %p8754_p2 = scmp.ne.s32.totalorder %s8752_s24, %s8753_s4  ;;  %p8760_p9 = scmp.lt.s32.totalorder %s8758_s14, %s8753_s4 }
  0x4d   : > { %p8756_p3 = pnand %p8754_p2, %p8992_p10  ;;  %p8761_p11 = por %p8760_p9, %p8759_p6 }
  0x4f   : > { %p8757_p4 = pneg %p8756_p3 }
  0x51   : > { %p8762_p12 = pnand %p8761_p11, %p8757_p4 }
  0x53   : > { %8765 = shalt.err (!%p8762_p12)
}
  0x54   : > { %s8887_s9 = smov 128   ;;  %s8888_s29 = smov 8  }
  0x55   : > { %8619 = dma.hbm_to_vmem [thread:$0]  (!%p8974_p8), %s273_s21, 50176, %s275_s17, %s262_s23, %s8887_s9, %s8887_s9, %s8888_s29  }
  0x56   : > { %s8015_s16 = sshll.u32 %s8883_s27, 10  ;;  %s310_s13 = scalar_lea.vmem [#allocation6], %s5647_s15 }
  0x57   : > { %s316_s2 = scalar_lea.hbm %s10512_s3, %s8015_s16  ;;  %s319_s18 = sshll.u32 %s310_s13, 4  ;;  %s320_s18 = int_to_ptr.vmem [resolvable:$true] %s319_s18 }
  0x58   : > { %s317_s24 = sshll.u32 %s316_s2, 4  ;;  %s5654_s4 = sshll.u32 %s8972_s11, 2  ;;  %s318_s24 = int_to_ptr.hbm [resolvable:$true] %s317_s24 }
  0x59   : > { %s8781_s14 = sshra.s32 %s318_s24, 4  ;;  %s8788_s21 = scalar_lea.hbm %s10512_s3, 2048  ;;  %s8782_s14 = int_to_ptr.hbm [resolvable:$true] %s8781_s14 }
  0x5a   : > { %s8783_s7 = scalar_lea.hbm %s8782_s14, 1024  ;;  %p8789_p2 = scmp.lt.s32.totalorder %s8782_s14, %s10512_s3 }
  0x5b   : > { %p8784_p13 = scmp.ne.s32.totalorder %s8782_s14, %s8783_s7  ;;  %p8790_p3 = scmp.lt.s32.totalorder %s8788_s21, %s8783_s7 }
  0x5d   : > { %p8786_p0 = pnand %p8784_p13, %p8992_p10  ;;  %p8791_p4 = por %p8790_p3, %p8789_p2 }
  0x5f   : > { %p8787_p1 = pneg %p8786_p0 }
  0x61   : > { %p8792_p6 = pnand %p8791_p4, %p8787_p1 }
  0x63   : > { %8795 = shalt.err (!%p8792_p6)
}
  0x64   : > { %8625 = dma.hbm_to_vmem [thread:$0]  (!%p8974_p8), %s318_s24, 16384, %s320_s18, %s8988_s22, %s8887_s9, %s8887_s9, %s8888_s29  }
  0x65   : > { %s5655_s11 = sshll.u32 %s8883_s27, 2  ;;  %s365_s20 = scalar_lea.vmem [#allocation9], %s5654_s4 }
  0x66   : > { %s369_s1 = scalar_lea.hbm %s10515_s6, %s5655_s11  ;;  %s372_s2 = sshll.u32 %s365_s20, 4  ;;  %s373_s2 = int_to_ptr.vmem [resolvable:$true] %s372_s2 }
  0x67   : > { %s370_s13 = sshll.u32 %s369_s1, 4  ;;  %s8818_s27 = scalar_lea.hbm %s10515_s6, 8  ;;  %s371_s13 = int_to_ptr.hbm [resolvable:$true] %s370_s13 }
  0x68   : > { %s8811_s14 = sshra.s32 %s371_s13, 4  ;;  %s8812_s14 = int_to_ptr.hbm [resolvable:$true] %s8811_s14 }
  0x69   : > { %s8813_s7 = scalar_lea.hbm %s8812_s14, 4  ;;  %p8819_p13 = scmp.lt.s32.totalorder %s8812_s14, %s10515_s6 }
  0x6a   : > { %p8814_p9 = scmp.ne.s32.totalorder %s8812_s14, %s8813_s7  ;;  %p8820_p0 = scmp.lt.s32.totalorder %s8818_s27, %s8813_s7 }
  0x6c   : > { %p8816_p11 = pnand %p8814_p9, %p8992_p10  ;;  %p8821_p1 = por %p8820_p0, %p8819_p13 }
  0x6e   : > { %p8817_p12 = pneg %p8816_p11 }
  0x70   : > { %p8822_p2 = pnand %p8821_p1, %p8817_p12 }
  0x72   : > { %8825 = shalt.err (!%p8822_p2)
}
  0x73   : > { %s8889_s29 = smov 16   ;;  %s8890_s18 = smov 1  }
  0x74   : > { %8631 = dma.hbm_to_vmem [thread:$0]  (!%p8974_p8), %s371_s13, 64, %s373_s2, %s9020_s26, %s8889_s29, %s8889_s29, %s8890_s18  }
  0x75   : > { %384 = sbr.rel (%p9009_p5) target bundleno = 1212 (0x4bc), region = 48  ;;  %s9084_s30 = sand.u32 (!%p9009_p5), 1, %s8875_s25  }
  0x76   : > { %s8604_s24 = smul.u32 (!%p9009_p5), 3136, %s9084_s30  ;;  %s387_s4 = scalar_lea.sflag (!%p9009_p5), [#allocation3], %s9084_s30 }
  0x78   : > { %s9088_s23 = scalar_lea.vmem (!%p9009_p5), [#allocation2], %s8604_s24 }
  0x7a   : > { %8858 = dma.done.wait (%p8967_p7), %s387_s4, 50176  }
  0x7b   : > { %8860 = vsyncadd (%p8967_p7), %s387_s4, 4294917120  ;;  %s396_s26 = sand.u32 1, %s8950_s28   ;;  %s5657_s12 = sshll.u32 %s9084_s30, 3 }
  0x7c   : > { %s397_s8 = scalar_lea.sflag [#allocation5], %s396_s26  ;;  %s9096_s19 = scalar_lea.vmem [#allocation4], %s5657_s12 }
  0x7d   : > { %8862 = dma.done.wait (%p8967_p7), %s397_s8, 16512  }
  0x7e   : > { %8864 = vsyncadd (%p8967_p7), %s397_s8, 4294950784  ;;  %s5658_s11 = sshll.u32 %s9084_s30, 10  ;;  %s417_s16 = scalar_lea.sflag [#allocation8], %s396_s26 }
  0x7f   : > { %s9103_s15 = scalar_lea.vmem [#allocation6], %s5658_s11  ;;  %s9105_s1 = scalar_lea.vmem [#allocation7], %s5657_s12 }
  0x80   : > { %8866 = dma.done.wait (%p8967_p7), %s417_s16, 192  }
  0x81   : > { %8868 = vsyncadd (%p8967_p7), %s417_s16, 4294967104  ;;  %s5661_s20 = sshll.u32 %s8950_s28, 2  ;;  %v5725_v0 = vld [vmem:[%s9088_s23 + $0x70] sm:$0xf]  ;;  %v8033_v1 = vld [vmem:[%s9088_s23 + $0x74] sm:$0xf0] }
  0x82   : > { %p9114_p8 = scmp.lt.s32.totalorder %s5661_s20, 7  ;;  %v5789_v2 = vld [vmem:[%s9088_s23 + $0xf0] sm:$0xf]  ;;  %v5726_v3 = vor.u32 %v8033_v1, %v5725_v0  ;;  %v8049_v4 = vld [vmem:[%s9088_s23 + $0xf4] sm:$0xf0]  ;;  %vm1443_vm0 = vcmask 130048  }
  0x83   : > { %v5853_v5 = vld [vmem:[%s9088_s23 + $0x170] sm:$0xf]  ;;  %v8065_v6 = vld [vmem:[%s9088_s23 + $0x174] sm:$0xf0]  ;;  %v5790_v7 = vor.u32 %v8049_v4, %v5789_v2  ;;  %v5717_v11 = vld [vmem:[%s9088_s23 + $0x60] sm:$0xf] }
  0x84   : > { %v5854_v8 = vor.u32 %v8065_v6, %v5853_v5  ;;  %v5917_v9 = vld [vmem:[%s9088_s23 + $0x1f0] sm:$0xf]  ;;  %v8081_v10 = vld [vmem:[%s9088_s23 + $0x1f4] sm:$0xf0]  ;;  %1446 = vmatpush.bf16.msra.mxu0 %v5726_v3  ;;  %v8031_v13 = vld [vmem:[%s9088_s23 + $0x64] sm:$0xf0] }
  0x85   : > { %v5918_v12 = vor.u32 %v8081_v10, %v5917_v9  ;;  %v5781_v14 = vld [vmem:[%s9088_s23 + $0xe0] sm:$0xf]  ;;  %v8047_v15 = vld [vmem:[%s9088_s23 + $0xe4] sm:$0xf0]  ;;  %1459 = vmatpush.bf16.msra.mxu1 %v5790_v7  ;;  %v5718_v16 = vor.u32 %v8031_v13, %v5717_v11  ;;  %v5709_v23 = vld [vmem:[%s9088_s23 + $0x50] sm:$0xf] }
  0x86   : > { %1472 = vmatpush.bf16.msra.mxu2 %v5854_v8  ;;  %v5782_v17 = vor.u32 %v8047_v15, %v5781_v14  ;;  %v5845_v18 = vld [vmem:[%s9088_s23 + $0x160] sm:$0xf]  ;;  %v8063_v19 = vld [vmem:[%s9088_s23 + $0x164] sm:$0xf0]  ;;  %v8029_v24 = vld [vmem:[%s9088_s23 + $0x54] sm:$0xf0] }
  0x87   : > { %v5909_v20 = vld [vmem:[%s9088_s23 + $0x1e0] sm:$0xf]  ;;  %1485 = vmatpush.bf16.msra.mxu3 %v5918_v12  ;;  %v5846_v21 = vor.u32 %v8063_v19, %v5845_v18  ;;  %v8079_v22 = vld [vmem:[%s9088_s23 + $0x1e4] sm:$0xf0]  ;;  %v5773_v26 = vld [vmem:[%s9088_s23 + $0xd0] sm:$0xf]  ;;  %v5710_v29 = vor.u32 %v8029_v24, %v5709_v23 }
  0x88   : > { %v5910_v25 = vor.u32 %v8079_v22, %v5909_v20  ;;  %v8045_v27 = vld [vmem:[%s9088_s23 + $0xd4] sm:$0xf0]  ;;  %v5837_v28 = vld [vmem:[%s9088_s23 + $0x150] sm:$0xf]  ;;  %1447 = vmatpush.bf16.msra.mxu0 %v5718_v16  ;;  %v5701_v35 = vld [vmem:[%s9088_s23 + $0x40] sm:$0xf] }
  0x89   : > { %v8061_v30 = vld [vmem:[%s9088_s23 + $0x154] sm:$0xf0]  ;;  %v5901_v31 = vld [vmem:[%s9088_s23 + $0x1d0] sm:$0xf]  ;;  %1460 = vmatpush.bf16.msra.mxu1 %v5782_v17  ;;  %v5774_v33 = vor.u32 %v8045_v27, %v5773_v26  ;;  %v8027_v36 = vld [vmem:[%s9088_s23 + $0x44] sm:$0xf0] }
  0x8a   : > { %v8077_v32 = vld [vmem:[%s9088_s23 + $0x1d4] sm:$0xf0]  ;;  %1473 = vmatpush.bf16.msra.mxu2 %v5846_v21  ;;  %v5838_v34 = vor.u32 %v8061_v30, %v5837_v28  ;;  %v5765_v37 = vld [vmem:[%s9088_s23 + $0xc0] sm:$0xf]  ;;  %v8043_v39 = vld [vmem:[%s9088_s23 + $0xc4] sm:$0xf0]  ;;  %v5702_v44 = vor.u32 %v8027_v36, %v5701_v35 }
  0x8b   : > { %1486 = vmatpush.bf16.msra.mxu3 %v5910_v25  ;;  %v5902_v38 = vor.u32 %v8077_v32, %v5901_v31  ;;  %v5829_v40 = vld [vmem:[%s9088_s23 + $0x140] sm:$0xf]  ;;  %v8059_v41 = vld [vmem:[%s9088_s23 + $0x144] sm:$0xf0]  ;;  %s10546_s20 = smov (!%p9114_p8, %s5661_s20), 7  ;;  %v5766_v45 = vor.u32 %v8043_v39, %v5765_v37  ;;  %s5660_s22 = sshll.u32 %s9084_s30, 2 }
  0x8c   : > { %v5893_v42 = vld [vmem:[%s9088_s23 + $0x1c0] sm:$0xf]  ;;  %v8075_v43 = vld [vmem:[%s9088_s23 + $0x1c4] sm:$0xf0]  ;;  %1448 = vmatpush.bf16.msra.mxu0 %v5710_v29  ;;  %v5830_v46 = vor.u32 %v8059_v41, %v5829_v40  ;;  %v5693_v47 = vld [vmem:[%s9088_s23 + $0x30] sm:$0xf] }
  0x8d   : > { %1461 = vmatpush.bf16.msra.mxu1 %v5774_v33  ;;  %v8025_v48 = vld [vmem:[%s9088_s23 + $0x34] sm:$0xf0]  ;;  %v5757_v49 = vld [vmem:[%s9088_s23 + $0xb0] sm:$0xf]  ;;  %v5894_v50 = vor.u32 %v8075_v43, %v5893_v42  ;;  %s8605_s28 = smul.u32 7, %s10546_s20  ;;  %s8017_s7 = sshll.u32 %s10546_s20, 7 }
  0x8e   : > { %1474 = vmatpush.bf16.msra.mxu2 %v5838_v34  ;;  %v8041_v51 = vld [vmem:[%s9088_s23 + $0xb4] sm:$0xf0]  ;;  %v5821_v52 = vld [vmem:[%s9088_s23 + $0x130] sm:$0xf]  ;;  %v5694_v56 = vor.u32 %v8025_v48, %v5693_v47  ;;  %v5685_v59 = vld [vmem:[%s9088_s23 + $0x20] sm:$0xf]  ;;  %s10382_s27 = scalar_lea.vmem %s10514_s5, %s8017_s7 }
  0x8f   : > { %1487 = vmatpush.bf16.msra.mxu3 %v5902_v38  ;;  %v8057_v53 = vld [vmem:[%s9088_s23 + $0x134] sm:$0xf0]  ;;  %v5885_v54 = vld [vmem:[%s9088_s23 + $0x1b0] sm:$0xf]  ;;  %v5758_v57 = vor.u32 %v8041_v51, %v5757_v49  ;;  %v8023_v60 = vld [vmem:[%s9088_s23 + $0x24] sm:$0xf0]  ;;  %s9179_s14 = scalar_lea.vmem %s10509_s0, %s8605_s28 }
  0x90   : > { %v8073_v55 = vld [vmem:[%s9088_s23 + $0x1b4] sm:$0xf0]  ;;  %1449 = vmatpush.bf16.msra.mxu0 %v5702_v44  ;;  %v5822_v58 = vor.u32 %v8057_v53, %v5821_v52  ;;  %v5749_v61 = vld [vmem:[%s9088_s23 + $0xa0] sm:$0xf]  ;;  %v8039_v63 = vld [vmem:[%s9088_s23 + $0xa4] sm:$0xf0]  ;;  %v5686_v4 = vor.u32 %v8023_v60, %v5685_v59 }
  0x91   : > { %1462 = vmatpush.bf16.msra.mxu1 %v5766_v45  ;;  %v5886_v62 = vor.u32 %v8073_v55, %v5885_v54  ;;  %v5813_v0 = vld [vmem:[%s9088_s23 + $0x120] sm:$0xf]  ;;  %v8055_v1 = vld [vmem:[%s9088_s23 + $0x124] sm:$0xf0]  ;;  %v5750_v5 = vor.u32 %v8039_v63, %v5749_v61  ;;  %v5677_v7 = vld [vmem:[%s9088_s23 + $0x10] sm:$0xf] }
  0x92   : > { %1475 = vmatpush.bf16.msra.mxu2 %v5830_v46  ;;  %v5877_v2 = vld [vmem:[%s9088_s23 + $0x1a0] sm:$0xf]  ;;  %v8071_v3 = vld [vmem:[%s9088_s23 + $0x1a4] sm:$0xf0]  ;;  %v5814_v6 = vor.u32 %v8055_v1, %v5813_v0  ;;  %v8021_v8 = vld [vmem:[%s9088_s23 + $0x14] sm:$0xf0] }
  0x93   : > { %1488 = vmatpush.bf16.msra.mxu3 %v5894_v50  ;;  %v5741_v9 = vld [vmem:[%s9088_s23 + $0x90] sm:$0xf]  ;;  %v5878_v10 = vor.u32 %v8071_v3, %v5877_v2  ;;  %v8037_v11 = vld [vmem:[%s9088_s23 + $0x94] sm:$0xf0]  ;;  %v5669_v16 = vld [vmem:[%s9088_s23] sm:$0xf]  ;;  %v5678_v17 = vor.u32 %v8021_v8, %v5677_v7 }
  0x94   : > { %1450 = vmatpush.bf16.msra.mxu0 %v5694_v56  ;;  %v5805_v12 = vld [vmem:[%s9088_s23 + $0x110] sm:$0xf]  ;;  %v8053_v13 = vld [vmem:[%s9088_s23 + $0x114] sm:$0xf0]  ;;  %v8019_v18 = vld [vmem:[%s9088_s23 + $0x4] sm:$0xf0]  ;;  %v5742_v21 = vor.u32 %v8037_v11, %v5741_v9 }
  0x95   : > { %1463 = vmatpush.bf16.msra.mxu1 %v5758_v57  ;;  %v5869_v14 = vld [vmem:[%s9088_s23 + $0x190] sm:$0xf]  ;;  %v8069_v15 = vld [vmem:[%s9088_s23 + $0x194] sm:$0xf0]  ;;  %v5733_v19 = vld [vmem:[%s9088_s23 + $0x80] sm:$0xf]  ;;  %v5806_v22 = vor.u32 %v8053_v13, %v5805_v12  ;;  %v5670_v32 = vor.u32 %v8019_v18, %v5669_v16 }
  0x96   : > { %1476 = vmatpush.bf16.msra.mxu2 %v5822_v58  ;;  %v518_v20 = vld [vmem:[%s9179_s14] sm:$0x7f]  ;;  %v8035_v23 = vld [vmem:[%s9088_s23 + $0x84] sm:$0xf0]  ;;  %v5797_v24 = vld [vmem:[%s9088_s23 + $0x100] sm:$0xf]  ;;  %v5870_v25 = vor.u32 %v8069_v15, %v5869_v14 }
  0x97   : > { %1489 = vmatpush.bf16.msra.mxu3 %v5886_v62  ;;  %939 = vst [vmem:[#allocation1] ss:$9 sm:$0xff] %v518_v20  ;;  %v8051_v26 = vld [vmem:[%s9088_s23 + $0x104] sm:$0xf0]  ;;  %v5861_v27 = vld [vmem:[%s9088_s23 + $0x180] sm:$0xf]  ;;  %v5734_v36 = vor.u32 %v8035_v23, %v5733_v19 }
  0x98   : > { %1451 = vmatpush.bf16.msra.mxu0 %v5686_v4  ;;  %v8067_v28 = vld [vmem:[%s9088_s23 + $0x184] sm:$0xf0]  ;;  %v5981_v29 = vld [vmem:[%s9088_s23 + $0x270] sm:$0xf]  ;;  %v8097_v30 = vld [vmem:[%s9088_s23 + $0x274] sm:$0xf0]  ;;  %v5798_v37 = vor.u32 %v8051_v26, %v5797_v24 }
  0x99   : > { %1464 = vmatpush.bf16.msra.mxu1 %v5750_v5  ;;  %v6045_v31 = vld [vmem:[%s9088_s23 + $0x2f0] sm:$0xf]  ;;  %v8113_v33 = vld [vmem:[%s9088_s23 + $0x2f4] sm:$0xf0]  ;;  %v8032_v34 = vld [vmem:[%s9088_s23 + $0x74] sm:$0xf]  ;;  %v5862_v39 = vor.u32 %v8067_v28, %v5861_v27  ;;  %v5982_v40 = vor.u32 %v8097_v30, %v5981_v29 }
  0x9a   : > { %1477 = vmatpush.bf16.msra.mxu2 %v5814_v6  ;;  %v5727_v35 = vld [vmem:[%s9088_s23 + $0x78] sm:$0xf0]  ;;  %v6053_v38 = vld [vmem:[%s9088_s23 + $0x300] sm:$0xf]  ;;  %v8115_v41 = vld [vmem:[%s9088_s23 + $0x304] sm:$0xf0]  ;;  %v6046_v44 = vor.u32 %v8113_v33, %v6045_v31 }
  0x9b   : > { %1490 = vmatpush.bf16.msra.mxu3 %v5878_v10  ;;  %v8048_v42 = vld [vmem:[%s9088_s23 + $0xf4] sm:$0xf]  ;;  %v5791_v43 = vld [vmem:[%s9088_s23 + $0xf8] sm:$0xf0]  ;;  %v5730_v45 = vor.u32 %v8032_v34, %v5727_v35  ;;  %v5973_v46 = vld [vmem:[%s9088_s23 + $0x260] sm:$0xf]  ;;  %v6054_v53 = vor.u32 %v8115_v41, %v6053_v38 }
  0x9c   : > { %1452 = vmatpush.bf16.msra.mxu0 %v5678_v17  ;;  %v8095_v47 = vld [vmem:[%s9088_s23 + $0x264] sm:$0xf0]  ;;  %v6037_v48 = vld [vmem:[%s9088_s23 + $0x2e0] sm:$0xf]  ;;  %v8030_v50 = vld [vmem:[%s9088_s23 + $0x64] sm:$0xf]  ;;  %v5794_v55 = vor.u32 %v8048_v42, %v5791_v43 }
  0x9d   : > { %1465 = vmatpush.bf16.msra.mxu1 %v5742_v21  ;;  %v8111_v49 = vld [vmem:[%s9088_s23 + $0x2e4] sm:$0xf0]  ;;  %v5719_v51 = vld [vmem:[%s9088_s23 + $0x68] sm:$0xf0]  ;;  %v5974_v56 = vor.u32 %v8095_v47, %v5973_v46  ;;  %v8046_v57 = vld [vmem:[%s9088_s23 + $0xe4] sm:$0xf] }
  0x9e   : > { %1478 = vmatpush.bf16.msra.mxu2 %v5806_v22  ;;  %v9211_v52 = vld [vmem:[#allocation1 + $0x12] sm:$0xff]  ;;  %v9213_v54 = vld [vmem:[#allocation1] sm:$0xff]  ;;  %v6038_v60 = vor.u32 %v8111_v49, %v6037_v48  ;;  %v5722_v61 = vor.u32 %v8030_v50, %v5719_v51  ;;  %v8028_v2 = vld [vmem:[%s9088_s23 + $0x54] sm:$0xf]  ;;  %s10443_s9 = scalar_lea.vmem [#allocation9], %s5660_s22  ;;  %vm5407_vm1 = vcmask 74752  }
  0x9f   : > { %1491 = vmatpush.bf16.msra.mxu3 %v5870_v25  ;;  %v5783_v58 = vld [vmem:[%s9088_s23 + $0xe8] sm:$0xf0]  ;;  %v9217_v59 = vld [vmem:[#allocation1 + $0x1b] sm:$0xff]  ;;  %v5711_v3 = vld [vmem:[%s9088_s23 + $0x58] sm:$0xf0]  ;;  %s5666_s29 = sshll.u32 %s10546_s20, 1 }
  0xa0   : > { %1453 = vmatpush.bf16.msra.mxu0 %v5670_v32  ;;  %v5965_v62 = vld [vmem:[%s9088_s23 + $0x250] sm:$0xf]  ;;  %v8093_v63 = vld [vmem:[%s9088_s23 + $0x254] sm:$0xf0]  ;;  %v9228_v4 = vld [vmem:[#allocation1 + $0x9] sm:$0xff]  ;;  %v5786_v5 = vor.u32 %v8046_v57, %v5783_v58  ;;  %v5714_v10 = vor.u32 %v8028_v2, %v5711_v3  ;;  %s10539_s24 = sld [smem:[#allocation19_spill]] }
  0xa1   : > { %1466 = vmatpush.bf16.msra.mxu1 %v5734_v36  ;;  %v6029_v0 = vld [vmem:[%s9088_s23 + $0x2d0] sm:$0xf]  ;;  %v8109_v1 = vld [vmem:[%s9088_s23 + $0x2d4] sm:$0xf0]  ;;  %v5966_v6 = vor.u32 %v8093_v63, %v5965_v62  ;;  %v8044_v7 = vld [vmem:[%s9088_s23 + $0xd4] sm:$0xf] }
  0xa2   : > { %1479 = vmatpush.bf16.msra.mxu2 %v5798_v37  ;;  %v5775_v8 = vld [vmem:[%s9088_s23 + $0xd8] sm:$0xf0]  ;;  %v6030_v9 = vor.u32 %v8109_v1, %v6029_v0  ;;  %v5957_v11 = vld [vmem:[%s9088_s23 + $0x240] sm:$0xf]  ;;  %v8091_v12 = vld [vmem:[%s9088_s23 + $0x244] sm:$0xf0] }
  0xa3   : > { %1492 = vmatpush.bf16.msra.mxu3 %v5862_v39  ;;  %1454 = vmatmul.bf16.vlgmr.msra.gmra.mxu0 %v9213_v54  ;;  %v6021_v13 = vld [vmem:[%s9088_s23 + $0x2c0] sm:$0xf]  ;;  %v8107_v14 = vld [vmem:[%s9088_s23 + $0x2c4] sm:$0xf0]  ;;  %v8026_v15 = vld [vmem:[%s9088_s23 + $0x44] sm:$0xf]  ;;  %v5778_v17 = vor.u32 %v8044_v7, %v5775_v8  ;;  %v5958_v18 = vor.u32 %v8091_v12, %v5957_v11 }
  0xa4   : > { %1498 = vmatpush.bf16.msrb.mxu0 %v5982_v40  ;;  %1467 = vmatmul.bf16.vlgmr.msra.gmra.mxu1 %v9228_v4  ;;  %v5703_v16 = vld [vmem:[%s9088_s23 + $0x48] sm:$0xf0]  ;;  %v8042_v19 = vld [vmem:[%s9088_s23 + $0xc4] sm:$0xf]  ;;  %v6022_v21 = vor.u32 %v8107_v14, %v6021_v13  ;;  %v5949_v23 = vld [vmem:[%s9088_s23 + $0x230] sm:$0xf] }
  0xa5   : > { %1511 = vmatpush.bf16.msrb.mxu1 %v6046_v44  ;;  %1480 = vmatmul.bf16.vlgmr.msra.gmra.mxu2 %v9211_v52  ;;  %v5767_v20 = vld [vmem:[%s9088_s23 + $0xc8] sm:$0xf0]  ;;  %v5706_v22 = vor.u32 %v8026_v15, %v5703_v16  ;;  %v8089_v24 = vld [vmem:[%s9088_s23 + $0x234] sm:$0xf0]  ;;  %v6013_v25 = vld [vmem:[%s9088_s23 + $0x2b0] sm:$0xf] }
  0xa6   : > { %1531 = vmatpush.bf16.msrb.mxu2 %v6054_v53  ;;  %1493 = vmatmul.bf16.vlgmr.msra.gmra.mxu3 %v9217_v59  ;;  %v8105_v26 = vld [vmem:[%s9088_s23 + $0x2b4] sm:$0xf0]  ;;  %v8024_v27 = vld [vmem:[%s9088_s23 + $0x34] sm:$0xf]  ;;  %v5695_v28 = vld [vmem:[%s9088_s23 + $0x38] sm:$0xf0]  ;;  %v5770_v30 = vor.u32 %v8042_v19, %v5767_v20  ;;  %v5950_v31 = vor.u32 %v8089_v24, %v5949_v23  ;;  %s515_s4 = scalar_lea.vmem %s10539_s24, %s5666_s29 }
  0xa7   : > { %1537 = vmatpush.bf16.msrb.mxu3 %v5730_v45  ;;  %v519_v29 = vld [vmem:[%s9179_s14 + $0x7] sm:$0x7f]  ;;  %v8040_v32 = vld [vmem:[%s9088_s23 + $0xb4] sm:$0xf]  ;;  %v6014_v34 = vor.u32 %v8105_v26, %v6013_v25  ;;  %v5698_v35 = vor.u32 %v8024_v27, %v5695_v28  ;;  %v8087_v37 = vld [vmem:[%s9088_s23 + $0x224] sm:$0xf0] }
  0xa8   : > { %1499 = vmatpush.bf16.msrb.mxu0 %v5974_v56  ;;  %v5759_v33 = vld [vmem:[%s9088_s23 + $0xb8] sm:$0xf0]  ;;  %v5941_v36 = vld [vmem:[%s9088_s23 + $0x220] sm:$0xf]  ;;  %v8103_v39 = vld [vmem:[%s9088_s23 + $0x2a4] sm:$0xf0] }
  0xa9   : > { %1512 = vmatpush.bf16.msrb.mxu1 %v6038_v60  ;;  %v6005_v38 = vld [vmem:[%s9088_s23 + $0x2a0] sm:$0xf]  ;;  %v8022_v40 = vld [vmem:[%s9088_s23 + $0x24] sm:$0xf]  ;;  %v5687_v41 = vld [vmem:[%s9088_s23 + $0x28] sm:$0xf0]  ;;  %v5762_v45 = vor.u32 %v8040_v32, %v5759_v33  ;;  %v5942_v46 = vor.u32 %v8087_v37, %v5941_v36 }
  0xaa   : > { %1550 = vmatpush.bf16.msra.mxu2 %v5794_v55  ;;  %v8038_v42 = vld [vmem:[%s9088_s23 + $0xa4] sm:$0xf]  ;;  %v5751_v43 = vld [vmem:[%s9088_s23 + $0xa8] sm:$0xf0]  ;;  %v5933_v47 = vld [vmem:[%s9088_s23 + $0x210] sm:$0xf]  ;;  %v6006_v50 = vor.u32 %v8103_v39, %v6005_v38  ;;  %v5690_v51 = vor.u32 %v8022_v40, %v5687_v41 }
  0xab   : > { %1538 = vmatpush.bf16.msrb.mxu3 %v5722_v61  ;;  %v9258_v44 = vld [vmem:[#allocation1 + $0x36] sm:$0xff]  ;;  %v9261_v48 = vld [vmem:[#allocation1 + $0x24] sm:$0xff]  ;;  %v9263_v49 = vld [vmem:[#allocation1 + $0x2d] sm:$0xff]  ;;  %v5754_v60 = vor.u32 %v8038_v42, %v5751_v43 }
  0xac   : > { %1500 = vmatpush.bf16.msrb.mxu0 %v5966_v6  ;;  %v8085_v53 = vld [vmem:[%s9088_s23 + $0x214] sm:$0xf0]  ;;  %v5997_v55 = vld [vmem:[%s9088_s23 + $0x290] sm:$0xf]  ;;  %1629 = vst [vmem:[#allocation1] ss:$9 sm:$0xff] %v519_v29 }
  0xad   : > { %1513 = vmatpush.bf16.msrb.mxu1 %v6030_v9  ;;  %v8101_v56 = vld [vmem:[%s9088_s23 + $0x294] sm:$0xf0]  ;;  %v8020_v57 = vld [vmem:[%s9088_s23 + $0x14] sm:$0xf]  ;;  %v5679_v58 = vld [vmem:[%s9088_s23 + $0x18] sm:$0xf0]  ;;  %v5934_v61 = vor.u32 %v8085_v53, %v5933_v47 }
  0xae   : > { %1551 = vmatpush.bf16.msra.mxu2 %v5786_v5  ;;  %v8036_v62 = vld [vmem:[%s9088_s23 + $0x94] sm:$0xf]  ;;  %v5743_v63 = vld [vmem:[%s9088_s23 + $0x98] sm:$0xf0]  ;;  %v5925_v0 = vld [vmem:[%s9088_s23 + $0x200] sm:$0xf]  ;;  %v5998_v1 = vor.u32 %v8101_v56, %v5997_v55  ;;  %v5682_v2 = vor.u32 %v8020_v57, %v5679_v58 }
  0xaf   : > { %1539 = vmatpush.bf16.msrb.mxu3 %v5714_v10  ;;  %v8083_v3 = vld [vmem:[%s9088_s23 + $0x204] sm:$0xf0]  ;;  %v5989_v5 = vld [vmem:[%s9088_s23 + $0x280] sm:$0xf]  ;;  %v8018_v7 = vld [vmem:[%s9088_s23 + $0x4] sm:$0xf]  ;;  %v5746_v13 = vor.u32 %v8036_v62, %v5743_v63 }
  0xb0   : > { %1501 = vmatpush.bf16.msrb.mxu0 %v5958_v18  ;;  %v8099_v6 = vld [vmem:[%s9088_s23 + $0x284] sm:$0xf0]  ;;  %v5671_v8 = vld [vmem:[%s9088_s23 + $0x8] sm:$0xf0]  ;;  %v8064_v9 = vld [vmem:[%s9088_s23 + $0x174] sm:$0xf]  ;;  %v5926_v14 = vor.u32 %v8083_v3, %v5925_v0 }
  0xb1   : > { %1514 = vmatpush.bf16.msrb.mxu1 %v6022_v21  ;;  %v5855_v10 = vld [vmem:[%s9088_s23 + $0x178] sm:$0xf0]  ;;  %v8080_v11 = vld [vmem:[%s9088_s23 + $0x1f4] sm:$0xf]  ;;  %v5674_v18 = vor.u32 %v8018_v7, %v5671_v8  ;;  %v8034_v19 = vld [vmem:[%s9088_s23 + $0x84] sm:$0xf] }
  0xb2   : > { %1552 = vmatpush.bf16.msra.mxu2 %v5778_v17  ;;  %v5919_v12 = vld [vmem:[%s9088_s23 + $0x1f8] sm:$0xf0]  ;;  %v8096_v15 = vld [vmem:[%s9088_s23 + $0x274] sm:$0xf]  ;;  %v5990_v17 = vor.u32 %v8099_v6, %v5989_v5  ;;  %v5735_v20 = vld [vmem:[%s9088_s23 + $0x88] sm:$0xf0]  ;;  %v5858_v21 = vor.u32 %v8064_v9, %v5855_v10 }
  0xb3   : > { %1540 = vmatpush.bf16.msrb.mxu3 %v5706_v22  ;;  %v5983_v16 = vld [vmem:[%s9088_s23 + $0x278] sm:$0xf0]  ;;  %v5922_v22 = vor.u32 %v8080_v11, %v5919_v12  ;;  %v8112_v23 = vld [vmem:[%s9088_s23 + $0x2f4] sm:$0xf]  ;;  %v8062_v25 = vld [vmem:[%s9088_s23 + $0x164] sm:$0xf] }
  0xb4   : > { %1502 = vmatpush.bf16.msrb.mxu0 %v5950_v31  ;;  %v6047_v24 = vld [vmem:[%s9088_s23 + $0x2f8] sm:$0xf0]  ;;  %v5986_v26 = vor.u32 %v8096_v15, %v5983_v16  ;;  %v5847_v27 = vld [vmem:[%s9088_s23 + $0x168] sm:$0xf0]  ;;  %v8078_v28 = vld [vmem:[%s9088_s23 + $0x1e4] sm:$0xf] }
  0xb5   : > { %1515 = vmatpush.bf16.msrb.mxu1 %v6014_v34  ;;  %6059 = vmatmul.msk.bf16.vlgmr.msrb.gmra.mxu2 %vm1443_vm0, %v9258_v44  ;;  %v5911_v29 = vld [vmem:[%s9088_s23 + $0x1e8] sm:$0xf0]  ;;  %v8094_v31 = vld [vmem:[%s9088_s23 + $0x264] sm:$0xf]  ;;  %v6050_v33 = vor.u32 %v8112_v23, %v6047_v24  ;;  %v5850_v34 = vor.u32 %v8062_v25, %v5847_v27  ;;  %v8060_v38 = vld [vmem:[%s9088_s23 + $0x154] sm:$0xf] }
  0xb6   : > { %1553 = vmatpush.bf16.msra.mxu2 %v5770_v30  ;;  %v5738_v30 = vor.u32 %v8034_v19, %v5735_v20  ;;  %v5975_v32 = vld [vmem:[%s9088_s23 + $0x268] sm:$0xf0]  ;;  %v8110_v36 = vld [vmem:[%s9088_s23 + $0x2e4] sm:$0xf]  ;;  %v5839_v40 = vld [vmem:[%s9088_s23 + $0x158] sm:$0xf0] }
  0xb7   : > { %1541 = vmatpush.bf16.msrb.mxu3 %v5698_v35  ;;  %v5914_v35 = vor.u32 %v8078_v28, %v5911_v29  ;;  %v6039_v37 = vld [vmem:[%s9088_s23 + $0x2e8] sm:$0xf0]  ;;  %v5978_v39 = vor.u32 %v8094_v31, %v5975_v32  ;;  %v8076_v41 = vld [vmem:[%s9088_s23 + $0x1d4] sm:$0xf]  ;;  %v5903_v42 = vld [vmem:[%s9088_s23 + $0x1d8] sm:$0xf0]  ;;  %v5842_v47 = vor.u32 %v8060_v38, %v5839_v40 }
  0xb8   : > { %1503 = vmatpush.bf16.msrb.mxu0 %v5942_v46  ;;  %v8092_v43 = vld [vmem:[%s9088_s23 + $0x254] sm:$0xf]  ;;  %v6042_v46 = vor.u32 %v8110_v36, %v6039_v37  ;;  %v6031_v53 = vld [vmem:[%s9088_s23 + $0x2d8] sm:$0xf0]  ;;  %v8058_v55 = vld [vmem:[%s9088_s23 + $0x144] sm:$0xf] }
  0xb9   : > { %1516 = vmatpush.bf16.msrb.mxu1 %v6006_v50  ;;  %v5906_v50 = vor.u32 %v8076_v41, %v5903_v42  ;;  %v5831_v57 = vld [vmem:[%s9088_s23 + $0x148] sm:$0xf0]  ;;  %v8074_v58 = vld [vmem:[%s9088_s23 + $0x1c4] sm:$0xf]  ;;  %v8056_v3 = vld [vmem:[%s9088_s23 + $0x134] sm:$0xf] }
  0xba   : > { %1554 = vmatpush.bf16.msra.mxu2 %v5762_v45  ;;  %v5967_v45 = vld [vmem:[%s9088_s23 + $0x258] sm:$0xf0]  ;;  %v5834_v63 = vor.u32 %v8058_v55, %v5831_v57  ;;  %v8072_v6 = vld [vmem:[%s9088_s23 + $0x1b4] sm:$0xf]  ;;  %v8054_v15 = vld [vmem:[%s9088_s23 + $0x124] sm:$0xf] }
  0xbb   : > { %1542 = vmatpush.bf16.msrb.mxu3 %v5690_v51  ;;  %v8108_v51 = vld [vmem:[%s9088_s23 + $0x2d4] sm:$0xf]  ;;  %v5970_v56 = vor.u32 %v8092_v43, %v5967_v45  ;;  %v5887_v7 = vld [vmem:[%s9088_s23 + $0x1b8] sm:$0xf0]  ;;  %v5879_v19 = vld [vmem:[%s9088_s23 + $0x1a8] sm:$0xf0] }
  0xbc   : > { %1504 = vmatpush.bf16.msrb.mxu0 %v5934_v61  ;;  %v5959_v61 = vld [vmem:[%s9088_s23 + $0x248] sm:$0xf0]  ;;  %v6034_v62 = vor.u32 %v8108_v51, %v6031_v53  ;;  %v8088_v8 = vld [vmem:[%s9088_s23 + $0x234] sm:$0xf]  ;;  %v5951_v9 = vld [vmem:[%s9088_s23 + $0x238] sm:$0xf0]  ;;  %v5890_v12 = vor.u32 %v8072_v6, %v5887_v7 }
  0xbd   : > { %1517 = vmatpush.bf16.msrb.mxu1 %v5998_v1  ;;  %v8106_v1 = vld [vmem:[%s9088_s23 + $0x2c4] sm:$0xf]  ;;  %v5954_v16 = vor.u32 %v8088_v8, %v5951_v9  ;;  %v8052_v27 = vld [vmem:[%s9088_s23 + $0x114] sm:$0xf]  ;;  %v5807_v29 = vld [vmem:[%s9088_s23 + $0x118] sm:$0xf0] }
  0xbe   : > { %1555 = vmatpush.bf16.msra.mxu2 %v5754_v60  ;;  %v5895_v60 = vld [vmem:[%s9088_s23 + $0x1c8] sm:$0xf0]  ;;  %v8086_v20 = vld [vmem:[%s9088_s23 + $0x224] sm:$0xf]  ;;  %v5871_v31 = vld [vmem:[%s9088_s23 + $0x198] sm:$0xf0]  ;;  %v5810_v37 = vor.u32 %v8052_v27, %v5807_v29 }
  0xbf   : > { %1543 = vmatpush.bf16.msrb.mxu3 %v5682_v2  ;;  %v5898_v0 = vor.u32 %v8074_v58, %v5895_v60  ;;  %v6023_v2 = vld [vmem:[%s9088_s23 + $0x2c8] sm:$0xf0]  ;;  %v8102_v25 = vld [vmem:[%s9088_s23 + $0x2a4] sm:$0xf]  ;;  %v8084_v32 = vld [vmem:[%s9088_s23 + $0x214] sm:$0xf] }
  0xc0   : > { %1505 = vmatpush.bf16.msrb.mxu0 %v5926_v14  ;;  %v6026_v10 = vor.u32 %v8106_v1, %v6023_v2  ;;  %v6015_v14 = vld [vmem:[%s9088_s23 + $0x2b8] sm:$0xf0]  ;;  %v5799_v40 = vld [vmem:[%s9088_s23 + $0x108] sm:$0xf0]  ;;  %v8066_v41 = vld [vmem:[%s9088_s23 + $0x184] sm:$0xf] }
  0xc1   : > { %1518 = vmatpush.bf16.msrb.mxu1 %v5990_v17  ;;  %v5815_v17 = vld [vmem:[%s9088_s23 + $0x128] sm:$0xf0]  ;;  %v5999_v36 = vld [vmem:[%s9088_s23 + $0x298] sm:$0xf0]  ;;  %v8082_v45 = vld [vmem:[%s9088_s23 + $0x204] sm:$0xf] }
  0xc2   : > { %1556 = vmatpush.bf16.msra.mxu2 %v5746_v13  ;;  %v8104_v13 = vld [vmem:[%s9088_s23 + $0x2b4] sm:$0xf]  ;;  %v5818_v23 = vor.u32 %v8054_v15, %v5815_v17  ;;  %v5863_v43 = vld [vmem:[%s9088_s23 + $0x188] sm:$0xf0]  ;;  %v6247_v51 = vld [vmem:[%s9088_s23 + $0x480] sm:$0xf] }
  0xc3   : > { %1544 = vmatpush.bf16.msrb.mxu3 %v5674_v18  ;;  %1506 = vmatmul.bf16.vlgmr.msrb.gmra.mxu0 %v9261_v48  ;;  %v8070_v18 = vld [vmem:[%s9088_s23 + $0x1a4] sm:$0xf]  ;;  %v8163_v55 = vld [vmem:[%s9088_s23 + $0x484] sm:$0xf0]  ;;  %v6055_v57 = vld [vmem:[%s9088_s23 + $0x308] sm:$0xf0]  ;;  %v5866_v60 = vor.u32 %v8066_v41, %v5863_v43 }
  0xc4   : > { %1563 = vmatpush.bf16.msra.mxu0 %v5858_v21  ;;  %1519 = vmatmul.bf16.vlgmr.msrb.gmra.mxu1 %v9263_v49  ;;  %v5943_v21 = vld [vmem:[%s9088_s23 + $0x228] sm:$0xf0]  ;;  %v5882_v24 = vor.u32 %v8070_v18, %v5879_v19  ;;  %v8179_v1 = vld [vmem:[%s9088_s23 + $0x504] sm:$0xf0]  ;;  %v6248_v2 = vor.u32 %v8163_v55, %v6247_v51  ;;  %v6111_v6 = vld [vmem:[%s9088_s23 + $0x370] sm:$0xf] }
  0xc5   : > { %1576 = vmatpush.bf16.msra.mxu1 %v5922_v22  ;;  %v6018_v22 = vor.u32 %v8104_v13, %v6015_v14  ;;  %v5946_v28 = vor.u32 %v8086_v20, %v5943_v21  ;;  %v8129_v8 = vld [vmem:[%s9088_s23 + $0x374] sm:$0xf0]  ;;  %v6239_v9 = vld [vmem:[%s9088_s23 + $0x470] sm:$0xf]  ;;  %v6103_v19 = vld [vmem:[%s9088_s23 + $0x360] sm:$0xf] }
  0xc6   : > { %1557 = vmatpush.bf16.msra.mxu2 %v5738_v30  ;;  %1545 = vmatmul.bf16.vlgmr.msrb.gmra.mxu3 %v9213_v54  ;;  %v8090_v54 = vld [vmem:[%s9088_s23 + $0x244] sm:$0xf]  ;;  %v8068_v30 = vld [vmem:[%s9088_s23 + $0x194] sm:$0xf]  ;;  %v6303_v13 = vld [vmem:[%s9088_s23 + $0x4f0] sm:$0xf]  ;;  %v6112_v15 = vor.u32 %v8129_v8, %v6111_v6 }
  0xc7   : > { %1589 = vmatpush.bf16.msra.mxu3 %v5986_v26  ;;  %v5962_v5 = vor.u32 %v8090_v54, %v5959_v61  ;;  %v6007_v26 = vld [vmem:[%s9088_s23 + $0x2a8] sm:$0xf0]  ;;  %v5874_v38 = vor.u32 %v8068_v30, %v5871_v31  ;;  %v8098_v54 = vld [vmem:[%s9088_s23 + $0x284] sm:$0xf]  ;;  %v8177_v14 = vld [vmem:[%s9088_s23 + $0x4f4] sm:$0xf0] }
  0xc8   : > { %1564 = vmatpush.bf16.msra.mxu0 %v5850_v34  ;;  %v6010_v34 = vor.u32 %v8102_v25, %v6007_v26  ;;  %v5991_v61 = vld [vmem:[%s9088_s23 + $0x288] sm:$0xf0]  ;;  %v6175_v17 = vld [vmem:[%s9088_s23 + $0x3f0] sm:$0xf]  ;;  %v8145_v18 = vld [vmem:[%s9088_s23 + $0x3f4] sm:$0xf0] }
  0xc9   : > { %1577 = vmatpush.bf16.msra.mxu1 %v5914_v35  ;;  %1558 = vmatmul.bf16.vlgmr.msra.gmra.mxu2 %v9228_v4  ;;  %v5823_v4 = vld [vmem:[%s9088_s23 + $0x138] sm:$0xf0]  ;;  %v8100_v35 = vld [vmem:[%s9088_s23 + $0x294] sm:$0xf]  ;;  %v5994_v7 = vor.u32 %v8098_v54, %v5991_v61  ;;  %v8127_v20 = vld [vmem:[%s9088_s23 + $0x364] sm:$0xf0] }
  0xca   : > { %1602 = vmatpush.bf16.msrb.mxu2 %v6050_v33  ;;  %v5826_v11 = vor.u32 %v8056_v3, %v5823_v4  ;;  %v5935_v33 = vld [vmem:[%s9088_s23 + $0x218] sm:$0xf0]  ;;  %v6002_v53 = vor.u32 %v8100_v35, %v5999_v36  ;;  %v8147_v4 = vld [vmem:[%s9088_s23 + $0x404] sm:$0xf0]  ;;  %v6231_v21 = vld [vmem:[%s9088_s23 + $0x460] sm:$0xf]  ;;  %v6104_v26 = vor.u32 %v8127_v20, %v6103_v19 }
  0xcb   : > { %1590 = vmatpush.bf16.msra.mxu3 %v5978_v39  ;;  %v8050_v39 = vld [vmem:[%s9088_s23 + $0x104] sm:$0xf]  ;;  %v5938_v42 = vor.u32 %v8084_v32, %v5935_v33  ;;  %v6295_v25 = vld [vmem:[%s9088_s23 + $0x4e0] sm:$0xf]  ;;  %v8143_v29 = vld [vmem:[%s9088_s23 + $0x3e4] sm:$0xf0] }
  0xcc   : > { %1565 = vmatpush.bf16.msra.mxu0 %v5842_v47  ;;  %v6119_v47 = vld [vmem:[%s9088_s23 + $0x380] sm:$0xf]  ;;  %v5802_v58 = vor.u32 %v8050_v39, %v5799_v40  ;;  %v8125_v30 = vld [vmem:[%s9088_s23 + $0x354] sm:$0xf0]  ;;  %v8123_v40 = vld [vmem:[%s9088_s23 + $0x344] sm:$0xf0] }
  0xcd   : > { %1578 = vmatpush.bf16.msra.mxu1 %v5906_v50  ;;  %v8131_v50 = vld [vmem:[%s9088_s23 + $0x384] sm:$0xf0]  ;;  %v8157_v31 = vld [vmem:[%s9088_s23 + $0x454] sm:$0xf0]  ;;  %v6087_v39 = vld [vmem:[%s9088_s23 + $0x340] sm:$0xf] }
  0xce   : > { %1603 = vmatpush.bf16.msrb.mxu2 %v6042_v46  ;;  %v5927_v46 = vld [vmem:[%s9088_s23 + $0x208] sm:$0xf0]  ;;  %v8173_v35 = vld [vmem:[%s9088_s23 + $0x4d4] sm:$0xf0]  ;;  %v6215_v41 = vld [vmem:[%s9088_s23 + $0x440] sm:$0xf] }
  0xcf   : > { %1591 = vmatpush.bf16.msra.mxu3 %v5970_v56  ;;  %v8114_v56 = vld [vmem:[%s9088_s23 + $0x304] sm:$0xf]  ;;  %v8139_v55 = vld [vmem:[%s9088_s23 + $0x3c4] sm:$0xf0]  ;;  %v6199_v6 = vld [vmem:[%s9088_s23 + $0x420] sm:$0xf] }
  0xd0   : > { %1566 = vmatpush.bf16.msra.mxu0 %v5834_v63  ;;  %v6120_v63 = vor.u32 %v8131_v50, %v6119_v47  ;;  %v6058_v3 = vor.u32 %v8114_v56, %v6055_v57  ;;  %v8171_v47 = vld [vmem:[%s9088_s23 + $0x4c4] sm:$0xf0]  ;;  %v6088_v50 = vor.u32 %v8123_v40, %v6087_v39  ;;  %v6079_v56 = vld [vmem:[%s9088_s23 + $0x330] sm:$0xf]  ;;  %v8121_v57 = vld [vmem:[%s9088_s23 + $0x334] sm:$0xf0] }
  0xd1   : > { %1579 = vmatpush.bf16.msra.mxu1 %v5898_v0  ;;  %v6311_v0 = vld [vmem:[%s9088_s23 + $0x500] sm:$0xf]  ;;  %v9435_v40 = vld [vmem:[#allocation1 + $0x12] sm:$0xff] }
  0xd2   : > { %1604 = vmatpush.bf16.msrb.mxu2 %v6034_v62  ;;  %v5930_v62 = vor.u32 %v8082_v45, %v5927_v46  ;;  %v6279_v46 = vld [vmem:[%s9088_s23 + $0x4c0] sm:$0xf] }
  0xd3   : > { %1592 = vmatpush.bf16.msra.mxu3 %v5962_v5  ;;  %v6183_v5 = vld [vmem:[%s9088_s23 + $0x400] sm:$0xf]  ;;  %v6280_v54 = vor.u32 %v8171_v47, %v6279_v46  ;;  %v8128_v46 = vld [vmem:[%s9088_s23 + $0x374] sm:$0xf]  ;;  %v6113_v47 = vld [vmem:[%s9088_s23 + $0x378] sm:$0xf0] }
  0xd4   : > { %1567 = vmatpush.bf16.msra.mxu0 %v5826_v11  ;;  %v6312_v11 = vor.u32 %v8179_v1, %v6311_v0  ;;  %v6080_v0 = vor.u32 %v8121_v57, %v6079_v56  ;;  %v6375_v19 = vld [vmem:[%s9088_s23 + $0x580] sm:$0xf]  ;;  %v6177_v56 = vld [vmem:[%s9088_s23 + $0x3f8] sm:$0xf0] }
  0xd5   : > { %1580 = vmatpush.bf16.msra.mxu1 %v5890_v12  ;;  %v6184_v12 = vor.u32 %v8147_v4, %v6183_v5  ;;  %v6071_v5 = vld [vmem:[%s9088_s23 + $0x320] sm:$0xf]  ;;  %v8119_v4 = vld [vmem:[%s9088_s23 + $0x324] sm:$0xf0] }
  0xd6   : > { %1605 = vmatpush.bf16.msrb.mxu2 %v6026_v10  ;;  %v8161_v10 = vld [vmem:[%s9088_s23 + $0x474] sm:$0xf0]  ;;  %v6359_v57 = vld [vmem:[%s9088_s23 + $0x560] sm:$0xf] }
  0xd7   : > { %1593 = vmatpush.bf16.msra.mxu3 %v5954_v16  ;;  %v6240_v16 = vor.u32 %v8161_v10, %v6239_v9  ;;  %v6135_v10 = vld [vmem:[%s9088_s23 + $0x3a0] sm:$0xf] }
  0xd8   : > { %1568 = vmatpush.bf16.msra.mxu0 %v5818_v23  ;;  %v6304_v23 = vor.u32 %v8177_v14, %v6303_v13  ;;  %v6072_v13 = vor.u32 %v8119_v4, %v6071_v5 }
  0xd9   : > { %1581 = vmatpush.bf16.msra.mxu1 %v5882_v24  ;;  %v6176_v24 = vor.u32 %v8145_v18, %v6175_v17  ;;  %v6191_v17 = vld [vmem:[%s9088_s23 + $0x410] sm:$0xf]  ;;  %v8149_v18 = vld [vmem:[%s9088_s23 + $0x414] sm:$0xf0] }
  0xda   : > { %1606 = vmatpush.bf16.msrb.mxu2 %v6018_v22  ;;  %v8159_v22 = vld [vmem:[%s9088_s23 + $0x464] sm:$0xf0] }
  0xdb   : > { %1594 = vmatpush.bf16.msra.mxu3 %v5946_v28  ;;  %v6232_v27 = vor.u32 %v8159_v22, %v6231_v21  ;;  %v6167_v28 = vld [vmem:[%s9088_s23 + $0x3e0] sm:$0xf]  ;;  %v8195_v21 = vld [vmem:[%s9088_s23 + $0x584] sm:$0xf0]  ;;  %v6447_v22 = vld [vmem:[%s9088_s23 + $0x610] sm:$0xf] }
  0xdc   : > { %1569 = vmatpush.bf16.msra.mxu0 %v5810_v37  ;;  %v6168_v33 = vor.u32 %v8143_v29, %v6167_v28  ;;  %v6192_v28 = vor.u32 %v8149_v18, %v6191_v17  ;;  %v8133_v29 = vld [vmem:[%s9088_s23 + $0x394] sm:$0xf0]  ;;  %v8124_v17 = vld [vmem:[%s9088_s23 + $0x354] sm:$0xf]  ;;  %v6097_v18 = vld [vmem:[%s9088_s23 + $0x358] sm:$0xf0] }
  0xdd   : > { %1582 = vmatpush.bf16.msra.mxu1 %v5874_v38  ;;  %v8141_v38 = vld [vmem:[%s9088_s23 + $0x3d4] sm:$0xf0] }
  0xde   : > { %1607 = vmatpush.bf16.msrb.mxu2 %v6010_v34  ;;  %v6287_v34 = vld [vmem:[%s9088_s23 + $0x4d0] sm:$0xf] }
  0xdf   : > { %1595 = vmatpush.bf16.msra.mxu3 %v5938_v42  ;;  %v8155_v42 = vld [vmem:[%s9088_s23 + $0x444] sm:$0xf0]  ;;  %v6288_v43 = vor.u32 %v8173_v35, %v6287_v34  ;;  %v8146_v34 = vld [vmem:[%s9088_s23 + $0x404] sm:$0xf] }
  0xe0   : > { %1570 = vmatpush.bf16.msra.mxu0 %v5802_v58  ;;  %v6216_v51 = vor.u32 %v8155_v42, %v6215_v41  ;;  %v6207_v58 = vld [vmem:[%s9088_s23 + $0x430] sm:$0xf] }
  0xe1   : > { %1583 = vmatpush.bf16.msra.mxu1 %v5866_v60  ;;  %v8153_v60 = vld [vmem:[%s9088_s23 + $0x434] sm:$0xf0]  ;;  %v6431_v41 = vld [vmem:[%s9088_s23 + $0x5f0] sm:$0xf] }
  0xe2   : > { %1608 = vmatpush.bf16.msrb.mxu2 %v6002_v53  ;;  %v6151_v53 = vld [vmem:[%s9088_s23 + $0x3c0] sm:$0xf]  ;;  %v6208_v1 = vor.u32 %v8153_v60, %v6207_v58  ;;  %v8191_v58 = vld [vmem:[%s9088_s23 + $0x564] sm:$0xf0]  ;;  %v9447_v60 = vld [vmem:[#allocation1] sm:$0xff] }
  0xe3   : > { %1596 = vmatpush.bf16.msra.mxu3 %v5930_v62  ;;  %1571 = vmatmul.bf16.vlgmr.msra.gmra.mxu0 %v9211_v52  ;;  %v8175_v52 = vld [vmem:[%s9088_s23 + $0x4e4] sm:$0xf0]  ;;  %v6152_v61 = vor.u32 %v8139_v55, %v6151_v53  ;;  %v6271_v62 = vld [vmem:[%s9088_s23 + $0x4b0] sm:$0xf]  ;;  %v8144_v55 = vld [vmem:[%s9088_s23 + $0x3f4] sm:$0xf]  ;;  %v6360_v4 = vor.u32 %v8191_v58, %v6359_v57 }
  0xe4   : > { %2161 = vmatpush.bf16.msrb.mxu0 %v6248_v2  ;;  %1584 = vmatmul.bf16.vlgmr.msra.gmra.mxu1 %v9217_v59  ;;  %v6223_v59 = vld [vmem:[%s9088_s23 + $0x450] sm:$0xf]  ;;  %v6296_v32 = vor.u32 %v8175_v52, %v6295_v25  ;;  %v9441_v53 = vld [vmem:[#allocation1 + $0x9] sm:$0xff]  ;;  %v6180_v5 = vor.u32 %v8144_v55, %v6177_v56  ;;  %v6073_v57 = vld [vmem:[%s9088_s23 + $0x328] sm:$0xf0] }
  0xe5   : > { %2135 = vmatpush.bf16.msrb.mxu1 %v6120_v63  ;;  %v6224_v37 = vor.u32 %v8157_v31, %v6223_v59  ;;  %v8169_v63 = vld [vmem:[%s9088_s23 + $0x4b4] sm:$0xf0]  ;;  %v6143_v2 = vld [vmem:[%s9088_s23 + $0x3b0] sm:$0xf]  ;;  %v6376_v59 = vor.u32 %v8195_v21, %v6375_v19  ;;  %v8140_v19 = vld [vmem:[%s9088_s23 + $0x3d4] sm:$0xf] }
  0xe6   : > { %1609 = vmatpush.bf16.msrb.mxu2 %v5994_v7  ;;  %1597 = vmatmul.bf16.vlgmr.msra.gmra.mxu3 %v9261_v48  ;;  %v6095_v48 = vld [vmem:[%s9088_s23 + $0x350] sm:$0xf]  ;;  %v8151_v7 = vld [vmem:[%s9088_s23 + $0x424] sm:$0xf0]  ;;  %v6272_v8 = vor.u32 %v8169_v63, %v6271_v62  ;;  %v6343_v21 = vld [vmem:[%s9088_s23 + $0x540] sm:$0xf] }
  0xe7   : > { %1622 = vmatpush.bf16.msrb.mxu3 %v6058_v3  ;;  %v6096_v36 = vor.u32 %v8125_v30, %v6095_v48  ;;  %v8137_v3 = vld [vmem:[%s9088_s23 + $0x3b4] sm:$0xf0]  ;;  %v6200_v14 = vor.u32 %v8151_v7, %v6199_v6  ;;  %v6127_v25 = vld [vmem:[%s9088_s23 + $0x390] sm:$0xf]  ;;  %v6439_v48 = vld [vmem:[%s9088_s23 + $0x600] sm:$0xf] }
  0xe8   : > { %2162 = vmatpush.bf16.msrb.mxu0 %v6240_v16  ;;  %v6144_v9 = vor.u32 %v8137_v3, %v6143_v2  ;;  %v8117_v16 = vld [vmem:[%s9088_s23 + $0x314] sm:$0xf0]  ;;  %v6255_v52 = vld [vmem:[%s9088_s23 + $0x490] sm:$0xf]  ;;  %v8211_v30 = vld [vmem:[%s9088_s23 + $0x604] sm:$0xf0]  ;;  %v6128_v39 = vor.u32 %v8133_v29, %v6127_v25 }
  0xe9   : > { %2136 = vmatpush.bf16.msrb.mxu1 %v6112_v15  ;;  %1610 = vmatmul.bf16.vlgmr.msrb.gmra.mxu2 %v9263_v49  ;;  %v6159_v49 = vld [vmem:[%s9088_s23 + $0x3d0] sm:$0xf]  ;;  %v6440_v42 = vor.u32 %v8211_v30, %v6439_v48  ;;  %v9456_v63 = vld [vmem:[#allocation1 + $0x2d] sm:$0xff]  ;;  %v6423_v2 = vld [vmem:[%s9088_s23 + $0x5e0] sm:$0xf] }
  0xea   : > { %2174 = vmatpush.bf16.msra.mxu2 %v6312_v11  ;;  %v6160_v45 = vor.u32 %v8141_v38, %v6159_v49  ;;  %v6263_v11 = vld [vmem:[%s9088_s23 + $0x4a0] sm:$0xf]  ;;  %v6063_v15 = vld [vmem:[%s9088_s23 + $0x310] sm:$0xf]  ;;  %v8193_v49 = vld [vmem:[%s9088_s23 + $0x574] sm:$0xf0] }
  0xeb   : > { %2148 = vmatpush.bf16.msra.mxu3 %v6184_v12  ;;  %v8167_v12 = vld [vmem:[%s9088_s23 + $0x4a4] sm:$0xf0]  ;;  %v9454_v62 = vld [vmem:[#allocation1 + $0x36] sm:$0xff]  ;;  %v8126_v6 = vld [vmem:[%s9088_s23 + $0x364] sm:$0xf] }
  0xec   : > { %2163 = vmatpush.bf16.msrb.mxu0 %v6232_v27  ;;  %v6264_v20 = vor.u32 %v8167_v12, %v6263_v11  ;;  %v6064_v27 = vor.u32 %v8117_v16, %v6063_v15  ;;  %v520_v38 = vld [vmem:[%s9179_s14 + $0xe] sm:$0x7f]  ;;  %v8189_v11 = vld [vmem:[%s9088_s23 + $0x554] sm:$0xf0]  ;;  %v6407_v25 = vld [vmem:[%s9088_s23 + $0x5c0] sm:$0xf] }
  0xed   : > { %2137 = vmatpush.bf16.msrb.mxu1 %v6104_v26  ;;  %v8165_v26 = vld [vmem:[%s9088_s23 + $0x494] sm:$0xf0]  ;;  %v8207_v3 = vld [vmem:[%s9088_s23 + $0x5e4] sm:$0xf0]  ;;  %v6105_v7 = vld [vmem:[%s9088_s23 + $0x368] sm:$0xf0] }
  0xee   : > { %2175 = vmatpush.bf16.msra.mxu2 %v6304_v23  ;;  %v8213_v23 = vld [vmem:[%s9088_s23 + $0x614] sm:$0xf0]  ;;  %v6256_v35 = vor.u32 %v8165_v26, %v6255_v52  ;;  %v6424_v12 = vor.u32 %v8207_v3, %v6423_v2  ;;  %v8203_v52 = vld [vmem:[%s9088_s23 + $0x5c4] sm:$0xf0]  ;;  %v6089_v29 = vld [vmem:[%s9088_s23 + $0x348] sm:$0xf0] }
  0xef   : > { %2149 = vmatpush.bf16.msra.mxu3 %v6176_v24  ;;  %v6448_v31 = vor.u32 %v8213_v23, %v6447_v22  ;;  %v8187_v22 = vld [vmem:[%s9088_s23 + $0x544] sm:$0xf0]  ;;  %v8138_v48 = vld [vmem:[%s9088_s23 + $0x3c4] sm:$0xf]  ;;  %v6153_v30 = vld [vmem:[%s9088_s23 + $0x3c8] sm:$0xf0] }
  0xf0   : > { %2164 = vmatpush.bf16.msrb.mxu0 %v6224_v37  ;;  %v6367_v37 = vld [vmem:[%s9088_s23 + $0x570] sm:$0xf]  ;;  %v8118_v56 = vld [vmem:[%s9088_s23 + $0x324] sm:$0xf]  ;;  %v8181_v2 = vld [vmem:[%s9088_s23 + $0x514] sm:$0xf0] }
  0xf1   : > { %2138 = vmatpush.bf16.msrb.mxu1 %v6096_v36  ;;  %v6185_v36 = vld [vmem:[%s9088_s23 + $0x408] sm:$0xf0]  ;;  %v8134_v58 = vld [vmem:[%s9088_s23 + $0x3a4] sm:$0xf] }
  0xf2   : > { %2176 = vmatpush.bf16.msra.mxu2 %v6296_v32  ;;  %v8130_v32 = vld [vmem:[%s9088_s23 + $0x384] sm:$0xf] }
  0xf3   : > { %2150 = vmatpush.bf16.msra.mxu3 %v6168_v33  ;;  %v6121_v33 = vld [vmem:[%s9088_s23 + $0x388] sm:$0xf0]  ;;  %v8162_v3 = vld [vmem:[%s9088_s23 + $0x484] sm:$0xf] }
  0xf4   : > { %2165 = vmatpush.bf16.msrb.mxu0 %v6216_v51  ;;  %v6368_v51 = vor.u32 %v8193_v49, %v6367_v37  ;;  %v8120_v49 = vld [vmem:[%s9088_s23 + $0x334] sm:$0xf] }
  0xf5   : > { %2139 = vmatpush.bf16.msrb.mxu1 %v6088_v50  ;;  %v6188_v50 = vor.u32 %v8146_v34, %v6185_v36  ;;  %v6399_v34 = vld [vmem:[%s9088_s23 + $0x5b0] sm:$0xf]  ;;  %v6156_v36 = vor.u32 %v8138_v48, %v6153_v30  ;;  %v8192_v30 = vld [vmem:[%s9088_s23 + $0x574] sm:$0xf] }
  0xf6   : > { %2177 = vmatpush.bf16.msra.mxu2 %v6288_v43  ;;  %6060 = vmatmul.msk.bf16.vlgmr.msrb.gmra.mxu3 %vm1443_vm0, %v9258_v44  ;;  %v8135_v44 = vld [vmem:[%s9088_s23 + $0x3a4] sm:$0xf0]  ;;  %v6124_v43 = vor.u32 %v8130_v32, %v6121_v33  ;;  %v6408_v32 = vor.u32 %v8203_v52, %v6407_v25 }
  0xf7   : > { %2151 = vmatpush.bf16.msra.mxu3 %v6160_v45  ;;  %v6136_v24 = vor.u32 %v8135_v44, %v6135_v10  ;;  %v8209_v45 = vld [vmem:[%s9088_s23 + $0x5f4] sm:$0xf0]  ;;  %v6351_v10 = vld [vmem:[%s9088_s23 + $0x550] sm:$0xf] }
  0xf8   : > { %2166 = vmatpush.bf16.msrb.mxu0 %v6208_v1  ;;  %v6116_v1 = vor.u32 %v8128_v46, %v6113_v47  ;;  %v8205_v44 = vld [vmem:[%s9088_s23 + $0x5d4] sm:$0xf0]  ;;  %v6352_v16 = vor.u32 %v8189_v11, %v6351_v10  ;;  %v6391_v47 = vld [vmem:[%s9088_s23 + $0x5a0] sm:$0xf]  ;;  %v8116_v11 = vld [vmem:[%s9088_s23 + $0x314] sm:$0xf] }
  0xf9   : > { %2140 = vmatpush.bf16.msrb.mxu1 %v6080_v0  ;;  %v6432_v0 = vor.u32 %v8209_v45, %v6431_v41  ;;  %v6145_v41 = vld [vmem:[%s9088_s23 + $0x3b8] sm:$0xf0] }
  0xfa   : > { %2178 = vmatpush.bf16.msra.mxu2 %v6280_v54  ;;  %v9449_v54 = vld [vmem:[#allocation1 + $0x1b] sm:$0xff] }
  0xfb   : > { %2152 = vmatpush.bf16.msra.mxu3 %v6152_v61  ;;  %v9452_v61 = vld [vmem:[#allocation1 + $0x24] sm:$0xff] }
  0xfc   : > { %2167 = vmatpush.bf16.msrb.mxu0 %v6200_v14  ;;  %2318 = vst [vmem:[#allocation1] ss:$9 sm:$0xff] %v520_v38  ;;  %v6415_v14 = vld [vmem:[%s9088_s23 + $0x5d0] sm:$0xf]  ;;  %v6081_v38 = vld [vmem:[%s9088_s23 + $0x338] sm:$0xf0] }
  0xfd   : > { %2141 = vmatpush.bf16.msrb.mxu1 %v6072_v13  ;;  %v6108_v13 = vor.u32 %v8126_v6, %v6105_v7  ;;  %v6416_v23 = vor.u32 %v8205_v44, %v6415_v14  ;;  %v6084_v46 = vor.u32 %v8120_v49, %v6081_v38  ;;  %v6076_v6 = vor.u32 %v8118_v56, %v6073_v57  ;;  %v6383_v7 = vld [vmem:[%s9088_s23 + $0x590] sm:$0xf]  ;;  %v6129_v44 = vld [vmem:[%s9088_s23 + $0x398] sm:$0xf0]  ;;  %v8174_v49 = vld [vmem:[%s9088_s23 + $0x4e4] sm:$0xf] }
  0xfe   : > { %2179 = vmatpush.bf16.msra.mxu2 %v6272_v8  ;;  %v8142_v8 = vld [vmem:[%s9088_s23 + $0x3e4] sm:$0xf]  ;;  %v6297_v38 = vld [vmem:[%s9088_s23 + $0x4e8] sm:$0xf0]  ;;  %v8172_v57 = vld [vmem:[%s9088_s23 + $0x4d4] sm:$0xf] }
  0xff   : > { %2153 = vmatpush.bf16.msra.mxu3 %v6144_v9  ;;  %v6169_v9 = vld [vmem:[%s9088_s23 + $0x3e8] sm:$0xf0] }
 0x100   : > { %2168 = vmatpush.bf16.msrb.mxu0 %v6192_v28  ;;  %v6172_v15 = vor.u32 %v8142_v8, %v6169_v9  ;;  %v8122_v28 = vld [vmem:[%s9088_s23 + $0x344] sm:$0xf]  ;;  %v8197_v8 = vld [vmem:[%s9088_s23 + $0x594] sm:$0xf0] }
 0x101   : > { %2142 = vmatpush.bf16.msrb.mxu1 %v6064_v27  ;;  %v6344_v27 = vor.u32 %v8187_v22, %v6343_v21  ;;  %v6092_v33 = vor.u32 %v8122_v28, %v6089_v29  ;;  %v6441_v21 = vld [vmem:[%s9088_s23 + $0x608] sm:$0xf0]  ;;  %v8160_v22 = vld [vmem:[%s9088_s23 + $0x474] sm:$0xf]  ;;  %v6305_v28 = vld [vmem:[%s9088_s23 + $0x4f8] sm:$0xf0] }
 0x102   : > { %2180 = vmatpush.bf16.msra.mxu2 %v6264_v20  ;;  %v6161_v20 = vld [vmem:[%s9088_s23 + $0x3d8] sm:$0xf0] }
 0x103   : > { %2154 = vmatpush.bf16.msra.mxu3 %v6136_v24  ;;  %2169 = vmatmul.bf16.vlgmr.msrb.gmra.mxu0 %v9435_v40  ;;  %v6100_v24 = vor.u32 %v8124_v17, %v6097_v18  ;;  %v6164_v26 = vor.u32 %v8140_v19, %v6161_v20  ;;  %v8194_v17 = vld [vmem:[%s9088_s23 + $0x584] sm:$0xf]  ;;  %v6377_v18 = vld [vmem:[%s9088_s23 + $0x588] sm:$0xf0]  ;;  %v6384_v20 = vor.u32 %v8197_v8, %v6383_v7 }
 0x104   : > { %2220 = vmatpush.bf16.msra.mxu0 %v6448_v31  ;;  %2143 = vmatmul.bf16.vlgmr.msrb.gmra.mxu1 %v9447_v60  ;;  %v8185_v31 = vld [vmem:[%s9088_s23 + $0x534] sm:$0xf0]  ;;  %v8210_v19 = vld [vmem:[%s9088_s23 + $0x604] sm:$0xf] }
 0x105   : > { %2187 = vmatpush.bf16.msra.mxu1 %v6376_v59  ;;  %v6335_v59 = vld [vmem:[%s9088_s23 + $0x530] sm:$0xf]  ;;  %v6444_v29 = vor.u32 %v8210_v19, %v6441_v21  ;;  %v8152_v19 = vld [vmem:[%s9088_s23 + $0x434] sm:$0xf] }
 0x106   : > { %2181 = vmatpush.bf16.msra.mxu2 %v6256_v35  ;;  %v8201_v35 = vld [vmem:[%s9088_s23 + $0x5b4] sm:$0xf0]  ;;  %v6336_v37 = vor.u32 %v8185_v31, %v6335_v59  ;;  %v6369_v59 = vld [vmem:[%s9088_s23 + $0x578] sm:$0xf0]  ;;  %v8208_v31 = vld [vmem:[%s9088_s23 + $0x5f4] sm:$0xf] }
 0x107   : > { %2155 = vmatpush.bf16.msra.mxu3 %v6128_v39  ;;  %v8136_v39 = vld [vmem:[%s9088_s23 + $0x3b4] sm:$0xf]  ;;  %v6400_v45 = vor.u32 %v8201_v35, %v6399_v34  ;;  %v6233_v34 = vld [vmem:[%s9088_s23 + $0x468] sm:$0xf0]  ;;  %v9529_v35 = vld [vmem:[%s9096_s19] sm:$0x3] }
 0x108   : > { %2239 = vmatpush.bf16.msrb.mxu0 %v6188_v50  ;;  %v8199_v50 = vld [vmem:[%s9088_s23 + $0x5a4] sm:$0xf0] }
 0x109   : > { %2188 = vmatpush.bf16.msra.mxu1 %v6368_v51  ;;  %2182 = vmatmul.bf16.vlgmr.msra.gmra.mxu2 %v9449_v54  ;;  %v6148_v51 = vor.u32 %v8136_v39, %v6145_v41  ;;  %v8190_v39 = vld [vmem:[%s9088_s23 + $0x564] sm:$0xf] }
 0x10a   : > { %2226 = vmatpush.bf16.msrb.mxu2 %v6124_v43  ;;  %2156 = vmatmul.bf16.vlgmr.msra.gmra.mxu3 %v9441_v53  ;;  %v8183_v43 = vld [vmem:[%s9088_s23 + $0x524] sm:$0xf0] }
 0x10b   : > { %2200 = vmatpush.bf16.msrb.mxu3 %v6440_v42  ;;  %v6327_v42 = vld [vmem:[%s9088_s23 + $0x520] sm:$0xf] }
 0x10c   : > { %2240 = vmatpush.bf16.msrb.mxu0 %v6180_v5  ;;  %v6328_v55 = vor.u32 %v8183_v43, %v6327_v42  ;;  %v6249_v5 = vld [vmem:[%s9088_s23 + $0x488] sm:$0xf0] }
 0x10d   : > { %2189 = vmatpush.bf16.msra.mxu1 %v6360_v4  ;;  %v6392_v4 = vor.u32 %v8199_v50, %v6391_v47  ;;  %v6252_v14 = vor.u32 %v8162_v3, %v6249_v5  ;;  %v6361_v43 = vld [vmem:[%s9088_s23 + $0x568] sm:$0xf0]  ;;  %v8156_v47 = vld [vmem:[%s9088_s23 + $0x454] sm:$0xf]  ;;  %v6225_v50 = vld [vmem:[%s9088_s23 + $0x458] sm:$0xf0] }
 0x10e   : > { %2227 = vmatpush.bf16.msrb.mxu2 %v6116_v1  ;;  %v6319_v1 = vld [vmem:[%s9088_s23 + $0x510] sm:$0xf]  ;;  %v6364_v56 = vor.u32 %v8190_v39, %v6361_v43  ;;  %v6353_v3 = vld [vmem:[%s9088_s23 + $0x558] sm:$0xf0]  ;;  %v6329_v43 = vld [vmem:[%s9088_s23 + $0x528] sm:$0xf0] }
 0x10f   : > { %2201 = vmatpush.bf16.msrb.mxu3 %v6432_v0  ;;  %v6137_v0 = vld [vmem:[%s9088_s23 + $0x3a8] sm:$0xf0]  ;;  %v6320_v10 = vor.u32 %v8181_v2, %v6319_v1  ;;  %v6228_v1 = vor.u32 %v8156_v47, %v6225_v50  ;;  %v8188_v2 = vld [vmem:[%s9088_s23 + $0x554] sm:$0xf] }
 0x110   : > { %2241 = vmatpush.bf16.msrb.mxu0 %v6172_v15  ;;  %v6140_v9 = vor.u32 %v8134_v58, %v6137_v0  ;;  %v8178_v15 = vld [vmem:[%s9088_s23 + $0x504] sm:$0xf]  ;;  %v6289_v58 = vld [vmem:[%s9088_s23 + $0x4d8] sm:$0xf0]  ;;  %v6393_v47 = vld [vmem:[%s9088_s23 + $0x5a8] sm:$0xf0] }
 0x111   : > { %2190 = vmatpush.bf16.msra.mxu1 %v6352_v16  ;;  %v6313_v16 = vld [vmem:[%s9088_s23 + $0x508] sm:$0xf0]  ;;  %v6292_v8 = vor.u32 %v8172_v57, %v6289_v58  ;;  %v8148_v50 = vld [vmem:[%s9088_s23 + $0x414] sm:$0xf]  ;;  %v6449_v57 = vld [vmem:[%s9088_s23 + $0x618] sm:$0xf0] }
 0x112   : > { %2228 = vmatpush.bf16.msrb.mxu2 %v6108_v13  ;;  %v8132_v13 = vld [vmem:[%s9088_s23 + $0x394] sm:$0xf]  ;;  %v6316_v52 = vor.u32 %v8178_v15, %v6313_v16  ;;  %v6345_v15 = vld [vmem:[%s9088_s23 + $0x548] sm:$0xf0]  ;;  %v8202_v16 = vld [vmem:[%s9088_s23 + $0x5c4] sm:$0xf] }
 0x113   : > { %2202 = vmatpush.bf16.msrb.mxu3 %v6424_v12  ;;  %6453 = vmatmul.msk.bf16.vlgmr.msra.gmra.mxu0 %vm1443_vm0, %v9454_v62  ;;  %v6065_v12 = vld [vmem:[%s9088_s23 + $0x318] sm:$0xf0]  ;;  %v6132_v25 = vor.u32 %v8132_v13, %v6129_v44  ;;  %v8186_v44 = vld [vmem:[%s9088_s23 + $0x544] sm:$0xf] }
 0x114   : > { %2242 = vmatpush.bf16.msrb.mxu0 %v6164_v26  ;;  %v6380_v26 = vor.u32 %v8194_v17, %v6377_v18  ;;  %v6409_v18 = vld [vmem:[%s9088_s23 + $0x5c8] sm:$0xf0] }
 0x115   : > { %2191 = vmatpush.bf16.msra.mxu1 %v6344_v27  ;;  %v8176_v27 = vld [vmem:[%s9088_s23 + $0x4f4] sm:$0xf] }
 0x116   : > { %2229 = vmatpush.bf16.msrb.mxu2 %v6100_v24  ;;  %v6068_v24 = vor.u32 %v8116_v11, %v6065_v12  ;;  %v6281_v11 = vld [vmem:[%s9088_s23 + $0x4c8] sm:$0xf0] }
 0x117   : > { %2203 = vmatpush.bf16.msrb.mxu3 %v6416_v23  ;;  %v6241_v23 = vld [vmem:[%s9088_s23 + $0x478] sm:$0xf0] }
 0x118   : > { %2243 = vmatpush.bf16.msrb.mxu0 %v6156_v36  ;;  %v6244_v48 = vor.u32 %v8160_v22, %v6241_v23  ;;  %v6308_v36 = vor.u32 %v8176_v27, %v6305_v28  ;;  %v6348_v23 = vor.u32 %v8186_v44, %v6345_v15  ;;  %v6412_v27 = vor.u32 %v8202_v16, %v6409_v18  ;;  %v8261_v44 = vld [vmem:[%s9088_s23 + $0x794] sm:$0xf0]  ;;  %v6705_v15 = vld [vmem:[%s9088_s23 + $0x810] sm:$0xf] }
 0x119   : > { %2192 = vmatpush.bf16.msra.mxu1 %v6336_v37  ;;  %v6372_v37 = vor.u32 %v8192_v30, %v6369_v59  ;;  %v8200_v30 = vld [vmem:[%s9088_s23 + $0x5b4] sm:$0xf]  ;;  %v8277_v16 = vld [vmem:[%s9088_s23 + $0x814] sm:$0xf0] }
 0x11a   : > { %2230 = vmatpush.bf16.msrb.mxu2 %v6092_v33  ;;  %v8158_v33 = vld [vmem:[%s9088_s23 + $0x464] sm:$0xf] }
 0x11b   : > { %2204 = vmatpush.bf16.msrb.mxu3 %v6408_v32  ;;  %v6433_v32 = vld [vmem:[%s9088_s23 + $0x5f8] sm:$0xf0]  ;;  %v6236_v42 = vor.u32 %v8158_v33, %v6233_v34  ;;  %v8150_v33 = vld [vmem:[%s9088_s23 + $0x424] sm:$0xf]  ;;  %v6201_v34 = vld [vmem:[%s9088_s23 + $0x428] sm:$0xf0] }
 0x11c   : > { %2244 = vmatpush.bf16.msrb.mxu0 %v6148_v51  ;;  %v6436_v41 = vor.u32 %v8208_v31, %v6433_v32  ;;  %v922_v51 = vperm.slane %v9529_v35, 0  ;;  %v6401_v32 = vld [vmem:[%s9088_s23 + $0x5b8] sm:$0xf0] }
 0x11d   : > { %2193 = vmatpush.bf16.msra.mxu1 %v6328_v55  ;;  %v6300_v55 = vor.u32 %v8174_v49, %v6297_v38  ;;  %v8166_v49 = vld [vmem:[%s9088_s23 + $0x4a4] sm:$0xf]  ;;  %v6265_v38 = vld [vmem:[%s9088_s23 + $0x4a8] sm:$0xf0]  ;;  %v6404_v39 = vor.u32 %v8200_v30, %v6401_v32  ;;  %v6497_v32 = vld [vmem:[%s9088_s23 + $0x670] sm:$0xf] }
 0x11e   : > { %2231 = vmatpush.bf16.msrb.mxu2 %v6084_v46  ;;  %v6425_v46 = vld [vmem:[%s9088_s23 + $0x5e8] sm:$0xf0]  ;;  %v6268_v58 = vor.u32 %v8166_v49, %v6265_v38  ;;  %v6625_v49 = vld [vmem:[%s9088_s23 + $0x770] sm:$0xf]  ;;  %v8257_v38 = vld [vmem:[%s9088_s23 + $0x774] sm:$0xf0] }
 0x11f   : > { %2205 = vmatpush.bf16.msrb.mxu3 %v6400_v45  ;;  %v8206_v45 = vld [vmem:[%s9088_s23 + $0x5e4] sm:$0xf] }
 0x120   : > { %2245 = vmatpush.bf16.msrb.mxu0 %v6140_v9  ;;  %v6428_v0 = vor.u32 %v8206_v45, %v6425_v46  ;;  %v1455_v5 = vpop.f32.mrf.mxu0  ;;  %v6356_v9 = vor.u32 %v8188_v2, %v6353_v3  ;;  %v8198_v45 = vld [vmem:[%s9088_s23 + $0x5a4] sm:$0xf]  ;;  %v6257_v2 = vld [vmem:[%s9088_s23 + $0x498] sm:$0xf0] }
 0x121   : > { %2194 = vmatpush.bf16.msra.mxu1 %v6320_v10  ;;  %v1456_v7 = vadd.f32 %v1455_v5, %v922_v51  ;;  %v8170_v10 = vld [vmem:[%s9088_s23 + $0x4c4] sm:$0xf]  ;;  %v6193_v51 = vld [vmem:[%s9088_s23 + $0x418] sm:$0xf0] }
 0x122   : > { %2232 = vmatpush.bf16.msrb.mxu2 %v6076_v6  ;;  %v6217_v6 = vld [vmem:[%s9088_s23 + $0x448] sm:$0xf0]  ;;  %v6284_v22 = vor.u32 %v8170_v10, %v6281_v11  ;;  %v6196_v5 = vor.u32 %v8148_v50, %v6193_v51  ;;  %v8229_v10 = vld [vmem:[%s9088_s23 + $0x694] sm:$0xf0]  ;;  %v6577_v11 = vld [vmem:[%s9088_s23 + $0x710] sm:$0xf] }
 0x123   : > { %2206 = vmatpush.bf16.msrb.mxu3 %v6392_v4  ;;  %v8154_v4 = vld [vmem:[%s9088_s23 + $0x444] sm:$0xf]  ;;  %v6553_v51 = vld [vmem:[%s9088_s23 + $0x6e0] sm:$0xf] }
 0x124   : > { %2195 = vmatmul.bf16.vlgmr.msra.gmra.mxu1 %v9452_v61  ;;  %2246 = vmatpush.bf16.msrb.mxu0 %v6132_v25  ;;  %v6220_v13 = vor.u32 %v8154_v4, %v6217_v6  ;;  %v6321_v4 = vld [vmem:[%s9088_s23 + $0x518] sm:$0xf0]  ;;  %v8196_v6 = vld [vmem:[%s9088_s23 + $0x594] sm:$0xf] }
 0x125   : > { %2252 = vmatpush.bf16.msrb.mxu1 %v6252_v14  ;;  %v1468_v14 = vpop.f32.mrf.mxu1 }
 0x126   : > { %2233 = vmatpush.bf16.msrb.mxu2 %v6068_v24  ;;  %v1469_v17 = vadd.f32 %v1468_v14, %v1456_v7  ;;  %v6385_v7 = vld [vmem:[%s9088_s23 + $0x598] sm:$0xf0] }
 0x127   : > { %2207 = vmatpush.bf16.msrb.mxu3 %v6384_v20  ;;  %2247 = vmatmul.bf16.vlgmr.msrb.gmra.mxu0 %v9441_v53  ;;  %v6417_v53 = vld [vmem:[%s9088_s23 + $0x5d8] sm:$0xf0]  ;;  %v6388_v18 = vor.u32 %v8196_v6, %v6385_v7 }
 0x128   : > { %2291 = vmatpush.bf16.msra.mxu0 %v6444_v29  ;;  %v6209_v20 = vld [vmem:[%s9088_s23 + $0x438] sm:$0xf0]  ;;  %v1481_v21 = vpop.f32.mrf.mxu2  ;;  %v8184_v29 = vld [vmem:[%s9088_s23 + $0x534] sm:$0xf]  ;;  %v1457_v59 = vpop.f32.mrf.mxu0 }
 0x129   : > { %2253 = vmatpush.bf16.msrb.mxu1 %v6244_v48  ;;  %2234 = vmatmul.bf16.vlgmr.msrb.gmra.mxu2 %v9447_v60  ;;  %v8204_v60 = vld [vmem:[%s9088_s23 + $0x5d4] sm:$0xf]  ;;  %v1482_v24 = vadd.f32 %v1481_v21, %v1469_v17  ;;  %v1494_v25 = vpop.f32.mrf.mxu3  ;;  %v6212_v28 = vor.u32 %v8152_v19, %v6209_v20  ;;  %v6337_v48 = vld [vmem:[%s9088_s23 + $0x538] sm:$0xf0]  ;;  %v6505_v21 = vld [vmem:[%s9088_s23 + $0x680] sm:$0xf] }
 0x12a   : > { %2278 = vmatpush.bf16.msra.mxu2 %v6380_v26  ;;  %2208 = vmatmul.bf16.vlgmr.msrb.gmra.mxu3 %v9456_v63  ;;  %v6420_v12 = vor.u32 %v8204_v60, %v6417_v53  ;;  %v6273_v26 = vld [vmem:[%s9088_s23 + $0x4b8] sm:$0xf0]  ;;  %v6396_v60 = vor.u32 %v8198_v45, %v6393_v47  ;;  %v8180_v53 = vld [vmem:[%s9088_s23 + $0x514] sm:$0xf]  ;;  %v6626_v47 = vor.u32 %v8257_v38, %v6625_v49  ;;  %v8265_v49 = vld [vmem:[%s9088_s23 + $0x7b4] sm:$0xf0] }
 0x12b   : > { %2265 = vmatpush.bf16.msra.mxu3 %v6316_v52  ;;  %v8168_v52 = vld [vmem:[%s9088_s23 + $0x4b4] sm:$0xf]  ;;  %v9564_v31 = vadd.f32 %v1494_v25, %v1482_v24  ;;  %v6324_v17 = vor.u32 %v8180_v53, %v6321_v4  ;;  %v6706_v24 = vor.u32 %v8277_v16, %v6705_v15  ;;  %v6569_v25 = vld [vmem:[%s9088_s23 + $0x700] sm:$0xf]  ;;  %v6545_v53 = vld [vmem:[%s9088_s23 + $0x6d0] sm:$0xf] }
 0x12c   : > { %2292 = vmatpush.bf16.msra.mxu0 %v6436_v41  ;;  %v6204_v41 = vor.u32 %v8150_v33, %v6201_v34  ;;  %v8225_v33 = vld [vmem:[%s9088_s23 + $0x674] sm:$0xf0]  ;;  %v6473_v15 = vld [vmem:[%s9088_s23 + $0x640] sm:$0xf]  ;;  %v8219_v16 = vld [vmem:[%s9088_s23 + $0x644] sm:$0xf0] }
 0x12d   : > { %2254 = vmatpush.bf16.msrb.mxu1 %v6236_v42  ;;  %v8182_v42 = vld [vmem:[%s9088_s23 + $0x524] sm:$0xf]  ;;  %v1470_v46 = vpop.f32.mrf.mxu1 }
 0x12e   : > { %2279 = vmatpush.bf16.msra.mxu2 %v6372_v37  ;;  %v6340_v37 = vor.u32 %v8184_v29, %v6337_v48  ;;  %v6697_v29 = vld [vmem:[%s9088_s23 + $0x800] sm:$0xf]  ;;  %v8275_v48 = vld [vmem:[%s9088_s23 + $0x804] sm:$0xf0] }
 0x12f   : > { %2266 = vmatpush.bf16.msra.mxu3 %v6308_v36  ;;  %v6276_v36 = vor.u32 %v8168_v52, %v6273_v26  ;;  %v8243_v52 = vld [vmem:[%s9088_s23 + $0x704] sm:$0xf0]  ;;  %v6633_v26 = vld [vmem:[%s9088_s23 + $0x780] sm:$0xf]  ;;  %v6698_v34 = vor.u32 %v8275_v48, %v6697_v29  ;;  %v6474_v29 = vor.u32 %v8219_v16, %v6473_v15  ;;  %v8226_v16 = vld [vmem:[%s9088_s23 + $0x684] sm:$0xf] }
 0x130   : > { %2293 = vmatpush.bf16.msra.mxu0 %v6428_v0  ;;  %v6332_v0 = vor.u32 %v8182_v42, %v6329_v43  ;;  %v6570_v59 = vor.u32 %v8243_v52, %v6569_v25  ;;  %v6498_v43 = vor.u32 %v8225_v33, %v6497_v32  ;;  %v6489_v46 = vld [vmem:[%s9088_s23 + $0x660] sm:$0xf]  ;;  %v8251_v25 = vld [vmem:[%s9088_s23 + $0x744] sm:$0xf0]  ;;  %v6529_v33 = vld [vmem:[%s9088_s23 + $0x6b0] sm:$0xf] }
 0x131   : > { %2255 = vmatpush.bf16.msrb.mxu1 %v6228_v1  ;;  %v8164_v1 = vld [vmem:[%s9088_s23 + $0x494] sm:$0xf]  ;;  %v1496_v3 = vpop.f32.mrf.mxu3  ;;  %v6665_v52 = vld [vmem:[%s9088_s23 + $0x7c0] sm:$0xf]  ;;  %v8307_v15 = vld [vmem:[%s9088_s23 + $0x904] sm:$0xf0] }
 0x132   : > { %2280 = vmatpush.bf16.msra.mxu2 %v6364_v56  ;;  %v8212_v56 = vld [vmem:[%s9088_s23 + $0x614] sm:$0xf]  ;;  %v6260_v14 = vor.u32 %v8164_v1, %v6257_v2  ;;  %v8271_v1 = vld [vmem:[%s9088_s23 + $0x7e4] sm:$0xf0] }
 0x133   : > { %2267 = vmatpush.bf16.msra.mxu3 %v6300_v55  ;;  %v1483_v55 = vpop.f32.mrf.mxu2 }
 0x134   : > { %2294 = vmatpush.bf16.msra.mxu0 %v6420_v12  ;;  %v8245_v12 = vld [vmem:[%s9088_s23 + $0x714] sm:$0xf0]  ;;  %v8239_v55 = vld [vmem:[%s9088_s23 + $0x6e4] sm:$0xf0] }
 0x135   : > { %2256 = vmatpush.bf16.msrb.mxu1 %v6220_v13  ;;  %v6641_v13 = vld [vmem:[%s9088_s23 + $0x790] sm:$0xf]  ;;  %v6578_v20 = vor.u32 %v8245_v12, %v6577_v11  ;;  %v6554_v3 = vor.u32 %v8239_v55, %v6553_v51  ;;  %v8253_v11 = vld [vmem:[%s9088_s23 + $0x754] sm:$0xf0]  ;;  %v8263_v51 = vld [vmem:[%s9088_s23 + $0x7a4] sm:$0xf0] }
 0x136   : > { %2281 = vmatpush.bf16.msra.mxu2 %v6356_v9  ;;  %v6513_v9 = vld [vmem:[%s9088_s23 + $0x690] sm:$0xf] }
 0x137   : > { %2268 = vmatpush.bf16.msra.mxu3 %v6292_v8  ;;  %v6452_v8 = vor.u32 %v8212_v56, %v6449_v57  ;;  %v6514_v19 = vor.u32 %v8229_v10, %v6513_v9  ;;  %v6617_v56 = vld [vmem:[%s9088_s23 + $0x760] sm:$0xf]  ;;  %v6609_v9 = vld [vmem:[%s9088_s23 + $0x750] sm:$0xf]  ;;  %v923_v10 = vperm.slane %v9529_v35, 1 }
 0x138   : > { %2295 = vmatpush.bf16.msra.mxu0 %v6412_v27  ;;  %v6673_v12 = vld [vmem:[%s9088_s23 + $0x7d0] sm:$0xf]  ;;  %v6610_v35 = vor.u32 %v8253_v11, %v6609_v9  ;;  %v9669_v9 = vld [vmem:[#allocation1] sm:$0xff] }
 0x139   : > { %2257 = vmatpush.bf16.msrb.mxu1 %v6212_v28  ;;  %v8259_v28 = vld [vmem:[%s9088_s23 + $0x784] sm:$0xf0]  ;;  %v6769_v55 = vld [vmem:[%s9088_s23 + $0x890] sm:$0xf]  ;;  %v6579_v11 = vld [vmem:[%s9088_s23 + $0x718] sm:$0xf0] }
 0x13a   : > { %2282 = vmatpush.bf16.msra.mxu2 %v6348_v23  ;;  %v6642_v23 = vor.u32 %v8261_v44, %v6641_v13  ;;  %v8269_v13 = vld [vmem:[%s9088_s23 + $0x7d4] sm:$0xf0] }
 0x13b   : > { %2269 = vmatpush.bf16.msra.mxu3 %v6284_v22  ;;  %v8227_v22 = vld [vmem:[%s9088_s23 + $0x684] sm:$0xf0]  ;;  %v1533_v27 = vpop.f32.mrf.mxu2 }
 0x13c   : > { %2296 = vmatpush.bf16.msra.mxu0 %v6404_v39  ;;  %v6506_v30 = vor.u32 %v8227_v22, %v6505_v21  ;;  %v6689_v39 = vld [vmem:[%s9088_s23 + $0x7f0] sm:$0xf]  ;;  %v8235_v21 = vld [vmem:[%s9088_s23 + $0x6c4] sm:$0xf0]  ;;  %v6601_v22 = vld [vmem:[%s9088_s23 + $0x740] sm:$0xf] }
 0x13d   : > { %2258 = vmatpush.bf16.msrb.mxu1 %v6204_v41  ;;  %v8273_v41 = vld [vmem:[%s9088_s23 + $0x7f4] sm:$0xf0] }
 0x13e   : > { %2283 = vmatpush.bf16.msra.mxu2 %v6340_v37  ;;  %v8241_v37 = vld [vmem:[%s9088_s23 + $0x6f4] sm:$0xf0]  ;;  %v6690_v50 = vor.u32 %v8273_v41, %v6689_v39  ;;  %v6457_v41 = vld [vmem:[%s9088_s23 + $0x620] sm:$0xf] }
 0x13f   : > { %2270 = vmatpush.bf16.msra.mxu3 %v6276_v36  ;;  %v6561_v36 = vld [vmem:[%s9088_s23 + $0x6f0] sm:$0xf] }
 0x140   : > { %2297 = vmatpush.bf16.msra.mxu0 %v6396_v60  ;;  %v1507_v42 = vpop.f32.mrf.mxu0  ;;  %v6562_v45 = vor.u32 %v8241_v37, %v6561_v36  ;;  %v6481_v60 = vld [vmem:[%s9088_s23 + $0x650] sm:$0xf]  ;;  %v8249_v36 = vld [vmem:[%s9088_s23 + $0x734] sm:$0xf0] }
 0x141   : > { %2259 = vmatpush.bf16.msrb.mxu1 %v6196_v5  ;;  %v8221_v5 = vld [vmem:[%s9088_s23 + $0x654] sm:$0xf0]  ;;  %v6657_v37 = vld [vmem:[%s9088_s23 + $0x7b0] sm:$0xf] }
 0x142   : > { %2284 = vmatpush.bf16.msra.mxu2 %v6332_v0  ;;  %v6681_v0 = vld [vmem:[%s9088_s23 + $0x7e0] sm:$0xf] }
 0x143   : > { %2271 = vmatpush.bf16.msra.mxu3 %v6268_v58  ;;  %v1535_v57 = vpop.f32.mrf.mxu2  ;;  %v8255_v58 = vld [vmem:[%s9088_s23 + $0x764] sm:$0xf0]  ;;  %v6682_v7 = vor.u32 %v8271_v1, %v6681_v0  ;;  %v8309_v0 = vld [vmem:[%s9088_s23 + $0x914] sm:$0xf0] }
 0x144   : > { %2260 = vmatmul.bf16.vlgmr.msrb.gmra.mxu1 %v9435_v40  ;;  %2298 = vmatpush.bf16.msra.mxu0 %v6388_v18  ;;  %v6634_v40 = vor.u32 %v8259_v28, %v6633_v26  ;;  %v6618_v6 = vor.u32 %v8255_v58, %v6617_v56  ;;  %v8267_v26 = vld [vmem:[%s9088_s23 + $0x7c4] sm:$0xf0]  ;;  %v8293_v57 = vld [vmem:[%s9088_s23 + $0x894] sm:$0xf0]  ;;  %v6833_v58 = vld [vmem:[%s9088_s23 + $0x910] sm:$0xf] }
 0x145   : > { %2311 = vmatpush.bf16.msra.mxu1 %v6452_v8  ;;  %v8237_v8 = vld [vmem:[%s9088_s23 + $0x6d4] sm:$0xf0]  ;;  %v6666_v32 = vor.u32 %v8267_v26, %v6665_v52  ;;  %v6753_v26 = vld [vmem:[%s9088_s23 + $0x870] sm:$0xf] }
 0x146   : > { %2285 = vmatpush.bf16.msra.mxu2 %v6324_v17  ;;  %v6546_v44 = vor.u32 %v8237_v8, %v6545_v53  ;;  %v6841_v53 = vld [vmem:[%s9088_s23 + $0x920] sm:$0xf]  ;;  %v6834_v8 = vor.u32 %v8309_v0, %v6833_v58  ;;  %v6737_v0 = vld [vmem:[%s9088_s23 + $0x850] sm:$0xf] }
 0x147   : > { %2272 = vmatpush.bf16.msra.mxu3 %v6260_v14  ;;  %2299 = vmatmul.bf16.vlgmr.msra.gmra.mxu0 %v9456_v63  ;;  %v1520_v63 = vpop.f32.mrf.mxu1  ;;  %v6482_v14 = vor.u32 %v8221_v5, %v6481_v60 }
 0x148   : > { %2863 = vmatpush.bf16.msrb.mxu0 %v6706_v24  ;;  %v1509_v18 = vpop.f32.mrf.mxu0 }
 0x149   : > { %2837 = vmatpush.bf16.msrb.mxu1 %v6578_v20  ;;  %2286 = vmatmul.bf16.vlgmr.msra.gmra.mxu2 %v9452_v61  ;;  %v1508_v61 = vadd.f32 %v1507_v42, %v9564_v31  ;;  %v1546_v17 = vpop.f32.mrf.mxu3  ;;  %v6537_v20 = vld [vmem:[%s9088_s23 + $0x6c0] sm:$0xf]  ;;  %v8215_v42 = vld [vmem:[%s9088_s23 + $0x624] sm:$0xf0] }
 0x14a   : > { %2850 = vmatpush.bf16.msrb.mxu2 %v6642_v23  ;;  %2273 = vmatmul.bf16.vlgmr.msra.gmra.mxu3 %v9449_v54  ;;  %v8223_v54 = vld [vmem:[%s9088_s23 + $0x664] sm:$0xf0]  ;;  %v1547_v23 = vadd.f32 %v1546_v17, %v923_v10  ;;  %v6538_v48 = vor.u32 %v8235_v21, %v6537_v20  ;;  %v6458_v1 = vor.u32 %v8215_v42, %v6457_v41  ;;  %v8244_v10 = vld [vmem:[%s9088_s23 + $0x714] sm:$0xf]  ;;  %v6507_v17 = vld [vmem:[%s9088_s23 + $0x688] sm:$0xf0] }
 0x14b   : > { %2824 = vmatpush.bf16.msrb.mxu3 %v6514_v19  ;;  %v1521_v2 = vadd.f32 %v1520_v63, %v1508_v61  ;;  %v6490_v31 = vor.u32 %v8223_v54, %v6489_v46  ;;  %v6674_v19 = vor.u32 %v8269_v13, %v6673_v12  ;;  %v6658_v54 = vor.u32 %v8265_v49, %v6657_v37  ;;  %v8231_v61 = vld [vmem:[%s9088_s23 + $0x6a4] sm:$0xf0]  ;;  %v6649_v63 = vld [vmem:[%s9088_s23 + $0x7a0] sm:$0xf] }
 0x14c   : > { %2864 = vmatpush.bf16.msrb.mxu0 %v6698_v34  ;;  %v6593_v34 = vld [vmem:[%s9088_s23 + $0x730] sm:$0xf]  ;;  %v6650_v5 = vor.u32 %v8263_v51, %v6649_v63  ;;  %v6761_v13 = vld [vmem:[%s9088_s23 + $0x880] sm:$0xf]  ;;  %v6582_v20 = vor.u32 %v8244_v10, %v6579_v11  ;;  %v6510_v52 = vor.u32 %v8226_v16, %v6507_v17  ;;  %v8287_v41 = vld [vmem:[%s9088_s23 + $0x864] sm:$0xf0] }
 0x14d   : > { %2838 = vmatpush.bf16.msrb.mxu1 %v6570_v59  ;;  %v9625_v4 = vadd.f32 %v1533_v27, %v1521_v2  ;;  %v1559_v27 = vpop.f32.mrf.mxu2  ;;  %v8217_v59 = vld [vmem:[%s9088_s23 + $0x634] sm:$0xf0]  ;;  %v6594_v46 = vor.u32 %v8249_v36, %v6593_v34  ;;  %v9679_v18 = vld [vmem:[#allocation1 + $0x12] sm:$0xff]  ;;  %v8240_v34 = vld [vmem:[%s9088_s23 + $0x6f4] sm:$0xf] }
 0x14e   : > { %2851 = vmatpush.bf16.msrb.mxu2 %v6634_v40  ;;  %v9643_v28 = vadd.f32 %v1559_v27, %v1547_v23  ;;  %v8233_v40 = vld [vmem:[%s9088_s23 + $0x6b4] sm:$0xf0]  ;;  %v6571_v23 = vld [vmem:[%s9088_s23 + $0x708] sm:$0xf0]  ;;  %v6563_v36 = vld [vmem:[%s9088_s23 + $0x6f8] sm:$0xf0] }
 0x14f   : > { %2825 = vmatpush.bf16.msrb.mxu3 %v6506_v30  ;;  %v1522_v24 = vpop.f32.mrf.mxu1  ;;  %v6465_v30 = vld [vmem:[%s9088_s23 + $0x630] sm:$0xf]  ;;  %v6530_v39 = vor.u32 %v8233_v40, %v6529_v33  ;;  %v8289_v27 = vld [vmem:[%s9088_s23 + $0x874] sm:$0xf0]  ;;  %v6809_v42 = vld [vmem:[%s9088_s23 + $0x8e0] sm:$0xf]  ;;  %v6566_v63 = vor.u32 %v8240_v34, %v6563_v36 }
 0x150   : > { %2865 = vmatpush.bf16.msrb.mxu0 %v6690_v50  ;;  %v6466_v38 = vor.u32 %v8217_v59, %v6465_v30  ;;  %v8247_v50 = vld [vmem:[%s9088_s23 + $0x724] sm:$0xf0]  ;;  %v9685_v24 = vld [vmem:[#allocation1 + $0x1b] sm:$0xff]  ;;  %v6499_v59 = vld [vmem:[%s9088_s23 + $0x678] sm:$0xf0]  ;;  %v6754_v40 = vor.u32 %v8289_v27, %v6753_v26 }
 0x151   : > { %2839 = vmatpush.bf16.msrb.mxu1 %v6562_v45  ;;  %v1548_v45 = vpop.f32.mrf.mxu3  ;;  %v8224_v30 = vld [vmem:[%s9088_s23 + $0x674] sm:$0xf]  ;;  %v6547_v10 = vld [vmem:[%s9088_s23 + $0x6d8] sm:$0xf0]  ;;  %v8299_v17 = vld [vmem:[%s9088_s23 + $0x8c4] sm:$0xf0] }
 0x152   : > { %2852 = vmatpush.bf16.msrb.mxu2 %v6626_v47  ;;  %v6585_v47 = vld [vmem:[%s9088_s23 + $0x720] sm:$0xf]  ;;  %v8303_v45 = vld [vmem:[%s9088_s23 + $0x8e4] sm:$0xf0]  ;;  %v6539_v26 = vld [vmem:[%s9088_s23 + $0x6c8] sm:$0xf0] }
 0x153   : > { %2826 = vmatpush.bf16.msrb.mxu3 %v6498_v43  ;;  %v6521_v43 = vld [vmem:[%s9088_s23 + $0x6a0] sm:$0xf]  ;;  %v6586_v60 = vor.u32 %v8247_v50, %v6585_v47  ;;  %v9707_v47 = vld [vmem:[#allocation1 + $0x36] sm:$0xff] }
 0x154   : > { %2866 = vmatpush.bf16.msrb.mxu0 %v6682_v7  ;;  %6454 = vmatmul.msk.bf16.vlgmr.msra.gmra.mxu1 %vm1443_vm0, %v9454_v62  ;;  %v6602_v62 = vor.u32 %v8251_v25, %v6601_v22  ;;  %v6522_v2 = vor.u32 %v8231_v61, %v6521_v43  ;;  %v6770_v7 = vor.u32 %v8293_v57, %v6769_v55  ;;  %v8242_v22 = vld [vmem:[%s9088_s23 + $0x704] sm:$0xf]  ;;  %v9709_v50 = vld [vmem:[#allocation1 + $0x24] sm:$0xff] }
 0x155   : > { %2840 = vmatpush.bf16.msrb.mxu1 %v6554_v3  ;;  %v1561_v56 = vpop.f32.mrf.mxu2  ;;  %v6515_v3 = vld [vmem:[%s9088_s23 + $0x698] sm:$0xf0]  ;;  %v8238_v55 = vld [vmem:[%s9088_s23 + $0x6e4] sm:$0xf]  ;;  %v6810_v57 = vor.u32 %v8303_v45, %v6809_v42  ;;  %v8279_v42 = vld [vmem:[%s9088_s23 + $0x824] sm:$0xf0] }
 0x156   : > { %2853 = vmatpush.bf16.msrb.mxu2 %v6618_v6  ;;  %v8311_v6 = vld [vmem:[%s9088_s23 + $0x924] sm:$0xf0]  ;;  %v6555_v56 = vld [vmem:[%s9088_s23 + $0x6e8] sm:$0xf0] }
 0x157   : > { %2827 = vmatpush.bf16.msrb.mxu3 %v6490_v31  ;;  %v8228_v31 = vld [vmem:[%s9088_s23 + $0x694] sm:$0xf]  ;;  %v8295_v45 = vld [vmem:[%s9088_s23 + $0x8a4] sm:$0xf0] }
 0x158   : > { %2867 = vmatpush.bf16.msrb.mxu0 %v6674_v19  ;;  %v6518_v12 = vor.u32 %v8228_v31, %v6515_v3  ;;  %v9681_v19 = vld [vmem:[#allocation1 + $0x9] sm:$0xff]  ;;  %v8301_v31 = vld [vmem:[%s9088_s23 + $0x8d4] sm:$0xf0]  ;;  %v8220_v3 = vld [vmem:[%s9088_s23 + $0x654] sm:$0xf] }
 0x159   : > { %2841 = vmatpush.bf16.msrb.mxu1 %v6546_v44  ;;  %v6825_v44 = vld [vmem:[%s9088_s23 + $0x900] sm:$0xf] }
 0x15a   : > { %2854 = vmatpush.bf16.msrb.mxu2 %v6610_v35  ;;  %v6842_v35 = vor.u32 %v8311_v6, %v6841_v53  ;;  %v6826_v25 = vor.u32 %v8307_v15, %v6825_v44  ;;  %v6558_v6 = vor.u32 %v8238_v55, %v6555_v56  ;;  %v8283_v44 = vld [vmem:[%s9088_s23 + $0x844] sm:$0xf0]  ;;  %v6793_v15 = vld [vmem:[%s9088_s23 + $0x8c0] sm:$0xf]  ;;  %v8276_v55 = vld [vmem:[%s9088_s23 + $0x814] sm:$0xf] }
 0x15b   : > { %2828 = vmatpush.bf16.msrb.mxu3 %v6482_v14  ;;  %v8291_v14 = vld [vmem:[%s9088_s23 + $0x884] sm:$0xf0]  ;;  %v6794_v27 = vor.u32 %v8299_v17, %v6793_v15  ;;  %v6707_v56 = vld [vmem:[%s9088_s23 + $0x818] sm:$0xf0]  ;;  %v6763_v17 = vld [vmem:[%s9088_s23 + $0x888] sm:$0xf0] }
 0x15c   : > { %2868 = vmatpush.bf16.msrb.mxu0 %v6666_v32  ;;  %v6762_v21 = vor.u32 %v8291_v14, %v6761_v13  ;;  %v6574_v32 = vor.u32 %v8242_v22, %v6571_v23  ;;  %v6729_v14 = vld [vmem:[%s9088_s23 + $0x840] sm:$0xf] }
 0x15d   : > { %2842 = vmatpush.bf16.msrb.mxu1 %v6538_v48  ;;  %v8305_v48 = vld [vmem:[%s9088_s23 + $0x8f4] sm:$0xf0] }
 0x15e   : > { %2855 = vmatpush.bf16.msrb.mxu2 %v6602_v62  ;;  %v521_v62 = vld [vmem:[%s9179_s14 + $0x15] sm:$0x7f] }
 0x15f   : > { %2829 = vmatpush.bf16.msrb.mxu3 %v6474_v29  ;;  %v6817_v29 = vld [vmem:[%s9088_s23 + $0x8f0] sm:$0xf] }
 0x160   : > { %2869 = vmatpush.bf16.msrb.mxu0 %v6658_v54  ;;  %v1572_v33 = vpop.f32.mrf.mxu0  ;;  %v6818_v49 = vor.u32 %v8305_v48, %v6817_v29  ;;  %v6491_v54 = vld [vmem:[%s9088_s23 + $0x668] sm:$0xf0]  ;;  %v6721_v48 = vld [vmem:[%s9088_s23 + $0x830] sm:$0xf] }
 0x161   : > { %2843 = vmatpush.bf16.msrb.mxu1 %v6530_v39  ;;  %v1573_v37 = vadd.f32 %v1572_v33, %v9643_v28  ;;  %v6745_v39 = vld [vmem:[%s9088_s23 + $0x860] sm:$0xf]  ;;  %v1585_v43 = vpop.f32.mrf.mxu1  ;;  %v9711_v28 = vld [vmem:[#allocation1 + $0x2d] sm:$0xff]  ;;  %v6467_v33 = vld [vmem:[%s9088_s23 + $0x638] sm:$0xf0] }
 0x162   : > { %2856 = vmatpush.bf16.msrb.mxu2 %v6594_v46  ;;  %v8222_v46 = vld [vmem:[%s9088_s23 + $0x664] sm:$0xf]  ;;  %v6746_v51 = vor.u32 %v8287_v41, %v6745_v39  ;;  %3007 = vst [vmem:[#allocation1] ss:$9 sm:$0xff] %v521_v62  ;;  %v8297_v62 = vld [vmem:[%s9088_s23 + $0x8b4] sm:$0xf0] }
 0x163   : > { %2830 = vmatpush.bf16.msrb.mxu3 %v6466_v38  ;;  %v6502_v38 = vor.u32 %v8224_v30, %v6499_v59  ;;  %v1586_v61 = vadd.f32 %v1585_v43, %v1573_v37  ;;  %v6494_v58 = vor.u32 %v8222_v46, %v6491_v54  ;;  %v8281_v30 = vld [vmem:[%s9088_s23 + $0x834] sm:$0xf0]  ;;  %v6785_v59 = vld [vmem:[%s9088_s23 + $0x8b0] sm:$0xf]  ;;  %v8232_v37 = vld [vmem:[%s9088_s23 + $0x6b4] sm:$0xf] }
 0x164   : > { %2870 = vmatpush.bf16.msrb.mxu0 %v6650_v5  ;;  %v6722_v36 = vor.u32 %v8281_v30, %v6721_v48  ;;  %v6786_v39 = vor.u32 %v8297_v62, %v6785_v59  ;;  %v6777_v43 = vld [vmem:[%s9088_s23 + $0x8a0] sm:$0xf]  ;;  %v8214_v46 = vld [vmem:[%s9088_s23 + $0x624] sm:$0xf]  ;;  %v6459_v54 = vld [vmem:[%s9088_s23 + $0x628] sm:$0xf0] }
 0x165   : > { %2844 = vmatpush.bf16.msrb.mxu1 %v6522_v2  ;;  %v6801_v2 = vld [vmem:[%s9088_s23 + $0x8d0] sm:$0xf]  ;;  %v8272_v48 = vld [vmem:[%s9088_s23 + $0x7f4] sm:$0xf]  ;;  %v6691_v30 = vld [vmem:[%s9088_s23 + $0x7f8] sm:$0xf0] }
 0x166   : > { %2857 = vmatpush.bf16.msrb.mxu2 %v6586_v60  ;;  %v6483_v60 = vld [vmem:[%s9088_s23 + $0x658] sm:$0xf0]  ;;  %v8288_v59 = vld [vmem:[%s9088_s23 + $0x874] sm:$0xf] }
 0x167   : > { %2831 = vmatpush.bf16.msrb.mxu3 %v6458_v1  ;;  %2871 = vmatmul.bf16.vlgmr.msrb.gmra.mxu0 %v9685_v24  ;;  %v8285_v1 = vld [vmem:[%s9088_s23 + $0x854] sm:$0xf0]  ;;  %v6486_v13 = vor.u32 %v8220_v3, %v6483_v60  ;;  %v8230_v3 = vld [vmem:[%s9088_s23 + $0x6a4] sm:$0xf]  ;;  %v6523_v60 = vld [vmem:[%s9088_s23 + $0x6a8] sm:$0xf0] }
 0x168   : > { %2915 = vmatpush.bf16.msra.mxu0 %v6518_v12  ;;  %2845 = vmatmul.bf16.vlgmr.msrb.gmra.mxu1 %v9681_v19  ;;  %v1574_v11 = vpop.f32.mrf.mxu0  ;;  %v6802_v12 = vor.u32 %v8301_v31, %v6801_v2  ;;  %v6778_v2 = vor.u32 %v8295_v45, %v6777_v43  ;;  %v6462_v31 = vor.u32 %v8214_v46, %v6459_v54  ;;  %v6755_v62 = vld [vmem:[%s9088_s23 + $0x878] sm:$0xf0]  ;;  %v8270_v43 = vld [vmem:[%s9088_s23 + $0x7e4] sm:$0xf]  ;;  %v6683_v45 = vld [vmem:[%s9088_s23 + $0x7e8] sm:$0xf0] }
 0x169   : > { %2889 = vmatpush.bf16.msra.mxu1 %v6834_v8  ;;  %2858 = vmatmul.bf16.vlgmr.msrb.gmra.mxu2 %v9679_v18  ;;  %v1598_v5 = vpop.f32.mrf.mxu3  ;;  %v8236_v8 = vld [vmem:[%s9088_s23 + $0x6d4] sm:$0xf]  ;;  %v6526_v15 = vor.u32 %v8230_v3, %v6523_v60  ;;  %v6747_v46 = vld [vmem:[%s9088_s23 + $0x868] sm:$0xf0]  ;;  %v6739_v60 = vld [vmem:[%s9088_s23 + $0x858] sm:$0xf0] }
 0x16a   : > { %2832 = vmatmul.bf16.vlgmr.msrb.gmra.mxu3 %v9669_v9  ;;  %2909 = vmatpush.bf16.msra.mxu2 %v6842_v35  ;;  %v1599_v53 = vadd.f32 %v1598_v5, %v1586_v61  ;;  %v8218_v35 = vld [vmem:[%s9088_s23 + $0x644] sm:$0xf]  ;;  %v6550_v23 = vor.u32 %v8236_v8, %v6547_v10  ;;  %v8260_v61 = vld [vmem:[%s9088_s23 + $0x794] sm:$0xf] }
 0x16b   : > { %2876 = vmatpush.bf16.msra.mxu3 %v6770_v7  ;;  %v6738_v7 = vor.u32 %v8285_v1, %v6737_v0  ;;  %v8292_v0 = vld [vmem:[%s9088_s23 + $0x894] sm:$0xf]  ;;  %v6771_v1 = vld [vmem:[%s9088_s23 + $0x898] sm:$0xf0]  ;;  %v8258_v8 = vld [vmem:[%s9088_s23 + $0x784] sm:$0xf] }
 0x16c   : > { %2916 = vmatpush.bf16.msra.mxu0 %v6510_v52  ;;  %v1611_v16 = vpop.f32.mrf.mxu2  ;;  %v8234_v52 = vld [vmem:[%s9088_s23 + $0x6c4] sm:$0xf]  ;;  %v6774_v10 = vor.u32 %v8292_v0, %v6771_v1  ;;  %v6611_v0 = vld [vmem:[%s9088_s23 + $0x758] sm:$0xf0]  ;;  %v8268_v1 = vld [vmem:[%s9088_s23 + $0x7d4] sm:$0xf] }
 0x16d   : > { %2890 = vmatpush.bf16.msra.mxu1 %v6826_v25  ;;  %v9729_v22 = vadd.f32 %v1611_v16, %v1599_v53  ;;  %v6730_v25 = vor.u32 %v8283_v44, %v6729_v14  ;;  %v6542_v34 = vor.u32 %v8234_v52, %v6539_v26  ;;  %v6710_v53 = vor.u32 %v8276_v55, %v6707_v56  ;;  %v6699_v14 = vld [vmem:[%s9088_s23 + $0x808] sm:$0xf0]  ;;  %v8290_v16 = vld [vmem:[%s9088_s23 + $0x884] sm:$0xf]  ;;  %v8256_v26 = vld [vmem:[%s9088_s23 + $0x774] sm:$0xf] }
 0x16e   : > { %2928 = vmatpush.bf16.msrb.mxu2 %v6582_v20  ;;  %v6475_v20 = vld [vmem:[%s9088_s23 + $0x648] sm:$0xf0]  ;;  %v6686_v55 = vor.u32 %v8270_v43, %v6683_v45  ;;  %v8302_v56 = vld [vmem:[%s9088_s23 + $0x8e4] sm:$0xf]  ;;  %v8284_v3 = vld [vmem:[%s9088_s23 + $0x854] sm:$0xf] }
 0x16f   : > { %2877 = vmatpush.bf16.msra.mxu3 %v6762_v21  ;;  %v1587_v21 = vpop.f32.mrf.mxu1  ;;  %v6478_v29 = vor.u32 %v8218_v35, %v6475_v20  ;;  %v8306_v20 = vld [vmem:[%s9088_s23 + $0x904] sm:$0xf] }
 0x170   : > { %2917 = vmatpush.bf16.msra.mxu0 %v6502_v38  ;;  %v6713_v38 = vld [vmem:[%s9088_s23 + $0x820] sm:$0xf]  ;;  %v3695_v21 = vmax.f32 %v9625_v4, 0.0  ;;  %v8262_v43 = vld [vmem:[%s9088_s23 + $0x7a4] sm:$0xf] }
 0x171   : > { %2891 = vmatpush.bf16.msra.mxu1 %v6818_v49  ;;  %v6531_v49 = vld [vmem:[%s9088_s23 + $0x6b8] sm:$0xf0] }
 0x172   : > { %2929 = vmatpush.bf16.msrb.mxu2 %v6574_v32  ;;  %v8216_v32 = vld [vmem:[%s9088_s23 + $0x634] sm:$0xf] }
 0x173   : > { %2878 = vmatpush.bf16.msra.mxu3 %v6754_v40  ;;  %v1600_v40 = vpop.f32.mrf.mxu3  ;;  %v6470_v41 = vor.u32 %v8216_v32, %v6467_v33  ;;  %v9780_v33 = vld [vmem:[%s9096_s19 + $0x2] sm:$0x3] }
 0x174   : > { %2918 = vmatpush.bf16.msra.mxu0 %v6494_v58  ;;  %v6714_v58 = vor.u32 %v8279_v42, %v6713_v38  ;;  %v8254_v38 = vld [vmem:[%s9088_s23 + $0x764] sm:$0xf]  ;;  %v6619_v42 = vld [vmem:[%s9088_s23 + $0x768] sm:$0xf0]  ;;  %v924_v54 = vperm.slane %v9780_v33, 0 }
 0x175   : > { %2892 = vmatpush.bf16.msra.mxu1 %v6810_v57  ;;  %v6534_v57 = vor.u32 %v8232_v37, %v6531_v49  ;;  %v6819_v37 = vld [vmem:[%s9088_s23 + $0x8f8] sm:$0xf0] }
 0x176   : > { %2930 = vmatpush.bf16.msrb.mxu2 %v6566_v63  ;;  %v1613_v63 = vpop.f32.mrf.mxu2 }
 0x177   : > { %2879 = vmatpush.bf16.msra.mxu3 %v6746_v51  ;;  %v6643_v51 = vld [vmem:[%s9088_s23 + $0x798] sm:$0xf0] }
 0x178   : > { %2919 = vmatpush.bf16.msra.mxu0 %v6486_v13  ;;  %v6646_v5 = vor.u32 %v8260_v61, %v6643_v51  ;;  %v8274_v13 = vld [vmem:[%s9088_s23 + $0x804] sm:$0xf]  ;;  %v6622_v51 = vor.u32 %v8254_v38, %v6619_v42  ;;  %v6587_v42 = vld [vmem:[%s9088_s23 + $0x728] sm:$0xf0] }
 0x179   : > { %2893 = vmatpush.bf16.msra.mxu1 %v6802_v12  ;;  %6847 = vmatmul.msk.bf16.vlgmr.msra.gmra.mxu2 %vm1443_vm0, %v9707_v47  ;;  %v6635_v12 = vld [vmem:[%s9088_s23 + $0x788] sm:$0xf0]  ;;  %v6702_v52 = vor.u32 %v8274_v13, %v6699_v14 }
 0x17a   : > { %2931 = vmatpush.bf16.msrb.mxu2 %v6558_v6  ;;  %v8308_v6 = vld [vmem:[%s9088_s23 + $0x914] sm:$0xf]  ;;  %v6603_v14 = vld [vmem:[%s9088_s23 + $0x748] sm:$0xf0] }
 0x17b   : > { %2880 = vmatpush.bf16.msra.mxu3 %v6738_v7  ;;  %v6835_v7 = vld [vmem:[%s9088_s23 + $0x918] sm:$0xf0]  ;;  %v1624_v11 = vpop.f32.mrf.mxu3 }
 0x17c   : > { %2920 = vmatpush.bf16.msra.mxu0 %v6478_v29  ;;  %v1625_v44 = vadd.f32 %v1624_v11, %v9729_v22  ;;  %v6838_v35 = vor.u32 %v8308_v6, %v6835_v7  ;;  %v6827_v22 = vld [vmem:[%s9088_s23 + $0x908] sm:$0xf0]  ;;  %v6627_v29 = vld [vmem:[%s9088_s23 + $0x778] sm:$0xf0]  ;;  %v8300_v7 = vld [vmem:[%s9088_s23 + $0x8d4] sm:$0xf] }
 0x17d   : > { %2894 = vmatpush.bf16.msra.mxu1 %v6794_v27  ;;  %v6766_v27 = vor.u32 %v8290_v16, %v6763_v17  ;;  %v6830_v32 = vor.u32 %v8306_v20, %v6827_v22  ;;  %v6630_v40 = vor.u32 %v8256_v26, %v6627_v29  ;;  %v8250_v11 = vld [vmem:[%s9088_s23 + $0x744] sm:$0xf]  ;;  %v8248_v29 = vld [vmem:[%s9088_s23 + $0x734] sm:$0xf] }
 0x17e   : > { %2932 = vmatpush.bf16.msrb.mxu2 %v6550_v23  ;;  %v3696_v23 = vmax.f32 %v1625_v44, 0.0  ;;  %v8266_v44 = vld [vmem:[%s9088_s23 + $0x7c4] sm:$0xf] }
 0x17f   : > { %2881 = vmatpush.bf16.msra.mxu3 %v6730_v25  ;;  %v6638_v25 = vor.u32 %v8258_v8, %v6635_v12  ;;  %v6803_v8 = vld [vmem:[%s9088_s23 + $0x8d8] sm:$0xf0]  ;;  %v6742_v12 = vor.u32 %v8284_v3, %v6739_v60  ;;  %v8282_v17 = vld [vmem:[%s9088_s23 + $0x844] sm:$0xf]  ;;  %v6779_v60 = vld [vmem:[%s9088_s23 + $0x8a8] sm:$0xf0] }
 0x180   : > { %2921 = vmatpush.bf16.msra.mxu0 %v6470_v41  ;;  %v9774_v4 = vpack.c.bf16 %v3696_v23, %v3695_v21  ;;  %v2170_v49 = vpop.f32.mrf.mxu0  ;;  %v6806_v21 = vor.u32 %v8300_v7, %v6803_v8  ;;  %v8298_v26 = vld [vmem:[%s9088_s23 + $0x8c4] sm:$0xf]  ;;  %v8343_v7 = vld [vmem:[%s9088_s23 + $0xa24] sm:$0xf0]  ;;  %v7099_v8 = vld [vmem:[%s9088_s23 + $0xb20] sm:$0xf] }
 0x181   : > { %2895 = vmatpush.bf16.msra.mxu1 %v6786_v39  ;;  %v6758_v39 = vor.u32 %v8288_v59, %v6755_v62  ;;  %v2144_v63 = vpop.f32.mrf.mxu1  ;;  %v8264_v59 = vld [vmem:[%s9088_s23 + $0x7b4] sm:$0xf]  ;;  %v6659_v62 = vld [vmem:[%s9088_s23 + $0x7b8] sm:$0xf0]  ;;  %v8294_v3 = vld [vmem:[%s9088_s23 + $0x8a4] sm:$0xf] }
 0x182   : > { %2933 = vmatpush.bf16.msrb.mxu2 %v6542_v34  ;;  %v6694_v34 = vor.u32 %v8272_v48, %v6691_v30  ;;  %v6595_v30 = vld [vmem:[%s9088_s23 + $0x738] sm:$0xf0] }
 0x183   : > { %2882 = vmatpush.bf16.msra.mxu3 %v6722_v36  ;;  %v8304_v36 = vld [vmem:[%s9088_s23 + $0x8f4] sm:$0xf]  ;;  %v1626_v41 = vpop.f32.mrf.mxu3  ;;  %v6598_v38 = vor.u32 %v8248_v29, %v6595_v30  ;;  %v8323_v29 = vld [vmem:[%s9088_s23 + $0x984] sm:$0xf0] }
 0x184   : > { %2922 = vmatpush.bf16.msra.mxu0 %v6462_v31  ;;  %v6822_v61 = vor.u32 %v8304_v36, %v6819_v37  ;;  %v2145_v31 = vadd.f32 %v2144_v63, %v924_v54  ;;  %v8296_v37 = vld [vmem:[%s9088_s23 + $0x8b4] sm:$0xf]  ;;  %v8246_v41 = vld [vmem:[%s9088_s23 + $0x724] sm:$0xf]  ;;  %v8355_v30 = vld [vmem:[%s9088_s23 + $0xa84] sm:$0xf0] }
 0x185   : > { %2896 = vmatpush.bf16.msra.mxu1 %v6778_v2  ;;  %v6675_v2 = vld [vmem:[%s9088_s23 + $0x7d8] sm:$0xf0]  ;;  %v8278_v54 = vld [vmem:[%s9088_s23 + $0x824] sm:$0xf] }
 0x186   : > { %2934 = vmatpush.bf16.msrb.mxu2 %v6534_v57  ;;  %v6811_v57 = vld [vmem:[%s9088_s23 + $0x8e8] sm:$0xf0]  ;;  %v6678_v6 = vor.u32 %v8268_v1, %v6675_v2  ;;  %v6590_v2 = vor.u32 %v8246_v41, %v6587_v42  ;;  %v6883_v41 = vld [vmem:[%s9088_s23 + $0x970] sm:$0xf]  ;;  %v8321_v42 = vld [vmem:[%s9088_s23 + $0x974] sm:$0xf0] }
 0x187   : > { %2883 = vmatpush.bf16.msra.mxu3 %v6714_v58  ;;  %2923 = vmatmul.bf16.vlgmr.msra.gmra.mxu0 %v9669_v9  ;;  %v8286_v9 = vld [vmem:[%s9088_s23 + $0x864] sm:$0xf]  ;;  %v6843_v1 = vld [vmem:[%s9088_s23 + $0x928] sm:$0xf0] }
 0x188   : > { %2967 = vmatpush.bf16.msrb.mxu0 %v6774_v10  ;;  %2897 = vmatmul.bf16.vlgmr.msra.gmra.mxu1 %v9711_v28  ;;  %v6750_v58 = vor.u32 %v8286_v9, %v6747_v46  ;;  %v2172_v10 = vpop.f32.mrf.mxu0  ;;  %v6651_v46 = vld [vmem:[%s9088_s23 + $0x7a8] sm:$0xf0] }
 0x189   : > { %2954 = vmatpush.bf16.msrb.mxu1 %v6710_v53  ;;  %v2146_v23 = vpop.f32.mrf.mxu1  ;;  %v8375_v10 = vld [vmem:[%s9088_s23 + $0xb24] sm:$0xf0] }
 0x18a   : > { %2884 = vmatmul.bf16.vlgmr.msra.gmra.mxu3 %v9709_v50  ;;  %2935 = vmatpush.bf16.msrb.mxu2 %v6526_v15  ;;  %v6667_v15 = vld [vmem:[%s9088_s23 + $0x7c8] sm:$0xf0] }
 0x18b   : > { %2941 = vmatpush.bf16.msrb.mxu3 %v6646_v5  ;;  %v6814_v5 = vor.u32 %v8302_v56, %v6811_v57  ;;  %v7035_v56 = vld [vmem:[%s9088_s23 + $0xaa0] sm:$0xf] }
 0x18c   : > { %2968 = vmatpush.bf16.msrb.mxu0 %v6766_v27  ;;  %v2183_v20 = vpop.f32.mrf.mxu2  ;;  %v6795_v27 = vld [vmem:[%s9088_s23 + $0x8c8] sm:$0xf0] }
 0x18d   : > { %2955 = vmatpush.bf16.msrb.mxu1 %v6702_v52  ;;  %2936 = vmatmul.bf16.vlgmr.msrb.gmra.mxu2 %v9681_v19  ;;  %v8252_v19 = vld [vmem:[%s9088_s23 + $0x754] sm:$0xf]  ;;  %v2157_v13 = vpop.f32.mrf.mxu3  ;;  %v6670_v52 = vor.u32 %v8266_v44, %v6667_v15  ;;  %v6798_v36 = vor.u32 %v8298_v26, %v6795_v27  ;;  %v6782_v44 = vor.u32 %v8294_v3, %v6779_v60  ;;  %v7027_v15 = vld [vmem:[%s9088_s23 + $0xa90] sm:$0xf]  ;;  %v6891_v27 = vld [vmem:[%s9088_s23 + $0x980] sm:$0xf] }
 0x18e   : > { %2980 = vmatpush.bf16.msra.mxu2 %v6838_v35  ;;  %v6614_v53 = vor.u32 %v8252_v19, %v6611_v0  ;;  %v2158_v16 = vadd.f32 %v2157_v13, %v2145_v31  ;;  %v6731_v35 = vld [vmem:[%s9088_s23 + $0x848] sm:$0xf0]  ;;  %v8310_v0 = vld [vmem:[%s9088_s23 + $0x924] sm:$0xf]  ;;  %v6654_v31 = vor.u32 %v8262_v43, %v6651_v46  ;;  %v6899_v13 = vld [vmem:[%s9088_s23 + $0x990] sm:$0xf] }
 0x18f   : > { %2942 = vmatpush.bf16.msrb.mxu3 %v6638_v25  ;;  %v6606_v25 = vor.u32 %v8250_v11, %v6603_v14  ;;  %v6734_v48 = vor.u32 %v8282_v17, %v6731_v35  ;;  %v8325_v14 = vld [vmem:[%s9088_s23 + $0x994] sm:$0xf0]  ;;  %v7100_v35 = vor.u32 %v8375_v10, %v7099_v8  ;;  %v7011_v43 = vld [vmem:[%s9088_s23 + $0xa70] sm:$0xf]  ;;  %v7067_v60 = vld [vmem:[%s9088_s23 + $0xae0] sm:$0xf] }
 0x190   : > { %2969 = vmatpush.bf16.msrb.mxu0 %v6758_v39  ;;  %v2171_v22 = vadd.f32 %v2170_v49, %v2158_v16  ;;  %v6787_v49 = vld [vmem:[%s9088_s23 + $0x8b8] sm:$0xf0]  ;;  %v6662_v39 = vor.u32 %v8264_v59, %v6659_v62  ;;  %v9824_v45 = vpop.f32.mrf.mxu0  ;;  %v8357_v16 = vld [vmem:[%s9088_s23 + $0xa94] sm:$0xf0]  ;;  %v6900_v23 = vor.u32 %v8325_v14, %v6899_v13 }
 0x191   : > { %2956 = vmatpush.bf16.msrb.mxu1 %v6694_v34  ;;  %v6723_v34 = vld [vmem:[%s9088_s23 + $0x838] sm:$0xf0]  ;;  %v6790_v19 = vor.u32 %v8296_v37, %v6787_v49  ;;  %v7028_v26 = vor.u32 %v8357_v16, %v7027_v15  ;;  %v8339_v37 = vld [vmem:[%s9088_s23 + $0xa04] sm:$0xf0]  ;;  %v7083_v49 = vld [vmem:[%s9088_s23 + $0xb00] sm:$0xf] }
 0x192   : > { %2981 = vmatpush.bf16.msra.mxu2 %v6830_v32  ;;  %v9815_v32 = vadd.f32 %v2183_v20, %v2171_v22  ;;  %v6963_v20 = vld [vmem:[%s9088_s23 + $0xa10] sm:$0xf]  ;;  %v8373_v22 = vld [vmem:[%s9088_s23 + $0xb14] sm:$0xf0] }
 0x193   : > { %2943 = vmatpush.bf16.msrb.mxu3 %v6630_v40  ;;  %v8280_v40 = vld [vmem:[%s9088_s23 + $0x834] sm:$0xf]  ;;  %v8317_v8 = vld [vmem:[%s9088_s23 + $0x954] sm:$0xf0]  ;;  %v6931_v15 = vld [vmem:[%s9088_s23 + $0x9d0] sm:$0xf] }
 0x194   : > { %2970 = vmatpush.bf16.msrb.mxu0 %v6750_v58  ;;  %v6726_v9 = vor.u32 %v8280_v40, %v6723_v34  ;;  %v2185_v57 = vpop.f32.mrf.mxu2  ;;  %v8359_v58 = vld [vmem:[%s9088_s23 + $0xaa4] sm:$0xf0]  ;;  %v6955_v40 = vld [vmem:[%s9088_s23 + $0xa00] sm:$0xf]  ;;  %v8349_v13 = vld [vmem:[%s9088_s23 + $0xa54] sm:$0xf0] }
 0x195   : > { %2957 = vmatpush.bf16.msrb.mxu1 %v6686_v55  ;;  %v2159_v63 = vpop.f32.mrf.mxu3  ;;  %v8327_v55 = vld [vmem:[%s9088_s23 + $0x9a4] sm:$0xf0]  ;;  %v7036_v11 = vor.u32 %v8359_v58, %v7035_v56  ;;  %v7003_v57 = vld [vmem:[%s9088_s23 + $0xa60] sm:$0xf] }
 0x196   : > { %2982 = vmatpush.bf16.msra.mxu2 %v6822_v61  ;;  %v6715_v61 = vld [vmem:[%s9088_s23 + $0x828] sm:$0xf0]  ;;  %v8369_v63 = vld [vmem:[%s9088_s23 + $0xaf4] sm:$0xf0] }
 0x197   : > { %2944 = vmatpush.bf16.msrb.mxu3 %v6622_v51  ;;  %v6907_v51 = vld [vmem:[%s9088_s23 + $0x9a0] sm:$0xf] }
 0x198   : > { %2971 = vmatpush.bf16.msrb.mxu0 %v6742_v12  ;;  %v6846_v12 = vor.u32 %v8310_v0, %v6843_v1  ;;  %v6939_v1 = vld [vmem:[%s9088_s23 + $0x9e0] sm:$0xf] }
 0x199   : > { %2958 = vmatpush.bf16.msrb.mxu1 %v6678_v6  ;;  %v6908_v6 = vor.u32 %v8327_v55, %v6907_v51  ;;  %v6875_v51 = vld [vmem:[%s9088_s23 + $0x960] sm:$0xf]  ;;  %v8319_v55 = vld [vmem:[%s9088_s23 + $0x964] sm:$0xf0] }
 0x19a   : > { %2983 = vmatpush.bf16.msra.mxu2 %v6814_v5  ;;  %v6971_v5 = vld [vmem:[%s9088_s23 + $0xa20] sm:$0xf]  ;;  %v6876_v3 = vor.u32 %v8319_v55, %v6875_v51 }
 0x19b   : > { %2945 = vmatpush.bf16.msrb.mxu3 %v6614_v53  ;;  %v6718_v53 = vor.u32 %v8278_v54, %v6715_v61  ;;  %v6972_v17 = vor.u32 %v8343_v7, %v6971_v5  ;;  %v6884_v54 = vor.u32 %v8321_v42, %v6883_v41  ;;  %v7075_v61 = vld [vmem:[%s9088_s23 + $0xaf0] sm:$0xf]  ;;  %v8367_v5 = vld [vmem:[%s9088_s23 + $0xae4] sm:$0xf0] }
 0x19c   : > { %2972 = vmatpush.bf16.msrb.mxu0 %v6734_v48  ;;  %v7019_v48 = vld [vmem:[%s9088_s23 + $0xa80] sm:$0xf]  ;;  %v7076_v0 = vor.u32 %v8369_v63, %v7075_v61  ;;  %v6867_v7 = vld [vmem:[%s9088_s23 + $0x950] sm:$0xf]  ;;  %v8391_v41 = vld [vmem:[%s9088_s23 + $0xba4] sm:$0xf0] }
 0x19d   : > { %2959 = vmatpush.bf16.msrb.mxu1 %v6670_v52  ;;  %v7091_v52 = vld [vmem:[%s9088_s23 + $0xb10] sm:$0xf]  ;;  %v8329_v61 = vld [vmem:[%s9088_s23 + $0x9b4] sm:$0xf0] }
 0x19e   : > { %2984 = vmatpush.bf16.msra.mxu2 %v6806_v21  ;;  %v2224_v21 = vpop.f32.mrf.mxu0  ;;  %v7092_v62 = vor.u32 %v8373_v22, %v7091_v52  ;;  %v6859_v52 = vld [vmem:[%s9088_s23 + $0x940] sm:$0xf]  ;;  %v8315_v22 = vld [vmem:[%s9088_s23 + $0x944] sm:$0xf0]  ;;  %v7043_v63 = vld [vmem:[%s9088_s23 + $0xab0] sm:$0xf] }
 0x19f   : > { %2946 = vmatpush.bf16.msrb.mxu3 %v6606_v25  ;;  %v8341_v25 = vld [vmem:[%s9088_s23 + $0xa14] sm:$0xf0] }
 0x1a0   : > { %2973 = vmatpush.bf16.msrb.mxu0 %v6726_v9  ;;  %v6964_v59 = vor.u32 %v8341_v25, %v6963_v20  ;;  %v8353_v9 = vld [vmem:[%s9088_s23 + $0xa74] sm:$0xf0]  ;;  %v7059_v20 = vld [vmem:[%s9088_s23 + $0xad0] sm:$0xf] }
 0x1a1   : > { %2960 = vmatpush.bf16.msrb.mxu1 %v6662_v39  ;;  %v2196_v34 = vpop.f32.mrf.mxu1  ;;  %v7020_v39 = vor.u32 %v8355_v30, %v7019_v48  ;;  %v8365_v21 = vld [vmem:[%s9088_s23 + $0xad4] sm:$0xf0]  ;;  %v8347_v48 = vld [vmem:[%s9088_s23 + $0xa44] sm:$0xf0] }
 0x1a2   : > { %2985 = vmatpush.bf16.msra.mxu2 %v6798_v36  ;;  %v6892_v36 = vor.u32 %v8323_v29, %v6891_v27  ;;  %v6987_v29 = vld [vmem:[%s9088_s23 + $0xa40] sm:$0xf]  ;;  %v7060_v30 = vor.u32 %v8365_v21, %v7059_v20  ;;  %v9935_v20 = vld [vmem:[#allocation1] sm:$0xff] }
 0x1a3   : > { %2947 = vmatpush.bf16.msrb.mxu3 %v6598_v38  ;;  %v8371_v38 = vld [vmem:[%s9088_s23 + $0xb04] sm:$0xf0]  ;;  %v9937_v21 = vld [vmem:[#allocation1 + $0x1b] sm:$0xff] }
 0x1a4   : > { %2974 = vmatpush.bf16.msrb.mxu0 %v6718_v53  ;;  %v7084_v46 = vor.u32 %v8371_v38, %v7083_v49  ;;  %v8313_v49 = vld [vmem:[%s9088_s23 + $0x934] sm:$0xf0]  ;;  %v6979_v38 = vld [vmem:[%s9088_s23 + $0xa30] sm:$0xf] }
 0x1a5   : > { %2961 = vmatpush.bf16.msrb.mxu1 %v6654_v31  ;;  %v925_v31 = vperm.slane %v9780_v33, 1 }
 0x1a6   : > { %2986 = vmatpush.bf16.msra.mxu2 %v6790_v19  ;;  %v2248_v56 = vpop.f32.mrf.mxu0  ;;  %v8351_v19 = vld [vmem:[%s9088_s23 + $0xa64] sm:$0xf0] }
 0x1a7   : > { %2948 = vmatpush.bf16.msrb.mxu3 %v6590_v2  ;;  %2975 = vmatmul.bf16.vlgmr.msrb.gmra.mxu0 %v9709_v50  ;;  %v6956_v50 = vor.u32 %v8339_v37, %v6955_v40  ;;  %v8335_v2 = vld [vmem:[%s9088_s23 + $0x9e4] sm:$0xf0]  ;;  %v6851_v37 = vld [vmem:[%s9088_s23 + $0x930] sm:$0xf] }
 0x1a8   : > { %3539 = vmatpush.bf16.msra.mxu0 %v7036_v11  ;;  %2962 = vmatmul.bf16.vlgmr.msrb.gmra.mxu1 %v9685_v24  ;;  %v7012_v24 = vor.u32 %v8353_v9, %v7011_v43  ;;  %v6940_v11 = vor.u32 %v8335_v2, %v6939_v1  ;;  %v8331_v40 = vld [vmem:[%s9088_s23 + $0x9c4] sm:$0xf0]  ;;  %v8342_v1 = vld [vmem:[%s9088_s23 + $0xa24] sm:$0xf]  ;;  %v6973_v2 = vld [vmem:[%s9088_s23 + $0xa28] sm:$0xf0] }
 0x1a9   : > { %3513 = vmatpush.bf16.msra.mxu1 %v6908_v6  ;;  %v2198_v53 = vpop.f32.mrf.mxu1  ;;  %v7004_v6 = vor.u32 %v8351_v19, %v7003_v57  ;;  %v8407_v57 = vld [vmem:[%s9088_s23 + $0xc24] sm:$0xf0]  ;;  %v8326_v19 = vld [vmem:[%s9088_s23 + $0x9a4] sm:$0xf] }
 0x1aa   : > { %2949 = vmatmul.bf16.vlgmr.msrb.gmra.mxu3 %v9679_v18  ;;  %2987 = vmatpush.bf16.msra.mxu2 %v6782_v44  ;;  %v2197_v18 = vadd.f32 %v2196_v34, %v9815_v32  ;;  %v6947_v32 = vld [vmem:[%s9088_s23 + $0x9f0] sm:$0xf]  ;;  %v7068_v44 = vor.u32 %v8367_v5, %v7067_v60  ;;  %v7051_v34 = vld [vmem:[%s9088_s23 + $0xac0] sm:$0xf]  ;;  %v8389_v5 = vld [vmem:[%s9088_s23 + $0xb94] sm:$0xf0] }
 0x1ab   : > { %3000 = vmatpush.bf16.msra.mxu3 %v6846_v12  ;;  %v6995_v12 = vld [vmem:[%s9088_s23 + $0xa50] sm:$0xf] }
 0x1ac   : > { %3540 = vmatpush.bf16.msra.mxu0 %v7028_v26  ;;  %v2235_v14 = vpop.f32.mrf.mxu2  ;;  %v6996_v25 = vor.u32 %v8349_v13, %v6995_v12  ;;  %v7155_v60 = vld [vmem:[%s9088_s23 + $0xb90] sm:$0xf]  ;;  %v8324_v12 = vld [vmem:[%s9088_s23 + $0x994] sm:$0xf] }
 0x1ad   : > { %3514 = vmatpush.bf16.msra.mxu1 %v6900_v23  ;;  %2988 = vmatmul.bf16.vlgmr.msra.gmra.mxu2 %v9711_v28  ;;  %v8337_v28 = vld [vmem:[%s9088_s23 + $0x9f4] sm:$0xf0]  ;;  %v2209_v10 = vpop.f32.mrf.mxu3  ;;  %v2236_v16 = vadd.f32 %v2235_v14, %v925_v31  ;;  %v9922_v53 = vld [vmem:[#allocation1 + $0x12] sm:$0xff]  ;;  %v7156_v13 = vor.u32 %v8389_v5, %v7155_v60  ;;  %v6901_v14 = vld [vmem:[%s9088_s23 + $0x998] sm:$0xf0] }
 0x1ae   : > { %3552 = vmatpush.bf16.msrb.mxu2 %v7100_v35  ;;  %v6948_v58 = vor.u32 %v8337_v28, %v6947_v32  ;;  %v2210_v33 = vadd.f32 %v2209_v10, %v2197_v18  ;;  %v8333_v35 = vld [vmem:[%s9088_s23 + $0x9d4] sm:$0xf0]  ;;  %v2250_v27 = vpop.f32.mrf.mxu0  ;;  %v7235_v32 = vld [vmem:[%s9088_s23 + $0xc30] sm:$0xf]  ;;  %v6852_v28 = vor.u32 %v8313_v49, %v6851_v37 }
 0x1af   : > { %3526 = vmatpush.bf16.msrb.mxu3 %v6972_v17  ;;  %v6868_v17 = vor.u32 %v8317_v8, %v6867_v7  ;;  %v9892_v26 = vadd.f32 %v2248_v56, %v2236_v16  ;;  %v8345_v18 = vld [vmem:[%s9088_s23 + $0xa34] sm:$0xf0]  ;;  %v7227_v56 = vld [vmem:[%s9088_s23 + $0xc20] sm:$0xf]  ;;  %v6976_v8 = vor.u32 %v8342_v1, %v6973_v2  ;;  %v7219_v10 = vld [vmem:[%s9088_s23 + $0xc10] sm:$0xf] }
 0x1b0   : > { %3541 = vmatpush.bf16.msra.mxu0 %v7020_v39  ;;  %v9888_v23 = vadd.f32 %v9824_v45, %v2210_v33  ;;  %v6932_v45 = vor.u32 %v8333_v35, %v6931_v15  ;;  %v7163_v39 = vld [vmem:[%s9088_s23 + $0xba0] sm:$0xf]  ;;  %v6980_v51 = vor.u32 %v8345_v18, %v6979_v38  ;;  %v8340_v33 = vld [vmem:[%s9088_s23 + $0xa14] sm:$0xf]  ;;  %v8403_v27 = vld [vmem:[%s9088_s23 + $0xc04] sm:$0xf0] }
 0x1b1   : > { %3515 = vmatpush.bf16.msra.mxu1 %v6892_v36  ;;  %v8363_v36 = vld [vmem:[%s9088_s23 + $0xac4] sm:$0xf0]  ;;  %v7164_v55 = vor.u32 %v8391_v41, %v7163_v39  ;;  %v7147_v16 = vld [vmem:[%s9088_s23 + $0xb80] sm:$0xf]  ;;  %v7203_v38 = vld [vmem:[%s9088_s23 + $0xbf0] sm:$0xf] }
 0x1b2   : > { %3553 = vmatpush.bf16.msrb.mxu2 %v7092_v62  ;;  %v6860_v62 = vor.u32 %v8315_v22, %v6859_v52  ;;  %v9930_v15 = vld [vmem:[#allocation1 + $0x9] sm:$0xff]  ;;  %v8401_v18 = vld [vmem:[%s9088_s23 + $0xbf4] sm:$0xf0]  ;;  %v6885_v41 = vld [vmem:[%s9088_s23 + $0x978] sm:$0xf0] }
 0x1b3   : > { %3527 = vmatpush.bf16.msrb.mxu3 %v6964_v59  ;;  %v6923_v59 = vld [vmem:[%s9088_s23 + $0x9c0] sm:$0xf] }
 0x1b4   : > { %3542 = vmatpush.bf16.msra.mxu0 %v7012_v24  ;;  %v2237_v43 = vpop.f32.mrf.mxu2  ;;  %v6924_v9 = vor.u32 %v8331_v40, %v6923_v59  ;;  %v8361_v24 = vld [vmem:[%s9088_s23 + $0xab4] sm:$0xf0]  ;;  %v7211_v22 = vld [vmem:[%s9088_s23 + $0xc00] sm:$0xf]  ;;  %v8338_v59 = vld [vmem:[%s9088_s23 + $0xa04] sm:$0xf] }
 0x1b5   : > { %3516 = vmatpush.bf16.msra.mxu1 %v6884_v54  ;;  %v2211_v42 = vpop.f32.mrf.mxu3  ;;  %v8409_v54 = vld [vmem:[%s9088_s23 + $0xc34] sm:$0xf0]  ;;  %v6949_v43 = vld [vmem:[%s9088_s23 + $0x9f8] sm:$0xf0] }
 0x1b6   : > { %3554 = vmatpush.bf16.msrb.mxu2 %v7084_v46  ;;  %v6915_v46 = vld [vmem:[%s9088_s23 + $0x9b0] sm:$0xf]  ;;  %v8336_v42 = vld [vmem:[%s9088_s23 + $0x9f4] sm:$0xf] }
 0x1b7   : > { %3528 = vmatpush.bf16.msrb.mxu3 %v6956_v50  ;;  %v7052_v50 = vor.u32 %v8363_v36, %v7051_v34  ;;  %v6916_v31 = vor.u32 %v8329_v61, %v6915_v46  ;;  %v7139_v34 = vld [vmem:[%s9088_s23 + $0xb70] sm:$0xf]  ;;  %v8385_v36 = vld [vmem:[%s9088_s23 + $0xb74] sm:$0xf0]  ;;  %v7195_v61 = vld [vmem:[%s9088_s23 + $0xbe0] sm:$0xf] }
 0x1b8   : > { %3543 = vmatpush.bf16.msra.mxu0 %v7004_v6  ;;  %v7228_v6 = vor.u32 %v8407_v57, %v7227_v56  ;;  %v7140_v39 = vor.u32 %v8385_v36, %v7139_v34  ;;  %v6877_v56 = vld [vmem:[%s9088_s23 + $0x968] sm:$0xf0]  ;;  %v8334_v57 = vld [vmem:[%s9088_s23 + $0x9e4] sm:$0xf]  ;;  %v7107_v36 = vld [vmem:[%s9088_s23 + $0xb30] sm:$0xf] }
 0x1b9   : > { %3517 = vmatpush.bf16.msra.mxu1 %v6876_v3  ;;  %v7044_v3 = vor.u32 %v8361_v24, %v7043_v63  ;;  %v8399_v63 = vld [vmem:[%s9088_s23 + $0xbe4] sm:$0xf0]  ;;  %v8318_v24 = vld [vmem:[%s9088_s23 + $0x964] sm:$0xf] }
 0x1ba   : > { %3555 = vmatpush.bf16.msrb.mxu2 %v7076_v0  ;;  %6848 = vmatmul.msk.bf16.vlgmr.msra.gmra.mxu3 %vm1443_vm0, %v9707_v47  ;;  %v6988_v47 = vor.u32 %v8347_v48, %v6987_v29  ;;  %v6909_v0 = vld [vmem:[%s9088_s23 + $0x9a8] sm:$0xf0]  ;;  %v8322_v29 = vld [vmem:[%s9088_s23 + $0x984] sm:$0xf]  ;;  %v6880_v5 = vor.u32 %v8318_v24, %v6877_v56 }
 0x1bb   : > { %3529 = vmatpush.bf16.msrb.mxu3 %v6948_v58  ;;  %v7236_v58 = vor.u32 %v8409_v54, %v7235_v32  ;;  %v6912_v7 = vor.u32 %v8326_v19, %v6909_v0  ;;  %v7204_v32 = vor.u32 %v8401_v18, %v7203_v38  ;;  %v6941_v19 = vld [vmem:[%s9088_s23 + $0x9e8] sm:$0xf0]  ;;  %v8381_v0 = vld [vmem:[%s9088_s23 + $0xb54] sm:$0xf0]  ;;  %v7171_v18 = vld [vmem:[%s9088_s23 + $0xbb0] sm:$0xf] }
 0x1bc   : > { %3544 = vmatpush.bf16.msra.mxu0 %v6996_v25  ;;  %v6904_v25 = vor.u32 %v8324_v12, %v6901_v14  ;;  %v6869_v12 = vld [vmem:[%s9088_s23 + $0x958] sm:$0xf0]  ;;  %v7037_v38 = vld [vmem:[%s9088_s23 + $0xaa8] sm:$0xf0]  ;;  %v8374_v24 = vld [vmem:[%s9088_s23 + $0xb24] sm:$0xf] }
 0x1bd   : > { %3518 = vmatpush.bf16.msra.mxu1 %v6868_v17  ;;  %v8387_v17 = vld [vmem:[%s9088_s23 + $0xb84] sm:$0xf0]  ;;  %v6933_v14 = vld [vmem:[%s9088_s23 + $0x9d8] sm:$0xf0] }
 0x1be   : > { %3556 = vmatpush.bf16.msrb.mxu2 %v7068_v44  ;;  %v6965_v44 = vld [vmem:[%s9088_s23 + $0xa18] sm:$0xf0] }
 0x1bf   : > { %3530 = vmatpush.bf16.msrb.mxu3 %v6940_v11  ;;  %v8405_v11 = vld [vmem:[%s9088_s23 + $0xc14] sm:$0xf0]  ;;  %v6968_v52 = vor.u32 %v8340_v33, %v6965_v44  ;;  %v7115_v44 = vld [vmem:[%s9088_s23 + $0xb40] sm:$0xf] }
 0x1c0   : > { %3545 = vmatpush.bf16.msra.mxu0 %v6988_v47  ;;  %v7220_v35 = vor.u32 %v8405_v11, %v7219_v10  ;;  %v7212_v47 = vor.u32 %v8403_v27, %v7211_v22  ;;  %v9970_v10 = vld [vmem:[#allocation1 + $0x36] sm:$0xff]  ;;  %v7179_v27 = vld [vmem:[%s9088_s23 + $0xbc0] sm:$0xf] }
 0x1c1   : > { %3519 = vmatpush.bf16.msra.mxu1 %v6860_v62  ;;  %v2261_v48 = vpop.f32.mrf.mxu1  ;;  %v6957_v62 = vld [vmem:[%s9088_s23 + $0xa08] sm:$0xf0] }
 0x1c2   : > { %3557 = vmatpush.bf16.msrb.mxu2 %v7060_v30  ;;  %v6893_v30 = vld [vmem:[%s9088_s23 + $0x988] sm:$0xf0]  ;;  %v2262_v40 = vadd.f32 %v2261_v48, %v9892_v26  ;;  %v6960_v49 = vor.u32 %v8338_v59, %v6957_v62  ;;  %v8320_v26 = vld [vmem:[%s9088_s23 + $0x974] sm:$0xf]  ;;  %v8314_v48 = vld [vmem:[%s9088_s23 + $0x944] sm:$0xf] }
 0x1c3   : > { %3531 = vmatpush.bf16.msrb.mxu3 %v6932_v45  ;;  %v7148_v45 = vor.u32 %v8387_v17, %v7147_v16  ;;  %v6896_v37 = vor.u32 %v8322_v29, %v6893_v30  ;;  %v6888_v54 = vor.u32 %v8320_v26, %v6885_v41  ;;  %v8379_v16 = vld [vmem:[%s9088_s23 + $0xb44] sm:$0xf0]  ;;  %v6861_v59 = vld [vmem:[%s9088_s23 + $0x948] sm:$0xf0]  ;;  %v8330_v62 = vld [vmem:[%s9088_s23 + $0x9c4] sm:$0xf] }
 0x1c4   : > { %3546 = vmatpush.bf16.msra.mxu0 %v6980_v51  ;;  %v2300_v46 = vpop.f32.mrf.mxu0  ;;  %v8395_v29 = vld [vmem:[%s9088_s23 + $0xbc4] sm:$0xf0]  ;;  %v7116_v30 = vor.u32 %v8379_v16, %v7115_v44  ;;  %v3697_v41 = vmax.f32 %v9888_v23, 0.0  ;;  %v7221_v44 = vld [vmem:[%s9088_s23 + $0xc18] sm:$0xf0] }
 0x1c5   : > { %3520 = vmatpush.bf16.msra.mxu1 %v6852_v28  ;;  %v6952_v28 = vor.u32 %v8336_v42, %v6949_v43  ;;  %v6864_v43 = vor.u32 %v8314_v48, %v6861_v59  ;;  %v10015_v16 = vld [vmem:[#allocation1 + $0x2d] sm:$0xff] }
 0x1c6   : > { %3558 = vmatpush.bf16.msrb.mxu2 %v7052_v50  ;;  %v8383_v50 = vld [vmem:[%s9088_s23 + $0xb64] sm:$0xf0]  ;;  %v8386_v48 = vld [vmem:[%s9088_s23 + $0xb84] sm:$0xf] }
 0x1c7   : > { %3532 = vmatpush.bf16.msrb.mxu3 %v6924_v9  ;;  %3547 = vmatmul.bf16.vlgmr.msra.gmra.mxu0 %v9922_v53  ;;  %v7131_v9 = vld [vmem:[%s9088_s23 + $0xb60] sm:$0xf]  ;;  %v8402_v59 = vld [vmem:[%s9088_s23 + $0xc04] sm:$0xf] }
 0x1c8   : > { %3598 = vmatpush.bf16.msrb.mxu0 %v7236_v58  ;;  %3521 = vmatmul.bf16.vlgmr.msra.gmra.mxu1 %v9935_v20  ;;  %v7123_v58 = vld [vmem:[%s9088_s23 + $0xb50] sm:$0xf] }
 0x1c9   : > { %3565 = vmatpush.bf16.msrb.mxu1 %v7164_v55  ;;  %v2263_v51 = vpop.f32.mrf.mxu1  ;;  %v7132_v55 = vor.u32 %v8383_v50, %v7131_v9  ;;  %v7124_v11 = vor.u32 %v8381_v0, %v7123_v58  ;;  %v8393_v50 = vld [vmem:[%s9088_s23 + $0xbb4] sm:$0xf0]  ;;  %v7229_v58 = vld [vmem:[%s9088_s23 + $0xc28] sm:$0xf0] }
 0x1ca   : > { %3559 = vmatpush.bf16.msrb.mxu2 %v7044_v3  ;;  %v7187_v3 = vld [vmem:[%s9088_s23 + $0xbd0] sm:$0xf]  ;;  %v7101_v51 = vld [vmem:[%s9088_s23 + $0xb28] sm:$0xf0]  ;;  %v7172_v56 = vor.u32 %v8393_v50, %v7171_v18  ;;  %v8384_v18 = vld [vmem:[%s9088_s23 + $0xb74] sm:$0xf] }
 0x1cb   : > { %3533 = vmatpush.bf16.msrb.mxu3 %v6916_v31  ;;  %v7196_v31 = vor.u32 %v8399_v63, %v7195_v61  ;;  %v6917_v61 = vld [vmem:[%s9088_s23 + $0x9b8] sm:$0xf0] }
 0x1cc   : > { %3617 = vmatpush.bf16.msra.mxu0 %v6976_v8  ;;  %v2287_v2 = vpop.f32.mrf.mxu2  ;;  %v8316_v8 = vld [vmem:[%s9088_s23 + $0x954] sm:$0xf]  ;;  %v2302_v17 = vpop.f32.mrf.mxu0 }
 0x1cd   : > { %3566 = vmatpush.bf16.msrb.mxu1 %v7156_v13  ;;  %3560 = vmatmul.bf16.vlgmr.msrb.gmra.mxu2 %v9937_v21  ;;  %v2274_v1 = vpop.f32.mrf.mxu3  ;;  %v8332_v13 = vld [vmem:[%s9088_s23 + $0x9d4] sm:$0xf]  ;;  %v8354_v17 = vld [vmem:[%s9088_s23 + $0xa84] sm:$0xf] }
 0x1ce   : > { %3604 = vmatpush.bf16.msra.mxu2 %v6912_v7  ;;  %3534 = vmatmul.bf16.vlgmr.msrb.gmra.mxu3 %v9930_v15  ;;  %v2275_v60 = vadd.f32 %v2274_v1, %v2262_v40  ;;  %v8397_v7 = vld [vmem:[%s9088_s23 + $0xbd4] sm:$0xf0]  ;;  %v6936_v22 = vor.u32 %v8332_v13, %v6933_v14  ;;  %v6925_v40 = vld [vmem:[%s9088_s23 + $0x9c8] sm:$0xf0]  ;;  %v8356_v1 = vld [vmem:[%s9088_s23 + $0xa94] sm:$0xf] }
 0x1cf   : > { %3578 = vmatpush.bf16.msra.mxu3 %v7228_v6  ;;  %v6944_v6 = vor.u32 %v8334_v57, %v6941_v19  ;;  %v6928_v9 = vor.u32 %v8330_v62, %v6925_v40  ;;  %v7165_v57 = vld [vmem:[%s9088_s23 + $0xba8] sm:$0xf0]  ;;  %v8406_v19 = vld [vmem:[%s9088_s23 + $0xc24] sm:$0xf]  ;;  %v7157_v14 = vld [vmem:[%s9088_s23 + $0xb98] sm:$0xf0] }
 0x1d0   : > { %3618 = vmatpush.bf16.msra.mxu0 %v6968_v52  ;;  %v2288_v33 = vadd.f32 %v2287_v2, %v2275_v60  ;;  %v6872_v52 = vor.u32 %v8316_v8, %v6869_v12  ;;  %v7029_v2 = vld [vmem:[%s9088_s23 + $0xa98] sm:$0xf0]  ;;  %v7104_v60 = vor.u32 %v8374_v24, %v7101_v51  ;;  %v8372_v8 = vld [vmem:[%s9088_s23 + $0xb14] sm:$0xf]  ;;  %v7213_v62 = vld [vmem:[%s9088_s23 + $0xc08] sm:$0xf0] }
 0x1d1   : > { %3567 = vmatpush.bf16.msrb.mxu1 %v7148_v45  ;;  %v2313_v45 = vpop.f32.mrf.mxu1  ;;  %v8388_v12 = vld [vmem:[%s9088_s23 + $0xb94] sm:$0xf]  ;;  %v7032_v13 = vor.u32 %v8356_v1, %v7029_v2  ;;  %v8382_v24 = vld [vmem:[%s9088_s23 + $0xb64] sm:$0xf] }
 0x1d2   : > { %3605 = vmatpush.bf16.msra.mxu2 %v6904_v25  ;;  %v2301_v25 = vadd.f32 %v2300_v46, %v2288_v33  ;;  %v8312_v46 = vld [vmem:[%s9088_s23 + $0x934] sm:$0xf] }
 0x1d3   : > { %3579 = vmatpush.bf16.msra.mxu3 %v7220_v35  ;;  %v7188_v35 = vor.u32 %v8397_v7, %v7187_v3  ;;  %v7232_v7 = vor.u32 %v8406_v19, %v7229_v58  ;;  %v8404_v33 = vld [vmem:[%s9088_s23 + $0xc14] sm:$0xf] }
 0x1d4   : > { %3619 = vmatpush.bf16.msra.mxu0 %v6960_v49  ;;  %v2314_v34 = vadd.f32 %v2313_v45, %v2301_v25  ;;  %v8358_v49 = vld [vmem:[%s9088_s23 + $0xaa4] sm:$0xf]  ;;  %v2289_v26 = vpop.f32.mrf.mxu2  ;;  %v8352_v40 = vld [vmem:[%s9088_s23 + $0xa74] sm:$0xf] }
 0x1d5   : > { %3568 = vmatpush.bf16.msrb.mxu1 %v7140_v39  ;;  %v2276_v39 = vpop.f32.mrf.mxu3  ;;  %v7040_v63 = vor.u32 %v8358_v49, %v7037_v38  ;;  %v7216_v49 = vor.u32 %v8402_v59, %v7213_v62  ;;  %v7077_v38 = vld [vmem:[%s9088_s23 + $0xaf8] sm:$0xf0]  ;;  %v10034_v26 = vld [vmem:[%s9096_s19 + $0x4] sm:$0x3]  ;;  %v8348_v58 = vld [vmem:[%s9088_s23 + $0xa54] sm:$0xf] }
 0x1d6   : > { %3606 = vmatpush.bf16.msra.mxu2 %v6896_v37  ;;  %v7180_v37 = vor.u32 %v8395_v29, %v7179_v27  ;;  %v3698_v42 = vmax.f32 %v2314_v34, 0.0  ;;  %v8370_v27 = vld [vmem:[%s9088_s23 + $0xb04] sm:$0xf]  ;;  %v7085_v29 = vld [vmem:[%s9088_s23 + $0xb08] sm:$0xf0] }
 0x1d7   : > { %3580 = vmatpush.bf16.msra.mxu3 %v7212_v47  ;;  %7241 = vmatmul.msk.bf16.vlgmr.msrb.gmra.mxu0 %vm1443_vm0, %v9970_v10  ;;  %v8377_v47 = vld [vmem:[%s9088_s23 + $0xb34] sm:$0xf0]  ;;  %v7013_v34 = vld [vmem:[%s9088_s23 + $0xa78] sm:$0xf0] }
 0x1d8   : > { %3620 = vmatpush.bf16.msra.mxu0 %v6952_v28  ;;  %v8328_v28 = vld [vmem:[%s9088_s23 + $0x9b4] sm:$0xf]  ;;  %v9996_v23 = vpack.c.bf16 %v3698_v42, %v3697_v41  ;;  %v7016_v39 = vor.u32 %v8352_v40, %v7013_v34  ;;  %v7205_v41 = vld [vmem:[%s9088_s23 + $0xbf8] sm:$0xf0]  ;;  %v7117_v40 = vld [vmem:[%s9088_s23 + $0xb48] sm:$0xf0] }
 0x1d9   : > { %3569 = vmatpush.bf16.msrb.mxu1 %v7132_v55  ;;  %v8390_v55 = vld [vmem:[%s9088_s23 + $0xba4] sm:$0xf]  ;;  %v6920_v3 = vor.u32 %v8328_v28, %v6917_v61 }
 0x1da   : > { %3607 = vmatpush.bf16.msra.mxu2 %v6888_v54  ;;  %v6853_v54 = vld [vmem:[%s9088_s23 + $0x938] sm:$0xf0]  ;;  %v8366_v61 = vld [vmem:[%s9088_s23 + $0xae4] sm:$0xf] }
 0x1db   : > { %3581 = vmatpush.bf16.msra.mxu3 %v7204_v32  ;;  %v7108_v32 = vor.u32 %v8377_v47, %v7107_v36  ;;  %v6856_v0 = vor.u32 %v8312_v46, %v6853_v54  ;;  %v7088_v36 = vor.u32 %v8370_v27, %v7085_v29  ;;  %v8368_v47 = vld [vmem:[%s9088_s23 + $0xaf4] sm:$0xf]  ;;  %v8394_v34 = vld [vmem:[%s9088_s23 + $0xbc4] sm:$0xf] }
 0x1dc   : > { %3621 = vmatpush.bf16.msra.mxu0 %v6944_v6  ;;  %v7168_v6 = vor.u32 %v8390_v55, %v7165_v57  ;;  %v7080_v46 = vor.u32 %v8368_v47, %v7077_v38  ;;  %v7133_v55 = vld [vmem:[%s9088_s23 + $0xb68] sm:$0xf0]  ;;  %v8344_v47 = vld [vmem:[%s9088_s23 + $0xa34] sm:$0xf] }
 0x1dd   : > { %3570 = vmatpush.bf16.msrb.mxu1 %v7124_v11  ;;  %v7093_v11 = vld [vmem:[%s9088_s23 + $0xb18] sm:$0xf0]  ;;  %v7197_v57 = vld [vmem:[%s9088_s23 + $0xbe8] sm:$0xf0] }
 0x1de   : > { %3608 = vmatpush.bf16.msra.mxu2 %v6880_v5  ;;  %v2315_v5 = vpop.f32.mrf.mxu1  ;;  %v7096_v25 = vor.u32 %v8372_v8, %v7093_v11  ;;  %v8380_v8 = vld [vmem:[%s9088_s23 + $0xb54] sm:$0xf] }
 0x1df   : > { %3582 = vmatpush.bf16.msra.mxu3 %v7196_v31  ;;  %v10006_v31 = vld [vmem:[#allocation1 + $0x24] sm:$0xff] }
 0x1e0   : > { %3622 = vmatpush.bf16.msra.mxu0 %v6936_v22  ;;  %v7224_v22 = vor.u32 %v8404_v33, %v7221_v44  ;;  %v7189_v33 = vld [vmem:[%s9088_s23 + $0xbd8] sm:$0xf0] }
 0x1e1   : > { %3571 = vmatpush.bf16.msrb.mxu1 %v7116_v30  ;;  %v7149_v30 = vld [vmem:[%s9088_s23 + $0xb88] sm:$0xf0] }
 0x1e2   : > { %3609 = vmatpush.bf16.msra.mxu2 %v6872_v52  ;;  %v7160_v52 = vor.u32 %v8388_v12, %v7157_v14  ;;  %v8396_v14 = vld [vmem:[%s9088_s23 + $0xbd4] sm:$0xf] }
 0x1e3   : > { %3583 = vmatpush.bf16.msra.mxu3 %v7188_v35  ;;  %v7021_v35 = vld [vmem:[%s9088_s23 + $0xa88] sm:$0xf0]  ;;  %v7192_v29 = vor.u32 %v8396_v14, %v7189_v33  ;;  %v8438_v33 = vld [vmem:[%s9103_s15 + $0xe4] sm:$0xf] }
 0x1e4   : > { %3623 = vmatpush.bf16.msra.mxu0 %v6928_v9  ;;  %v7024_v45 = vor.u32 %v8354_v17, %v7021_v35  ;;  %v7005_v9 = vld [vmem:[%s9088_s23 + $0xa68] sm:$0xf0]  ;;  %v2872_v50 = vpop.f32.mrf.mxu0  ;;  %v8346_v17 = vld [vmem:[%s9088_s23 + $0xa44] sm:$0xf] }
 0x1e5   : > { %3572 = vmatpush.bf16.msrb.mxu1 %v7108_v32  ;;  %v926_v32 = vperm.slane %v10034_v26, 0  ;;  %v6989_v35 = vld [vmem:[%s9088_s23 + $0xa48] sm:$0xf0] }
 0x1e6   : > { %3610 = vmatpush.bf16.msra.mxu2 %v6864_v43  ;;  %v2846_v42 = vpop.f32.mrf.mxu1  ;;  %v8350_v43 = vld [vmem:[%s9088_s23 + $0xa64] sm:$0xf]  ;;  %v6992_v62 = vor.u32 %v8346_v17, %v6989_v35 }
 0x1e7   : > { %3584 = vmatpush.bf16.msra.mxu3 %v7180_v37  ;;  %v7152_v37 = vor.u32 %v8386_v48, %v7149_v30  ;;  %v7008_v51 = vor.u32 %v8350_v43, %v7005_v9  ;;  %v8362_v48 = vld [vmem:[%s9088_s23 + $0xac4] sm:$0xf]  ;;  %v7045_v43 = vld [vmem:[%s9088_s23 + $0xab8] sm:$0xf0]  ;;  %v8376_v9 = vld [vmem:[%s9088_s23 + $0xb34] sm:$0xf] }
 0x1e8   : > { %3573 = vmatmul.bf16.vlgmr.msrb.gmra.mxu1 %v10006_v31  ;;  %3624 = vmatpush.bf16.msra.mxu0 %v6920_v3  ;;  %v8378_v30 = vld [vmem:[%s9088_s23 + $0xb44] sm:$0xf] }
 0x1e9   : > { %3630 = vmatpush.bf16.msra.mxu1 %v7040_v63  ;;  %v7069_v63 = vld [vmem:[%s9088_s23 + $0xae8] sm:$0xf0] }
 0x1ea   : > { %3611 = vmatpush.bf16.msra.mxu2 %v6856_v0  ;;  %v6997_v0 = vld [vmem:[%s9088_s23 + $0xa58] sm:$0xf0]  ;;  %v7072_v3 = vor.u32 %v8366_v61, %v7069_v63  ;;  %v7301_v61 = vld [vmem:[%s9103_s15 + $0x70] sm:$0xf]  ;;  %v8425_v63 = vld [vmem:[%s9103_s15 + $0x74] sm:$0xf0] }
 0x1eb   : > { %3585 = vmatpush.bf16.msra.mxu3 %v7172_v56  ;;  %3625 = vmatmul.bf16.vlgmr.msra.gmra.mxu0 %v9930_v15  ;;  %v8400_v15 = vld [vmem:[%s9088_s23 + $0xbf4] sm:$0xf]  ;;  %v8398_v56 = vld [vmem:[%s9088_s23 + $0xbe4] sm:$0xf]  ;;  %v7000_v12 = vor.u32 %v8348_v58, %v6997_v0  ;;  %v7367_v0 = vld [vmem:[%s9103_s15 + $0xf8] sm:$0xf0] }
 0x1ec   : > { %3669 = vmatpush.bf16.msrb.mxu0 %v7232_v7  ;;  %v7208_v28 = vor.u32 %v8400_v15, %v7205_v41  ;;  %v2859_v2 = vpop.f32.mrf.mxu2  ;;  %v7200_v5 = vor.u32 %v8398_v56, %v7197_v57  ;;  %v7061_v7 = vld [vmem:[%s9088_s23 + $0xad8] sm:$0xf0]  ;;  %v7120_v15 = vor.u32 %v8378_v30, %v7117_v40  ;;  %v8424_v56 = vld [vmem:[%s9103_s15 + $0x74] sm:$0xf]  ;;  %v7303_v57 = vld [vmem:[%s9103_s15 + $0x78] sm:$0xf0] }
 0x1ed   : > { %3631 = vmatpush.bf16.msra.mxu1 %v7032_v13  ;;  %3612 = vmatmul.bf16.vlgmr.msra.gmra.mxu2 %v9935_v20  ;;  %v7141_v20 = vld [vmem:[%s9088_s23 + $0xb78] sm:$0xf0]  ;;  %v2833_v19 = vpop.f32.mrf.mxu3  ;;  %v8440_v58 = vld [vmem:[%s9103_s15 + $0xf4] sm:$0xf] }
 0x1ee   : > { %3656 = vmatpush.bf16.msrb.mxu2 %v7168_v6  ;;  %3586 = vmatmul.bf16.vlgmr.msra.gmra.mxu3 %v10015_v16  ;;  %v7144_v54 = vor.u32 %v8384_v18, %v7141_v20  ;;  %v2834_v1 = vadd.f32 %v2833_v19, %v926_v32  ;;  %v8364_v6 = vld [vmem:[%s9088_s23 + $0xad4] sm:$0xf]  ;;  %v7125_v13 = vld [vmem:[%s9088_s23 + $0xb58] sm:$0xf0]  ;;  %v2848_v44 = vpop.f32.mrf.mxu1  ;;  %v8436_v30 = vld [vmem:[%s9103_s15 + $0xd4] sm:$0xf] }
 0x1ef   : > { %3643 = vmatpush.bf16.msrb.mxu3 %v7104_v60  ;;  %v7136_v60 = vor.u32 %v8382_v24, %v7133_v55  ;;  %v7128_v27 = vor.u32 %v8380_v8, %v7125_v13  ;;  %v7237_v20 = vld [vmem:[%s9088_s23 + $0xc38] sm:$0xf0]  ;;  %v8392_v32 = vld [vmem:[%s9088_s23 + $0xbb4] sm:$0xf]  ;;  %v7365_v24 = vld [vmem:[%s9103_s15 + $0xf0] sm:$0xf]  ;;  %v7370_v8 = vor.u32 %v8440_v58, %v7367_v0 }
 0x1f0   : > { %3670 = vmatpush.bf16.msrb.mxu0 %v7224_v22  ;;  %v2847_v11 = vadd.f32 %v2846_v42, %v2834_v1  ;;  %v7064_v22 = vor.u32 %v8364_v6, %v7061_v7  ;;  %v8360_v42 = vld [vmem:[%s9088_s23 + $0xab4] sm:$0xf]  ;;  %v8441_v55 = vld [vmem:[%s9103_s15 + $0xf4] sm:$0xf0]  ;;  %v8423_v6 = vld [vmem:[%s9103_s15 + $0x64] sm:$0xf0] }
 0x1f1   : > { %3632 = vmatpush.bf16.msra.mxu1 %v7024_v45  ;;  %v7053_v45 = vld [vmem:[%s9088_s23 + $0xac8] sm:$0xf0]  ;;  %v7357_v7 = vld [vmem:[%s9103_s15 + $0xe0] sm:$0xf]  ;;  %v7295_v13 = vld [vmem:[%s9103_s15 + $0x68] sm:$0xf0] }
 0x1f2   : > { %3657 = vmatpush.bf16.msrb.mxu2 %v7160_v52  ;;  %v2860_v52 = vadd.f32 %v2859_v2, %v2847_v11  ;;  %v7056_v18 = vor.u32 %v8362_v48, %v7053_v45  ;;  %v7302_v2 = vor.u32 %v8425_v63, %v7301_v61  ;;  %v8439_v11 = vld [vmem:[%s9103_s15 + $0xe4] sm:$0xf0]  ;;  %v7359_v44 = vld [vmem:[%s9103_s15 + $0xe8] sm:$0xf0]  ;;  %v8420_v48 = vld [vmem:[%s9103_s15 + $0x54] sm:$0xf] }
 0x1f3   : > { %3644 = vmatpush.bf16.msrb.mxu3 %v7096_v25  ;;  %v2874_v25 = vpop.f32.mrf.mxu0  ;;  %v7358_v35 = vor.u32 %v8439_v11, %v7357_v7  ;;  %v7287_v45 = vld [vmem:[%s9103_s15 + $0x58] sm:$0xf0]  ;;  %v8416_v61 = vld [vmem:[%s9103_s15 + $0x34] sm:$0xf]  ;;  %v7261_v0 = vld [vmem:[%s9103_s15 + $0x20] sm:$0xf] }
 0x1f4   : > { %3671 = vmatpush.bf16.msrb.mxu0 %v7216_v49  ;;  %v10061_v59 = vadd.f32 %v2872_v50, %v2860_v52  ;;  %v2861_v38 = vpop.f32.mrf.mxu2  ;;  %v7285_v52 = vld [vmem:[%s9103_s15 + $0x50] sm:$0xf]  ;;  %v7271_v63 = vld [vmem:[%s9103_s15 + $0x38] sm:$0xf0]  ;;  %v7263_v7 = vld [vmem:[%s9103_s15 + $0x28] sm:$0xf0] }
 0x1f5   : > { %3633 = vmatpush.bf16.msra.mxu1 %v7016_v39  ;;  %v2835_v49 = vpop.f32.mrf.mxu3  ;;  %v8408_v39 = vld [vmem:[%s9088_s23 + $0xc34] sm:$0xf]  ;;  %v7279_v38 = vld [vmem:[%s9103_s15 + $0x48] sm:$0xf0]  ;;  %v7274_v58 = vor.u32 %v8416_v61, %v7271_v63  ;;  %v3860_v61 = vunpack.c.l.b16 %v9774_v4 }
 0x1f6   : > { %3658 = vmatpush.bf16.msrb.mxu2 %v7152_v37  ;;  %v6981_v37 = vld [vmem:[%s9088_s23 + $0xa38] sm:$0xf0]  ;;  %v8435_v49 = vld [vmem:[%s9103_s15 + $0xc4] sm:$0xf0] }
 0x1f7   : > { %3645 = vmatpush.bf16.msrb.mxu3 %v7088_v36  ;;  %v7181_v36 = vld [vmem:[%s9088_s23 + $0xbc8] sm:$0xf0]  ;;  %v6984_v50 = vor.u32 %v8344_v47, %v6981_v37  ;;  %v8419_v47 = vld [vmem:[%s9103_s15 + $0x44] sm:$0xf0]  ;;  %v7341_v37 = vld [vmem:[%s9103_s15 + $0xc0] sm:$0xf] }
 0x1f8   : > { %3672 = vmatpush.bf16.msrb.mxu0 %v7208_v28  ;;  %v7184_v41 = vor.u32 %v8394_v34, %v7181_v36  ;;  %v7240_v28 = vor.u32 %v8408_v39, %v7237_v20  ;;  %v7290_v34 = vor.u32 %v8420_v48, %v7287_v45  ;;  %v7277_v36 = vld [vmem:[%s9103_s15 + $0x40] sm:$0xf]  ;;  %v8434_v20 = vld [vmem:[%s9103_s15 + $0xc4] sm:$0xf]  ;;  %v7327_v11 = vld [vmem:[%s9103_s15 + $0xa8] sm:$0xf0] }
 0x1f9   : > { %3634 = vmatpush.bf16.msra.mxu1 %v7008_v51  ;;  %v7048_v51 = vor.u32 %v8360_v42, %v7045_v43  ;;  %v7278_v42 = vor.u32 %v8419_v47, %v7277_v36  ;;  %v7342_v43 = vor.u32 %v8435_v49, %v7341_v37  ;;  %v7319_v48 = vld [vmem:[%s9103_s15 + $0x98] sm:$0xf0]  ;;  %v7309_v36 = vld [vmem:[%s9103_s15 + $0x80] sm:$0xf]  ;;  %v8427_v47 = vld [vmem:[%s9103_s15 + $0x84] sm:$0xf0] }
 0x1fa   : > { %3659 = vmatpush.bf16.msrb.mxu2 %v7144_v54  ;;  %v7173_v54 = vld [vmem:[%s9088_s23 + $0xbb8] sm:$0xf0]  ;;  %v8410_v37 = vld [vmem:[%s9103_s15 + $0x4] sm:$0xf] }
 0x1fb   : > { %3646 = vmatpush.bf16.msrb.mxu3 %v7080_v46  ;;  %v7109_v46 = vld [vmem:[%s9088_s23 + $0xb38] sm:$0xf0]  ;;  %v7176_v1 = vor.u32 %v8392_v32, %v7173_v54  ;;  %v7333_v32 = vld [vmem:[%s9103_s15 + $0xb0] sm:$0xf] }
 0x1fc   : > { %3673 = vmatpush.bf16.msrb.mxu0 %v7200_v5  ;;  %v7112_v19 = vor.u32 %v8376_v9, %v7109_v46  ;;  %v7293_v5 = vld [vmem:[%s9103_s15 + $0x60] sm:$0xf]  ;;  %v10090_v14 = vpop.f32.mrf.mxu2  ;;  %v8417_v46 = vld [vmem:[%s9103_s15 + $0x34] sm:$0xf0]  ;;  %v7247_v49 = vld [vmem:[%s9103_s15 + $0x8] sm:$0xf0] }
 0x1fd   : > { %3635 = vmatpush.bf16.msra.mxu1 %v7000_v12  ;;  %v8422_v12 = vld [vmem:[%s9103_s15 + $0x64] sm:$0xf]  ;;  %v7294_v17 = vor.u32 %v8423_v6, %v7293_v5  ;;  %v8431_v5 = vld [vmem:[%s9103_s15 + $0xa4] sm:$0xf0] }
 0x1fe   : > { %3660 = vmatpush.bf16.msrb.mxu2 %v7136_v60  ;;  %v7306_v60 = vor.u32 %v8424_v56, %v7303_v57  ;;  %v7298_v25 = vor.u32 %v8422_v12, %v7295_v13  ;;  %v8414_v6 = vld [vmem:[%s9103_s15 + $0x24] sm:$0xf] }
 0x1ff   : > { %3647 = vmatpush.bf16.msrb.mxu3 %v7072_v3  ;;  %v7366_v3 = vor.u32 %v8441_v55, %v7365_v24  ;;  %v7335_v55 = vld [vmem:[%s9103_s15 + $0xb8] sm:$0xf0] }
 0x200   : > { %3674 = vmatpush.bf16.msrb.mxu0 %v7192_v29  ;;  %v8437_v29 = vld [vmem:[%s9103_s15 + $0xd4] sm:$0xf0] }
 0x201   : > { %3636 = vmatpush.bf16.msra.mxu1 %v6992_v62  ;;  %v7351_v62 = vld [vmem:[%s9103_s15 + $0xd8] sm:$0xf0] }
 0x202   : > { %3661 = vmatpush.bf16.msrb.mxu2 %v7128_v27  ;;  %v7349_v27 = vld [vmem:[%s9103_s15 + $0xd0] sm:$0xf] }
 0x203   : > { %3648 = vmatpush.bf16.msrb.mxu3 %v7064_v22  ;;  %v8421_v22 = vld [vmem:[%s9103_s15 + $0x54] sm:$0xf0] }
 0x204   : > { %3675 = vmatpush.bf16.msrb.mxu0 %v7184_v41  ;;  %v7286_v40 = vor.u32 %v8421_v22, %v7285_v52  ;;  %v2913_v39 = vpop.f32.mrf.mxu2  ;;  %v10114_v41 = vpop.f32.mrf.mxu0  ;;  %v7317_v52 = vld [vmem:[%s9103_s15 + $0x90] sm:$0xf] }
 0x205   : > { %3637 = vmatpush.bf16.msra.mxu1 %v6984_v50  ;;  %v7269_v50 = vld [vmem:[%s9103_s15 + $0x30] sm:$0xf]  ;;  %v8457_v39 = vld [vmem:[%s9103_s15 + $0x174] sm:$0xf0] }
 0x206   : > { %3662 = vmatpush.bf16.msrb.mxu2 %v7120_v15  ;;  %v7343_v15 = vld [vmem:[%s9103_s15 + $0xc8] sm:$0xf0]  ;;  %v7270_v57 = vor.u32 %v8417_v46, %v7269_v50  ;;  %v7431_v50 = vld [vmem:[%s9103_s15 + $0x178] sm:$0xf0]  ;;  %v7310_v46 = vor.u32 %v8427_v47, %v7309_v36 }
 0x207   : > { %3649 = vmatpush.bf16.msrb.mxu3 %v7056_v18  ;;  %v2898_v18 = vpop.f32.mrf.mxu1  ;;  %v7346_v54 = vor.u32 %v8434_v20, %v7343_v15  ;;  %v7493_v20 = vld [vmem:[%s9103_s15 + $0x1f0] sm:$0xf]  ;;  %v7471_v36 = vld [vmem:[%s9103_s15 + $0x1c8] sm:$0xf0] }
 0x208   : > { %3638 = vmatmul.bf16.vlgmr.msra.gmra.mxu1 %v9922_v53  ;;  %3676 = vmatpush.bf16.msrb.mxu0 %v7176_v1  ;;  %v7362_v53 = vor.u32 %v8438_v33, %v7359_v44  ;;  %v8415_v1 = vld [vmem:[%s9103_s15 + $0x24] sm:$0xf0] }
 0x209   : > { %3689 = vmatpush.bf16.msrb.mxu1 %v7240_v28  ;;  %v8433_v28 = vld [vmem:[%s9103_s15 + $0xb4] sm:$0xf0]  ;;  %v7262_v44 = vor.u32 %v8415_v1, %v7261_v0  ;;  %v8471_v1 = vld [vmem:[%s9103_s15 + $0x1e4] sm:$0xf0] }
 0x20a   : > { %3663 = vmatpush.bf16.msrb.mxu2 %v7112_v19  ;;  %v7334_v19 = vor.u32 %v8433_v28, %v7333_v32  ;;  %v7250_v32 = vor.u32 %v8410_v37, %v7247_v49  ;;  %v7495_v28 = vld [vmem:[%s9103_s15 + $0x1f8] sm:$0xf0] }
 0x20b   : > { %3650 = vmatpush.bf16.msrb.mxu3 %v7048_v51  ;;  %3677 = vmatmul.bf16.vlgmr.msrb.gmra.mxu0 %v10015_v16  ;;  %v8418_v16 = vld [vmem:[%s9103_s15 + $0x44] sm:$0xf]  ;;  %v8432_v51 = vld [vmem:[%s9103_s15 + $0xb4] sm:$0xf] }
 0x20c   : > { %4065 = vmatpush.bf16.msra.mxu0 %v7370_v8  ;;  %v7282_v9 = vor.u32 %v8418_v16, %v7279_v38  ;;  %v8430_v8 = vld [vmem:[%s9103_s15 + $0xa4] sm:$0xf]  ;;  %v2926_v13 = vpop.f32.mrf.mxu0  ;;  %v7311_v38 = vld [vmem:[%s9103_s15 + $0x88] sm:$0xf0] }
 0x20d   : > { %4039 = vmatpush.bf16.msra.mxu1 %v7366_v3  ;;  %3664 = vmatmul.bf16.vlgmr.msrb.gmra.mxu2 %v10006_v31  ;;  %v7354_v31 = vor.u32 %v8436_v30, %v7351_v62  ;;  %v2885_v24 = vpop.f32.mrf.mxu3  ;;  %v7330_v22 = vor.u32 %v8430_v8, %v7327_v11  ;;  %v7245_v62 = vld [vmem:[%s9103_s15] sm:$0xf]  ;;  %v8426_v16 = vld [vmem:[%s9103_s15 + $0x84] sm:$0xf]  ;;  %v7413_v11 = vld [vmem:[%s9103_s15 + $0x150] sm:$0xf] }
 0x20e   : > { %4052 = vmatpush.bf16.msra.mxu2 %v7306_v60  ;;  %3651 = vmatmul.bf16.vlgmr.msrb.gmra.mxu3 %v9937_v21  ;;  %v7350_v21 = vor.u32 %v8437_v29, %v7349_v27  ;;  %v2886_v56 = vadd.f32 %v2885_v24, %v10061_v59  ;;  %v7338_v60 = vor.u32 %v8432_v51, %v7335_v55  ;;  %v8429_v27 = vld [vmem:[%s9103_s15 + $0x94] sm:$0xf0]  ;;  %v8428_v29 = vld [vmem:[%s9103_s15 + $0x94] sm:$0xf]  ;;  %v3861_v51 = vunpack.c.h.b16 %v9774_v4 }
 0x20f   : > { %4026 = vmatpush.bf16.msra.mxu3 %v7302_v2  ;;  %v7325_v2 = vld [vmem:[%s9103_s15 + $0xa0] sm:$0xf]  ;;  %v2900_v59 = vpop.f32.mrf.mxu1  ;;  %v7314_v63 = vor.u32 %v8426_v16, %v7311_v38  ;;  %v8453_v13 = vld [vmem:[%s9103_s15 + $0x154] sm:$0xf0]  ;;  %v7397_v16 = vld [vmem:[%s9103_s15 + $0x130] sm:$0xf] }
 0x210   : > { %4066 = vmatpush.bf16.msra.mxu0 %v7362_v53  ;;  %v2899_v3 = vadd.f32 %v2898_v18, %v2886_v56  ;;  %v10135_v12 = vpop.f32.mrf.mxu2  ;;  %v7255_v53 = vld [vmem:[%s9103_s15 + $0x18] sm:$0xf0]  ;;  %v7429_v18 = vld [vmem:[%s9103_s15 + $0x170] sm:$0xf]  ;;  %v8449_v38 = vld [vmem:[%s9103_s15 + $0x134] sm:$0xf0] }
 0x211   : > { %4040 = vmatpush.bf16.msra.mxu1 %v7358_v35  ;;  %v7253_v35 = vld [vmem:[%s9103_s15 + $0x10] sm:$0xf]  ;;  %v7430_v24 = vor.u32 %v8457_v39, %v7429_v18 }
 0x212   : > { %4053 = vmatpush.bf16.msra.mxu2 %v7298_v25  ;;  %v10138_v33 = vadd.f32 %v10090_v14, %v2899_v3  ;;  %v8413_v25 = vld [vmem:[%s9103_s15 + $0x14] sm:$0xf0]  ;;  %v8412_v14 = vld [vmem:[%s9103_s15 + $0x14] sm:$0xf]  ;;  %v7423_v3 = vld [vmem:[%s9103_s15 + $0x168] sm:$0xf0] }
 0x213   : > { %4027 = vmatpush.bf16.msra.mxu3 %v7294_v17  ;;  %v7326_v17 = vor.u32 %v8431_v5, %v7325_v2  ;;  %v7254_v30 = vor.u32 %v8413_v25, %v7253_v35  ;;  %v8454_v2 = vld [vmem:[%s9103_s15 + $0x164] sm:$0xf]  ;;  %v7487_v5 = vld [vmem:[%s9103_s15 + $0x1e8] sm:$0xf0]  ;;  %v8452_v35 = vld [vmem:[%s9103_s15 + $0x154] sm:$0xf] }
 0x214   : > { %4067 = vmatpush.bf16.msra.mxu0 %v7354_v31  ;;  %v7322_v31 = vor.u32 %v8428_v29, %v7319_v48  ;;  %v7426_v8 = vor.u32 %v8454_v2, %v7423_v3  ;;  %v7415_v25 = vld [vmem:[%s9103_s15 + $0x158] sm:$0xf0]  ;;  %v7405_v29 = vld [vmem:[%s9103_s15 + $0x140] sm:$0xf]  ;;  %v8451_v48 = vld [vmem:[%s9103_s15 + $0x144] sm:$0xf0] }
 0x215   : > { %4041 = vmatpush.bf16.msra.mxu1 %v7350_v21  ;;  %v2887_v45 = vpop.f32.mrf.mxu3  ;;  %v7318_v21 = vor.u32 %v8429_v27, %v7317_v52  ;;  %v8468_v52 = vld [vmem:[%s9103_s15 + $0x1d4] sm:$0xf]  ;;  %v7414_v27 = vor.u32 %v8453_v13, %v7413_v11  ;;  %v7406_v37 = vor.u32 %v8451_v48, %v7405_v29  ;;  %v7461_v18 = vld [vmem:[%s9103_s15 + $0x1b0] sm:$0xf]  ;;  %v927_v2 = vperm.slane %v10034_v26, 1 }
 0x216   : > { %4054 = vmatpush.bf16.msra.mxu2 %v7290_v34  ;;  %v7258_v34 = vor.u32 %v8412_v14, %v7255_v53  ;;  %v7418_v53 = vor.u32 %v8452_v35, %v7415_v25  ;;  %v7469_v45 = vld [vmem:[%s9103_s15 + $0x1c0] sm:$0xf]  ;;  %v8461_v11 = vld [vmem:[%s9103_s15 + $0x194] sm:$0xf0]  ;;  %v8444_v26 = vld [vmem:[%s9103_s15 + $0x114] sm:$0xf] }
 0x217   : > { %4028 = vmatpush.bf16.msra.mxu3 %v7286_v40  ;;  %v8411_v40 = vld [vmem:[%s9103_s15 + $0x4] sm:$0xf0]  ;;  %v7383_v13 = vld [vmem:[%s9103_s15 + $0x118] sm:$0xf0]  ;;  %v7373_v25 = vld [vmem:[%s9103_s15 + $0x100] sm:$0xf] }
 0x218   : > { %4068 = vmatpush.bf16.msra.mxu0 %v7346_v54  ;;  %7242 = vmatmul.msk.bf16.vlgmr.msrb.gmra.mxu1 %vm1443_vm0, %v9970_v10  ;;  %v7266_v10 = vor.u32 %v8414_v6, %v7263_v7  ;;  %v2939_v15 = vpop.f32.mrf.mxu2  ;;  %v8472_v54 = vld [vmem:[%s9103_s15 + $0x1f4] sm:$0xf]  ;;  %v3862_v6 = vpack.c.b16 %v3860_v61, %v3860_v61  ;;  %v3863_v7 = vpack.c.b16 %v3861_v51, %v3861_v51  ;;  %v7389_v61 = vld [vmem:[%s9103_s15 + $0x120] sm:$0xf]  ;;  %v8459_v29 = vld [vmem:[%s9103_s15 + $0x184] sm:$0xf0] }
 0x219   : > { %4042 = vmatpush.bf16.msra.mxu1 %v7342_v43  ;;  %v8473_v43 = vld [vmem:[%s9103_s15 + $0x1f4] sm:$0xf0]  ;;  %v7498_v0 = vor.u32 %v8472_v54, %v7495_v28  ;;  %v8442_v48 = vld [vmem:[%s9103_s15 + $0x104] sm:$0xf] }
 0x21a   : > { %4055 = vmatpush.bf16.msra.mxu2 %v7282_v9  ;;  %v8456_v9 = vld [vmem:[%s9103_s15 + $0x174] sm:$0xf]  ;;  %v7494_v55 = vor.u32 %v8473_v43, %v7493_v20  ;;  %v8465_v15 = vld [vmem:[%s9103_s15 + $0x1b4] sm:$0xf0]  ;;  %v7399_v43 = vld [vmem:[%s9103_s15 + $0x138] sm:$0xf0] }
 0x21b   : > { %4029 = vmatpush.bf16.msra.mxu3 %v7278_v42  ;;  %v7246_v42 = vor.u32 %v8411_v40, %v7245_v62  ;;  %v7434_v56 = vor.u32 %v8456_v9, %v7431_v50  ;;  %v8467_v62 = vld [vmem:[%s9103_s15 + $0x1c4] sm:$0xf0]  ;;  %v8450_v40 = vld [vmem:[%s9103_s15 + $0x144] sm:$0xf]  ;;  %v8464_v50 = vld [vmem:[%s9103_s15 + $0x1b4] sm:$0xf]  ;;  %v7462_v54 = vor.u32 %v8465_v15, %v7461_v18 }
 0x21c   : > { %4069 = vmatpush.bf16.msra.mxu0 %v7338_v60  ;;  %v8470_v60 = vld [vmem:[%s9103_s15 + $0x1e4] sm:$0xf]  ;;  %v8504_v15 = vld [vmem:[%s9103_s15 + $0x2f4] sm:$0xf] }
 0x21d   : > { %4043 = vmatpush.bf16.msra.mxu1 %v7334_v19  ;;  %v8455_v19 = vld [vmem:[%s9103_s15 + $0x164] sm:$0xf0] }
 0x21e   : > { %4056 = vmatpush.bf16.msra.mxu2 %v7274_v58  ;;  %v7485_v58 = vld [vmem:[%s9103_s15 + $0x1e0] sm:$0xf] }
 0x21f   : > { %4030 = vmatpush.bf16.msra.mxu3 %v7270_v57  ;;  %v7421_v57 = vld [vmem:[%s9103_s15 + $0x160] sm:$0xf]  ;;  %v7486_v59 = vor.u32 %v8471_v1, %v7485_v58  ;;  %v8462_v58 = vld [vmem:[%s9103_s15 + $0x1a4] sm:$0xf] }
 0x220   : > { %4070 = vmatpush.bf16.msra.mxu0 %v7330_v22  ;;  %v7422_v4 = vor.u32 %v8455_v19, %v7421_v57  ;;  %v7479_v22 = vld [vmem:[%s9103_s15 + $0x1d8] sm:$0xf0]  ;;  %v7391_v57 = vld [vmem:[%s9103_s15 + $0x128] sm:$0xf0] }
 0x221   : > { %4044 = vmatpush.bf16.msra.mxu1 %v7326_v17  ;;  %v7490_v17 = vor.u32 %v8470_v60, %v7487_v5 }
 0x222   : > { %4057 = vmatpush.bf16.msra.mxu2 %v7266_v10  ;;  %v8469_v10 = vld [vmem:[%s9103_s15 + $0x1d4] sm:$0xf0] }
 0x223   : > { %4031 = vmatpush.bf16.msra.mxu3 %v7262_v44  ;;  %v7477_v44 = vld [vmem:[%s9103_s15 + $0x1d0] sm:$0xf] }
 0x224   : > { %4071 = vmatpush.bf16.msra.mxu0 %v7322_v31  ;;  %v7478_v14 = vor.u32 %v8469_v10, %v7477_v44  ;;  %v10190_v47 = vpop.f32.mrf.mxu0  ;;  %v7470_v31 = vor.u32 %v8467_v62, %v7469_v45  ;;  %v7447_v10 = vld [vmem:[%s9103_s15 + $0x198] sm:$0xf0]  ;;  %v8458_v62 = vld [vmem:[%s9103_s15 + $0x184] sm:$0xf] }
 0x225   : > { %4045 = vmatpush.bf16.msra.mxu1 %v7318_v21  ;;  %v7407_v21 = vld [vmem:[%s9103_s15 + $0x148] sm:$0xf0]  ;;  %v10195_v39 = vpop.f32.mrf.mxu1 }
 0x226   : > { %4058 = vmatpush.bf16.msra.mxu2 %v7258_v34  ;;  %v8466_v34 = vld [vmem:[%s9103_s15 + $0x1c4] sm:$0xf]  ;;  %v7410_v49 = vor.u32 %v8450_v40, %v7407_v21  ;;  %v7439_v40 = vld [vmem:[%s9103_s15 + $0x188] sm:$0xf0] }
 0x227   : > { %4032 = vmatpush.bf16.msra.mxu3 %v7254_v30  ;;  %v7482_v30 = vor.u32 %v8468_v52, %v7479_v22  ;;  %v7474_v20 = vor.u32 %v8466_v34, %v7471_v36  ;;  %v8443_v52 = vld [vmem:[%s9103_s15 + $0x104] sm:$0xf0]  ;;  %v2925_v22 = vadd.f32 %v10114_v41, %v927_v2  ;;  %v7557_v41 = vld [vmem:[%s9103_s15 + $0x270] sm:$0xf]  ;;  %v8489_v34 = vld [vmem:[%s9103_s15 + $0x274] sm:$0xf0] }
 0x228   : > { %4072 = vmatpush.bf16.msra.mxu0 %v7314_v63  ;;  %v8447_v63 = vld [vmem:[%s9103_s15 + $0x124] sm:$0xf0]  ;;  %v7621_v36 = vld [vmem:[%s9103_s15 + $0x2f0] sm:$0xf] }
 0x229   : > { %4046 = vmatpush.bf16.msra.mxu1 %v7310_v46  ;;  %v7463_v46 = vld [vmem:[%s9103_s15 + $0x1b8] sm:$0xf0]  ;;  %v7390_v3 = vor.u32 %v8447_v63, %v7389_v61  ;;  %v7549_v61 = vld [vmem:[%s9103_s15 + $0x260] sm:$0xf]  ;;  %v8487_v63 = vld [vmem:[%s9103_s15 + $0x264] sm:$0xf0] }
 0x22a   : > { %4059 = vmatpush.bf16.msra.mxu2 %v7250_v32  ;;  %v7398_v32 = vor.u32 %v8449_v38, %v7397_v16  ;;  %v7466_v51 = vor.u32 %v8464_v50, %v7463_v46  ;;  %v7559_v16 = vld [vmem:[%s9103_s15 + $0x278] sm:$0xf0]  ;;  %v2938_v38 = vadd.f32 %v10135_v12, %v2925_v22  ;;  %v7442_v50 = vor.u32 %v8458_v62, %v7439_v40  ;;  %v8483_v22 = vld [vmem:[%s9103_s15 + $0x244] sm:$0xf0]  ;;  %v7599_v62 = vld [vmem:[%s9103_s15 + $0x2c8] sm:$0xf0] }
 0x22b   : > { %4033 = vmatpush.bf16.msra.mxu3 %v7246_v42  ;;  %4073 = vmatmul.bf16.vlgmr.msra.gmra.mxu0 %v3863_v7  ;;  %v8448_v42 = vld [vmem:[%s9103_s15 + $0x134] sm:$0xf]  ;;  %v7558_v46 = vor.u32 %v8489_v34, %v7557_v41  ;;  %v7550_v2 = vor.u32 %v8487_v63, %v7549_v61  ;;  %v7581_v61 = vld [vmem:[%s9103_s15 + $0x2a0] sm:$0xf] }
 0x22c   : > { %4284 = vmatpush.bf16.msrb.mxu0 %v7498_v0  ;;  %4047 = vmatmul.bf16.vlgmr.msra.gmra.mxu1 %v3863_v7  ;;  %v7402_v28 = vor.u32 %v8448_v42, %v7399_v43  ;;  %v7455_v0 = vld [vmem:[%s9103_s15 + $0x1a8] sm:$0xf0]  ;;  %v2978_v1 = vpop.f32.mrf.mxu0  ;;  %v7445_v7 = vld [vmem:[%s9103_s15 + $0x190] sm:$0xf]  ;;  %v7623_v42 = vld [vmem:[%s9103_s15 + $0x2f8] sm:$0xf0]  ;;  %v4079_v43 = vunpack.c.l.b16 %v9996_v23 }
 0x22d   : > { %4258 = vmatpush.bf16.msrb.mxu1 %v7494_v55  ;;  %4060 = vmatmul.bf16.vlgmr.msra.gmra.mxu2 %v3862_v6  ;;  %v10200_v9 = vpop.f32.mrf.mxu3  ;;  %v8463_v55 = vld [vmem:[%s9103_s15 + $0x1a4] sm:$0xf0] }
 0x22e   : > { %4271 = vmatpush.bf16.msrb.mxu2 %v7434_v56  ;;  %4034 = vmatmul.bf16.vlgmr.msra.gmra.mxu3 %v3862_v6  ;;  %v8446_v56 = vld [vmem:[%s9103_s15 + $0x124] sm:$0xf]  ;;  %v7381_v6 = vld [vmem:[%s9103_s15 + $0x110] sm:$0xf]  ;;  %v4081_v1 = vpack.c.b16 %v4079_v43, %v4079_v43 }
 0x22f   : > { %4245 = vmatpush.bf16.msrb.mxu3 %v7430_v24  ;;  %v7453_v24 = vld [vmem:[%s9103_s15 + $0x1a0] sm:$0xf]  ;;  %v7394_v5 = vor.u32 %v8446_v56, %v7391_v57  ;;  %v8486_v56 = vld [vmem:[%s9103_s15 + $0x264] sm:$0xf]  ;;  %v7551_v57 = vld [vmem:[%s9103_s15 + $0x268] sm:$0xf0] }
 0x230   : > { %4285 = vmatpush.bf16.msrb.mxu0 %v7490_v17  ;;  %v10210_v19 = vpop.f32.mrf.mxu2  ;;  %v7454_v60 = vor.u32 %v8463_v55, %v7453_v24  ;;  %v8460_v17 = vld [vmem:[%s9103_s15 + $0x194] sm:$0xf]  ;;  %v7613_v24 = vld [vmem:[%s9103_s15 + $0x2e0] sm:$0xf]  ;;  %v8503_v55 = vld [vmem:[%s9103_s15 + $0x2e4] sm:$0xf0] }
 0x231   : > { %4259 = vmatpush.bf16.msrb.mxu1 %v7486_v59  ;;  %v2965_v59 = vpop.f32.mrf.mxu1  ;;  %v7450_v45 = vor.u32 %v8460_v17, %v7447_v10 }
 0x232   : > { %4272 = vmatpush.bf16.msrb.mxu2 %v7426_v8  ;;  %v7458_v8 = vor.u32 %v8462_v58, %v7455_v0  ;;  %v2951_v58 = vadd.f32 %v10200_v9, %v2938_v38  ;;  %v7615_v0 = vld [vmem:[%s9103_s15 + $0x2e8] sm:$0xf0]  ;;  %v7541_v9 = vld [vmem:[%s9103_s15 + $0x250] sm:$0xf]  ;;  %v8501_v59 = vld [vmem:[%s9103_s15 + $0x2d4] sm:$0xf0] }
 0x233   : > { %4246 = vmatpush.bf16.msrb.mxu3 %v7422_v4  ;;  %v8445_v4 = vld [vmem:[%s9103_s15 + $0x114] sm:$0xf0]  ;;  %v7527_v38 = vld [vmem:[%s9103_s15 + $0x238] sm:$0xf0] }
 0x234   : > { %4286 = vmatpush.bf16.msrb.mxu0 %v7482_v30  ;;  %v7382_v35 = vor.u32 %v8445_v4, %v7381_v6  ;;  %v7375_v30 = vld [vmem:[%s9103_s15 + $0x108] sm:$0xf0]  ;;  %v8485_v6 = vld [vmem:[%s9103_s15 + $0x254] sm:$0xf0]  ;;  %v7605_v4 = vld [vmem:[%s9103_s15 + $0x2d0] sm:$0xf] }
 0x235   : > { %4260 = vmatpush.bf16.msrb.mxu1 %v7478_v14  ;;  %v2952_v44 = vpop.f32.mrf.mxu3  ;;  %v7386_v14 = vor.u32 %v8444_v26, %v7383_v13  ;;  %v2964_v26 = vadd.f32 %v10195_v39, %v2951_v58  ;;  %v8500_v13 = vld [vmem:[%s9103_s15 + $0x2d4] sm:$0xf]  ;;  %v7542_v17 = vor.u32 %v8485_v6, %v7541_v9  ;;  %v7606_v10 = vor.u32 %v8501_v59, %v7605_v4  ;;  %v7533_v39 = vld [vmem:[%s9103_s15 + $0x240] sm:$0xf]  ;;  %v8493_v6 = vld [vmem:[%s9103_s15 + $0x294] sm:$0xf0] }
 0x236   : > { %4273 = vmatpush.bf16.msrb.mxu2 %v7418_v53  ;;  %v7437_v53 = vld [vmem:[%s9103_s15 + $0x180] sm:$0xf]  ;;  %v7607_v44 = vld [vmem:[%s9103_s15 + $0x2d8] sm:$0xf0]  ;;  %v7534_v40 = vor.u32 %v8483_v22, %v7533_v39  ;;  %v8476_v4 = vld [vmem:[%s9103_s15 + $0x214] sm:$0xf] }
 0x237   : > { %4247 = vmatpush.bf16.msrb.mxu3 %v7414_v27  ;;  %v7446_v27 = vor.u32 %v8461_v11, %v7445_v7  ;;  %v7438_v18 = vor.u32 %v8459_v29, %v7437_v53  ;;  %v7543_v11 = vld [vmem:[%s9103_s15 + $0x258] sm:$0xf0]  ;;  %v8499_v53 = vld [vmem:[%s9103_s15 + $0x2c4] sm:$0xf0]  ;;  %v8482_v29 = vld [vmem:[%s9103_s15 + $0x244] sm:$0xf] }
 0x238   : > { %4287 = vmatpush.bf16.msrb.mxu0 %v7474_v20  ;;  %v2991_v21 = vpop.f32.mrf.mxu2  ;;  %v7378_v20 = vor.u32 %v8442_v48, %v7375_v30  ;;  %v7535_v48 = vld [vmem:[%s9103_s15 + $0x248] sm:$0xf0]  ;;  %v8498_v30 = vld [vmem:[%s9103_s15 + $0x2c4] sm:$0xf]  ;;  %v3699_v59 = vmax.f32 %v10138_v33, 0.0 }
 0x239   : > { %4261 = vmatpush.bf16.msrb.mxu1 %v7470_v31  ;;  %v8505_v31 = vld [vmem:[%s9103_s15 + $0x2f4] sm:$0xf0]  ;;  %v7538_v34 = vor.u32 %v8482_v29, %v7535_v48  ;;  %v8491_v33 = vld [vmem:[%s9103_s15 + $0x284] sm:$0xf0]  ;;  %v8490_v29 = vld [vmem:[%s9103_s15 + $0x284] sm:$0xf] }
 0x23a   : > { %4274 = vmatpush.bf16.msrb.mxu2 %v7410_v49  ;;  %v8488_v49 = vld [vmem:[%s9103_s15 + $0x274] sm:$0xf]  ;;  %v7622_v12 = vor.u32 %v8505_v31, %v7621_v36  ;;  %v7525_v36 = vld [vmem:[%s9103_s15 + $0x230] sm:$0xf] }
 0x23b   : > { %4248 = vmatpush.bf16.msrb.mxu3 %v7406_v37  ;;  %v7374_v37 = vor.u32 %v8443_v52, %v7373_v25  ;;  %v7589_v31 = vld [vmem:[%s9103_s15 + $0x2b0] sm:$0xf] }
 0x23c   : > { %4288 = vmatpush.bf16.msrb.mxu0 %v7466_v51  ;;  %v7626_v51 = vor.u32 %v8504_v15, %v7623_v42  ;;  %v7591_v15 = vld [vmem:[%s9103_s15 + $0x2b8] sm:$0xf0] }
 0x23d   : > { %4262 = vmatpush.bf16.msrb.mxu1 %v7462_v54  ;;  %v7562_v54 = vor.u32 %v8488_v49, %v7559_v16  ;;  %v7602_v49 = vor.u32 %v8498_v30, %v7599_v62  ;;  %v8480_v16 = vld [vmem:[%s9103_s15 + $0x234] sm:$0xf]  ;;  %v7685_v30 = vld [vmem:[%s9103_s15 + $0x370] sm:$0xf]  ;;  %v8521_v62 = vld [vmem:[%s9103_s15 + $0x374] sm:$0xf0] }
 0x23e   : > { %4275 = vmatpush.bf16.msrb.mxu2 %v7402_v28  ;;  %v10243_v28 = vpop.f32.mrf.mxu3 }
 0x23f   : > { %4249 = vmatpush.bf16.msrb.mxu3 %v7398_v32  ;;  %v4080_v32 = vunpack.c.h.b16 %v9996_v23  ;;  %v8502_v23 = vld [vmem:[%s9103_s15 + $0x2e4] sm:$0xf] }
 0x240   : > { %4289 = vmatpush.bf16.msrb.mxu0 %v7458_v8  ;;  %v7618_v7 = vor.u32 %v8502_v23, %v7615_v0  ;;  %v8484_v8 = vld [vmem:[%s9103_s15 + $0x254] sm:$0xf]  ;;  %v7509_v23 = vld [vmem:[%s9103_s15 + $0x210] sm:$0xf] }
 0x241   : > { %4263 = vmatpush.bf16.msrb.mxu1 %v7454_v60  ;;  %v7614_v60 = vor.u32 %v8503_v55, %v7613_v24  ;;  %v8495_v24 = vld [vmem:[%s9103_s15 + $0x2a4] sm:$0xf0] }
 0x242   : > { %4276 = vmatpush.bf16.msrb.mxu2 %v7394_v5  ;;  %v7554_v5 = vor.u32 %v8486_v56, %v7551_v57  ;;  %v8494_v56 = vld [vmem:[%s9103_s15 + $0x2a4] sm:$0xf]  ;;  %v7583_v57 = vld [vmem:[%s9103_s15 + $0x2a8] sm:$0xf0] }
 0x243   : > { %4250 = vmatpush.bf16.msrb.mxu3 %v7390_v3  ;;  %v4082_v3 = vpack.c.b16 %v4080_v32, %v4080_v32  ;;  %v7586_v9 = vor.u32 %v8494_v56, %v7583_v57  ;;  %v7669_v56 = vld [vmem:[%s9103_s15 + $0x350] sm:$0xf]  ;;  %v8517_v57 = vld [vmem:[%s9103_s15 + $0x354] sm:$0xf0] }
 0x244   : > { %4290 = vmatpush.bf16.msrb.mxu0 %v7450_v45  ;;  %v10263_v52 = vpop.f32.mrf.mxu0  ;;  %v2977_v45 = vadd.f32 %v10190_v47, %v2964_v26  ;;  %v8497_v47 = vld [vmem:[%s9103_s15 + $0x2b4] sm:$0xf0] }
 0x245   : > { %4264 = vmatpush.bf16.msrb.mxu1 %v7446_v27  ;;  %v7597_v27 = vld [vmem:[%s9103_s15 + $0x2c0] sm:$0xf]  ;;  %v10274_v21 = vpop.f32.mrf.mxu1 }
 0x246   : > { %4277 = vmatpush.bf16.msrb.mxu2 %v7386_v14  ;;  %v3004_v25 = vpop.f32.mrf.mxu3  ;;  %v7610_v14 = vor.u32 %v8500_v13, %v7607_v44  ;;  %v7598_v41 = vor.u32 %v8499_v53, %v7597_v27  ;;  %v7501_v13 = vld [vmem:[%s9103_s15 + $0x200] sm:$0xf]  ;;  %v7503_v53 = vld [vmem:[%s9103_s15 + $0x208] sm:$0xf0] }
 0x247   : > { %4251 = vmatpush.bf16.msrb.mxu3 %v7382_v35  ;;  %v7546_v35 = vor.u32 %v8484_v8, %v7543_v11  ;;  %v8492_v8 = vld [vmem:[%s9103_s15 + $0x294] sm:$0xf]  ;;  %v7575_v11 = vld [vmem:[%s9103_s15 + $0x298] sm:$0xf0]  ;;  %v7565_v25 = vld [vmem:[%s9103_s15 + $0x280] sm:$0xf] }
 0x248   : > { %4291 = vmatpush.bf16.msrb.mxu0 %v7442_v50  ;;  %v7590_v50 = vor.u32 %v8497_v47, %v7589_v31  ;;  %v7578_v27 = vor.u32 %v8492_v8, %v7575_v11  ;;  %v7725_v8 = vld [vmem:[%s9103_s15 + $0x3c0] sm:$0xf]  ;;  %v8531_v11 = vld [vmem:[%s9103_s15 + $0x3c4] sm:$0xf0] }
 0x249   : > { %4265 = vmatpush.bf16.msrb.mxu1 %v7438_v18  ;;  %v2990_v18 = vadd.f32 %v10210_v19, %v2977_v45  ;;  %v7517_v19 = vld [vmem:[%s9103_s15 + $0x220] sm:$0xf]  ;;  %v7567_v45 = vld [vmem:[%s9103_s15 + $0x288] sm:$0xf0] }
 0x24a   : > { %4278 = vmatpush.bf16.msrb.mxu2 %v7378_v20  ;;  %v8496_v20 = vld [vmem:[%s9103_s15 + $0x2b4] sm:$0xf]  ;;  %v7570_v47 = vor.u32 %v8490_v29, %v7567_v45  ;;  %v8529_v29 = vld [vmem:[%s9103_s15 + $0x3b4] sm:$0xf0]  ;;  %v7663_v45 = vld [vmem:[%s9103_s15 + $0x348] sm:$0xf0] }
 0x24b   : > { %4252 = vmatpush.bf16.msrb.mxu3 %v7374_v37  ;;  %4292 = vmatmul.bf16.vlgmr.msrb.gmra.mxu0 %v4082_v3  ;;  %v8481_v37 = vld [vmem:[%s9103_s15 + $0x234] sm:$0xf0]  ;;  %v3003_v43 = vadd.f32 %v10243_v28, %v2990_v18  ;;  %v7594_v63 = vor.u32 %v8496_v20, %v7591_v15  ;;  %v7519_v28 = vld [vmem:[%s9103_s15 + $0x228] sm:$0xf0]  ;;  %v8520_v18 = vld [vmem:[%s9103_s15 + $0x374] sm:$0xf] }
 0x24c   : > { %4503 = vmatpush.bf16.msra.mxu0 %v7626_v51  ;;  %4266 = vmatmul.bf16.vlgmr.msrb.gmra.mxu1 %v4082_v3  ;;  %v7526_v42 = vor.u32 %v8481_v37, %v7525_v36  ;;  %v8478_v51 = vld [vmem:[%s9103_s15 + $0x224] sm:$0xf]  ;;  %v7566_v37 = vor.u32 %v8491_v33, %v7565_v25  ;;  %v7687_v20 = vld [vmem:[%s9103_s15 + $0x378] sm:$0xf0] }
 0x24d   : > { %4477 = vmatpush.bf16.msra.mxu1 %v7622_v12  ;;  %4279 = vmatmul.bf16.vlgmr.msrb.gmra.mxu2 %v4081_v1  ;;  %v3550_v12 = vpop.f32.mrf.mxu0  ;;  %v3524_v0 = vpop.f32.mrf.mxu1  ;;  %v7522_v3 = vor.u32 %v8478_v51, %v7519_v28 }
 0x24e   : > { %4490 = vmatpush.bf16.msra.mxu2 %v7562_v54  ;;  %4253 = vmatmul.bf16.vlgmr.msrb.gmra.mxu3 %v4081_v1  ;;  %v8479_v54 = vld [vmem:[%s9103_s15 + $0x224] sm:$0xf0]  ;;  %v3700_v1 = vmax.f32 %v3003_v43, 0.0  ;;  %v8536_v43 = vld [vmem:[%s9103_s15 + $0x3f4] sm:$0xf] }
 0x24f   : > { %4464 = vmatpush.bf16.msra.mxu3 %v7558_v46  ;;  %v7530_v46 = vor.u32 %v8480_v16, %v7527_v38  ;;  %v7518_v58 = vor.u32 %v8479_v54, %v7517_v19  ;;  %v7686_v16 = vor.u32 %v8521_v62, %v7685_v30  ;;  %v7677_v38 = vld [vmem:[%s9103_s15 + $0x360] sm:$0xf]  ;;  %v8535_v12 = vld [vmem:[%s9103_s15 + $0x3e4] sm:$0xf0]  ;;  %v8518_v0 = vld [vmem:[%s9103_s15 + $0x364] sm:$0xf] }
 0x250   : > { %4504 = vmatpush.bf16.msra.mxu0 %v7618_v7  ;;  %v10294_v55 = vpop.f32.mrf.mxu2  ;;  %v7511_v7 = vld [vmem:[%s9103_s15 + $0x218] sm:$0xf0]  ;;  %v3705_v44 = vpack.c.bf16 %v3700_v1, %v3699_v59  ;;  %v7679_v1 = vld [vmem:[%s9103_s15 + $0x368] sm:$0xf0]  ;;  %v8530_v30 = vld [vmem:[%s9103_s15 + $0x3c4] sm:$0xf] }
 0x251   : > { %4478 = vmatpush.bf16.msra.mxu1 %v7614_v60  ;;  %v10286_v32 = vpop.f32.mrf.mxu3  ;;  %v8477_v60 = vld [vmem:[%s9103_s15 + $0x214] sm:$0xf0] }
 0x252   : > { %4491 = vmatpush.bf16.msra.mxu2 %v7554_v5  ;;  %v7573_v5 = vld [vmem:[%s9103_s15 + $0x290] sm:$0xf]  ;;  %v7510_v26 = vor.u32 %v8477_v60, %v7509_v23  ;;  %v4298_v36 = vunpack.c.l.b16 %v3705_v44  ;;  %v8533_v23 = vld [vmem:[%s9103_s15 + $0x3d4] sm:$0xf0]  ;;  %v7670_v60 = vor.u32 %v8517_v57, %v7669_v56  ;;  %v7647_v56 = vld [vmem:[%s9103_s15 + $0x328] sm:$0xf0] }
 0x253   : > { %4465 = vmatpush.bf16.msra.mxu3 %v7550_v2  ;;  %v7582_v2 = vor.u32 %v8495_v24, %v7581_v61  ;;  %v7690_v61 = vor.u32 %v8520_v18, %v7687_v20  ;;  %v8527_v18 = vld [vmem:[%s9103_s15 + $0x3a4] sm:$0xf0]  ;;  %v8512_v20 = vld [vmem:[%s9103_s15 + $0x334] sm:$0xf]  ;;  %v8526_v57 = vld [vmem:[%s9103_s15 + $0x3a4] sm:$0xf] }
 0x254   : > { %4505 = vmatpush.bf16.msra.mxu0 %v7610_v14  ;;  %v8474_v14 = vld [vmem:[%s9103_s15 + $0x204] sm:$0xf]  ;;  %v4300_v19 = vpack.c.b16 %v4298_v36, %v4298_v36 }
 0x255   : > { %4479 = vmatpush.bf16.msra.mxu1 %v7606_v10  ;;  %v7514_v10 = vor.u32 %v8476_v4, %v7511_v7  ;;  %v10311_v22 = vpop.f32.mrf.mxu0  ;;  %v7506_v31 = vor.u32 %v8474_v14, %v7503_v53  ;;  %v8515_v4 = vld [vmem:[%s9103_s15 + $0x344] sm:$0xf0]  ;;  %v8513_v14 = vld [vmem:[%s9103_s15 + $0x334] sm:$0xf0]  ;;  %v7717_v53 = vld [vmem:[%s9103_s15 + $0x3b0] sm:$0xf] }
 0x256   : > { %4492 = vmatpush.bf16.msra.mxu2 %v7546_v35  ;;  %v8475_v35 = vld [vmem:[%s9103_s15 + $0x204] sm:$0xf0] }
 0x257   : > { %4466 = vmatpush.bf16.msra.mxu3 %v7542_v17  ;;  %v7574_v17 = vor.u32 %v8493_v6, %v7573_v5  ;;  %v7682_v5 = vor.u32 %v8518_v0, %v7679_v1  ;;  %v7661_v6 = vld [vmem:[%s9103_s15 + $0x340] sm:$0xf]  ;;  %v7711_v0 = vld [vmem:[%s9103_s15 + $0x3a8] sm:$0xf0]  ;;  %v917_v1 = vld [vmem:[%s9096_s19 + $0x6] sm:$0x3] }
 0x258   : > { %4506 = vmatpush.bf16.msra.mxu0 %v7602_v49  ;;  %v3563_v48 = vpop.f32.mrf.mxu2  ;;  %v4299_v49 = vunpack.c.h.b16 %v3705_v44  ;;  %v8532_v44 = vld [vmem:[%s9103_s15 + $0x3d4] sm:$0xf]  ;;  %v7662_v25 = vor.u32 %v8515_v4, %v7661_v6  ;;  %v7629_v6 = vld [vmem:[%s9103_s15 + $0x300] sm:$0xf]  ;;  %v8507_v4 = vld [vmem:[%s9103_s15 + $0x304] sm:$0xf0] }
 0x259   : > { %4480 = vmatpush.bf16.msra.mxu1 %v7598_v41  ;;  %v3537_v39 = vpop.f32.mrf.mxu3  ;;  %v7749_v41 = vld [vmem:[%s9103_s15 + $0x3f0] sm:$0xf]  ;;  %v8514_v48 = vld [vmem:[%s9103_s15 + $0x344] sm:$0xf] }
 0x25a   : > { %4493 = vmatpush.bf16.msra.mxu2 %v7538_v34  ;;  %v8537_v34 = vld [vmem:[%s9103_s15 + $0x3f4] sm:$0xf0]  ;;  %v7653_v39 = vld [vmem:[%s9103_s15 + $0x330] sm:$0xf]  ;;  %v7666_v62 = vor.u32 %v8514_v48, %v7663_v45  ;;  %v7695_v45 = vld [vmem:[%s9103_s15 + $0x388] sm:$0xf0] }
 0x25b   : > { %4467 = vmatpush.bf16.msra.mxu3 %v7534_v40  ;;  %v7502_v40 = vor.u32 %v8475_v35, %v7501_v13  ;;  %v7750_v15 = vor.u32 %v8537_v34, %v7749_v41  ;;  %v7671_v13 = vld [vmem:[%s9103_s15 + $0x358] sm:$0xf0]  ;;  %v7654_v34 = vor.u32 %v8513_v14, %v7653_v39  ;;  %v8545_v39 = vld [vmem:[%s10382_s27 + $0x38] sm:$0xff] }
 0x25c   : > { %4507 = vmatpush.bf16.msra.mxu0 %v7594_v63  ;;  %v4301_v63 = vpack.c.b16 %v4299_v49, %v4299_v49  ;;  %v8506_v14 = vld [vmem:[%s9103_s15 + $0x304] sm:$0xf] }
 0x25d   : > { %4481 = vmatpush.bf16.msra.mxu1 %v7590_v50  ;;  %v7751_v50 = vld [vmem:[%s9103_s15 + $0x3f8] sm:$0xf0]  ;;  %v3602_v54 = vpop.f32.mrf.mxu0 }
 0x25e   : > { %4494 = vmatpush.bf16.msra.mxu2 %v7530_v46  ;;  %v7741_v46 = vld [vmem:[%s9103_s15 + $0x3e0] sm:$0xf]  ;;  %v7754_v51 = vor.u32 %v8536_v43, %v7751_v50 }
 0x25f   : > { %4468 = vmatpush.bf16.msra.mxu3 %v7526_v42  ;;  %v8519_v42 = vld [vmem:[%s9103_s15 + $0x364] sm:$0xf0]  ;;  %v7742_v28 = vor.u32 %v8535_v12, %v7741_v46  ;;  %v8528_v46 = vld [vmem:[%s9103_s15 + $0x3b4] sm:$0xf]  ;;  %v7719_v12 = vld [vmem:[%s9103_s15 + $0x3b8] sm:$0xf0] }
 0x260   : > { %4508 = vmatpush.bf16.msra.mxu0 %v7586_v9  ;;  %v7678_v24 = vor.u32 %v8519_v42, %v7677_v38  ;;  %v7743_v9 = vld [vmem:[%s9103_s15 + $0x3e8] sm:$0xf0]  ;;  %v7709_v38 = vld [vmem:[%s9103_s15 + $0x3a0] sm:$0xf]  ;;  %v7722_v54 = vor.u32 %v8528_v46, %v7719_v12 }
 0x261   : > { %4482 = vmatpush.bf16.msra.mxu1 %v7582_v2  ;;  %v8534_v2 = vld [vmem:[%s9103_s15 + $0x3e4] sm:$0xf] }
 0x262   : > { %4495 = vmatpush.bf16.msra.mxu2 %v7522_v3  ;;  %v7746_v59 = vor.u32 %v8534_v2, %v7743_v9  ;;  %v8549_v46 = vld [vmem:[%s10382_s27 + $0x58] sm:$0xff] }
 0x263   : > { %4469 = vmatpush.bf16.msra.mxu3 %v7518_v58  ;;  %v7733_v58 = vld [vmem:[%s9103_s15 + $0x3d0] sm:$0xf] }
 0x264   : > { %4509 = vmatpush.bf16.msra.mxu0 %v7578_v27  ;;  %v7734_v7 = vor.u32 %v8533_v23, %v7733_v58  ;;  %v7726_v27 = vor.u32 %v8531_v11, %v7725_v8  ;;  %v8508_v8 = vld [vmem:[%s9103_s15 + $0x314] sm:$0xf]  ;;  %v7639_v11 = vld [vmem:[%s9103_s15 + $0x318] sm:$0xf0] }
 0x265   : > { %4483 = vmatpush.bf16.msra.mxu1 %v7574_v17  ;;  %v10336_v3 = vpop.f32.mrf.mxu1  ;;  %v7735_v17 = vld [vmem:[%s9103_s15 + $0x3d8] sm:$0xf0] }
 0x266   : > { %4496 = vmatpush.bf16.msra.mxu2 %v7514_v10  ;;  %v7738_v33 = vor.u32 %v8532_v44, %v7735_v17  ;;  %v8524_v44 = vld [vmem:[%s9103_s15 + $0x394] sm:$0xf]  ;;  %v7703_v17 = vld [vmem:[%s9103_s15 + $0x398] sm:$0xf0] }
 0x267   : > { %4470 = vmatpush.bf16.msra.mxu3 %v7510_v26  ;;  %v8516_v26 = vld [vmem:[%s9103_s15 + $0x354] sm:$0xf] }
 0x268   : > { %4510 = vmatpush.bf16.msra.mxu0 %v7570_v47  ;;  %v7674_v10 = vor.u32 %v8516_v26, %v7671_v13  ;;  %v10347_v35 = vpop.f32.mrf.mxu0  ;;  %v7645_v47 = vld [vmem:[%s9103_s15 + $0x320] sm:$0xf]  ;;  %v7630_v26 = vor.u32 %v8507_v4, %v7629_v6  ;;  %v7642_v13 = vor.u32 %v8508_v8, %v7639_v11  ;;  %v8560_v6 = vld [vmem:[%s10382_s27 + $0xb0] sm:$0xff] }
 0x269   : > { %4484 = vmatpush.bf16.msra.mxu1 %v7566_v37  ;;  %v8568_v4 = vld [vmem:[%s10382_s27 + $0xf0] sm:$0xff] }
 0x26a   : > { %4497 = vmatpush.bf16.msra.mxu2 %v7506_v31  ;;  %v7718_v31 = vor.u32 %v8529_v29, %v7717_v53  ;;  %v7631_v53 = vld [vmem:[%s9103_s15 + $0x308] sm:$0xf0]  ;;  %v8522_v29 = vld [vmem:[%s9103_s15 + $0x384] sm:$0xf] }
 0x26b   : > { %4471 = vmatpush.bf16.msra.mxu3 %v7502_v40  ;;  %4511 = vmatmul.bf16.vlgmr.msra.gmra.mxu0 %v4301_v63  ;;  %v7727_v40 = vld [vmem:[%s9103_s15 + $0x3c8] sm:$0xf0]  ;;  %v7634_v48 = vor.u32 %v8506_v14, %v7631_v53 }
 0x26c   : > { %4485 = vmatmul.bf16.vlgmr.msra.gmra.mxu1 %v4301_v63  ;;  %4722 = vmatpush.bf16.msrb.mxu0 %v7754_v51  ;;  %v7730_v36 = vor.u32 %v8530_v30, %v7727_v40  ;;  %v8509_v63 = vld [vmem:[%s9103_s15 + $0x314] sm:$0xf0] }
 0x26d   : > { %4696 = vmatpush.bf16.msrb.mxu1 %v7750_v15  ;;  %4498 = vmatmul.bf16.vlgmr.msra.gmra.mxu2 %v4300_v19  ;;  %v3576_v41 = vpop.f32.mrf.mxu1  ;;  %v7655_v15 = vld [vmem:[%s9103_s15 + $0x338] sm:$0xf0]  ;;  %v8525_v51 = vld [vmem:[%s9103_s15 + $0x394] sm:$0xf0] }
 0x26e   : > { %4472 = vmatmul.bf16.vlgmr.msra.gmra.mxu3 %v4300_v19  ;;  %4709 = vmatpush.bf16.msrb.mxu2 %v7690_v61  ;;  %v7658_v50 = vor.u32 %v8512_v20, %v7655_v15  ;;  %v7710_v19 = vor.u32 %v8527_v18, %v7709_v38  ;;  %v7637_v61 = vld [vmem:[%s9103_s15 + $0x310] sm:$0xf]  ;;  %v8544_v40 = vld [vmem:[%s10382_s27 + $0x30] sm:$0xff]  ;;  %v929_v41 = vperm.slane %v917_v1, 1  ;;  %v8542_v18 = vld [vmem:[%s10382_s27 + $0x20] sm:$0xff] }
 0x26f   : > { %4683 = vmatpush.bf16.msrb.mxu3 %v7686_v16  ;;  %v8511_v16 = vld [vmem:[%s9103_s15 + $0x324] sm:$0xf0]  ;;  %v7638_v58 = vor.u32 %v8509_v63, %v7637_v61  ;;  %v8540_v61 = vld [vmem:[%s10382_s27 + $0x10] sm:$0xff] }
 0x270   : > { %4723 = vmatpush.bf16.msrb.mxu0 %v7746_v59  ;;  %v10359_v49 = vpop.f32.mrf.mxu2  ;;  %v3628_v42 = vpop.f32.mrf.mxu0  ;;  %v7646_v43 = vor.u32 %v8511_v16, %v7645_v47  ;;  %v8523_v59 = vld [vmem:[%s9103_s15 + $0x384] sm:$0xf0]  ;;  %v8551_v16 = vld [vmem:[%s10382_s27 + $0x68] sm:$0xff] }
 0x271   : > { %4697 = vmatpush.bf16.msrb.mxu1 %v7742_v28  ;;  %v10357_v37 = vpop.f32.mrf.mxu3  ;;  %v8510_v28 = vld [vmem:[%s9103_s15 + $0x324] sm:$0xf]  ;;  %v3614_v47 = vadd.f32 %v10359_v49, %v929_v41  ;;  %v8550_v42 = vld [vmem:[%s10382_s27 + $0x60] sm:$0xff] }
 0x272   : > { %4710 = vmatpush.bf16.msrb.mxu2 %v7682_v5  ;;  %v7650_v23 = vor.u32 %v8510_v28, %v7647_v56  ;;  %v7714_v5 = vor.u32 %v8526_v57, %v7711_v0  ;;  %v8547_v57 = vld [vmem:[%s10382_s27 + $0x48] sm:$0xff] }
 0x273   : > { %4684 = vmatpush.bf16.msrb.mxu3 %v7678_v24  ;;  %v7701_v24 = vld [vmem:[%s9103_s15 + $0x390] sm:$0xf]  ;;  %v3627_v20 = vadd.f32 %v10347_v35, %v3614_v47 }
 0x274   : > { %4724 = vmatpush.bf16.msrb.mxu0 %v7738_v33  ;;  %v7706_v33 = vor.u32 %v8524_v44, %v7703_v17  ;;  %v8567_v44 = vld [vmem:[%s10382_s27 + $0xe8] sm:$0xff]  ;;  %v8558_v17 = vld [vmem:[%s10382_s27 + $0xa0] sm:$0xff] }
 0x275   : > { %4698 = vmatpush.bf16.msrb.mxu1 %v7734_v7  ;;  %v7693_v7 = vld [vmem:[%s9103_s15 + $0x380] sm:$0xf] }
 0x276   : > { %4711 = vmatpush.bf16.msrb.mxu2 %v7674_v10  ;;  %v928_v10 = vperm.slane %v917_v1, 0 }
 0x277   : > { %4685 = vmatpush.bf16.msrb.mxu3 %v7670_v60  ;;  %v7702_v60 = vor.u32 %v8525_v51, %v7701_v24  ;;  %v8548_v24 = vld [vmem:[%s10382_s27 + $0x50] sm:$0xff] }
 0x278   : > { %4725 = vmatpush.bf16.msrb.mxu0 %v7730_v36  ;;  %v3615_v9 = vpop.f32.mrf.mxu2  ;;  %v3523_v30 = vadd.f32 %v10274_v21, %v928_v10  ;;  %v8566_v10 = vld [vmem:[%s10382_s27 + $0xe0] sm:$0xff] }
 0x279   : > { %4699 = vmatpush.bf16.msrb.mxu1 %v7726_v27  ;;  %v3589_v2 = vpop.f32.mrf.mxu3  ;;  %v8553_v27 = vld [vmem:[%s10382_s27 + $0x78] sm:$0xff] }
 0x27a   : > { %4712 = vmatpush.bf16.msrb.mxu2 %v7666_v62  ;;  %v7698_v62 = vor.u32 %v8522_v29, %v7695_v45  ;;  %v3536_v36 = vadd.f32 %v10286_v32, %v3523_v30  ;;  %v8538_v2 = vld [vmem:[%s10382_s27] sm:$0xff]  ;;  %v8556_v45 = vld [vmem:[%s10382_s27 + $0x90] sm:$0xff] }
 0x27b   : > { %4686 = vmatpush.bf16.msrb.mxu3 %v7662_v25  ;;  %v7694_v25 = vor.u32 %v8523_v59, %v7693_v7  ;;  %v8564_v30 = vld [vmem:[%s10382_s27 + $0xd0] sm:$0xff] }
 0x27c   : > { %4726 = vmatpush.bf16.msrb.mxu0 %v7722_v54  ;;  %v3549_v38 = vadd.f32 %v10263_v52, %v3536_v36 }
 0x27d   : > { %4700 = vmatpush.bf16.msrb.mxu1 %v7718_v31  ;;  %v8543_v31 = vld [vmem:[%s10382_s27 + $0x28] sm:$0xff] }
 0x27e   : > { %4713 = vmatpush.bf16.msrb.mxu2 %v7658_v50  ;;  %v3562_v32 = vadd.f32 %v10294_v55, %v3549_v38 }
 0x27f   : > { %4687 = vmatpush.bf16.msrb.mxu3 %v7654_v34  ;;  %v8552_v34 = vld [vmem:[%s10382_s27 + $0x70] sm:$0xff] }
 0x280   : > { %4727 = vmatpush.bf16.msrb.mxu0 %v7714_v5  ;;  %v3575_v52 = vadd.f32 %v10336_v3, %v3562_v32  ;;  %v8539_v3 = vld [vmem:[%s10382_s27 + $0x8] sm:$0xff]  ;;  %v8569_v5 = vld [vmem:[%s10382_s27 + $0xf8] sm:$0xff]  ;;  %v8562_v32 = vld [vmem:[%s10382_s27 + $0xc0] sm:$0xff] }
 0x281   : > { %4701 = vmatpush.bf16.msrb.mxu1 %v7710_v19 }
 0x282   : > { %4714 = vmatpush.bf16.msrb.mxu2 %v7650_v23  ;;  %v3588_v54 = vadd.f32 %v10357_v37, %v3575_v52 }
 0x283   : > { %4688 = vmatpush.bf16.msrb.mxu3 %v7646_v43  ;;  %v8541_v43 = vld [vmem:[%s10382_s27 + $0x18] sm:$0xff] }
 0x284   : > { %4728 = vmatpush.bf16.msrb.mxu0 %v7706_v33  ;;  %v3601_v28 = vadd.f32 %v10311_v22, %v3588_v54  ;;  %v8546_v22 = vld [vmem:[%s10382_s27 + $0x40] sm:$0xff]  ;;  %v8557_v33 = vld [vmem:[%s10382_s27 + $0x98] sm:$0xff]  ;;  %v8584_v54 = vld [vmem:[%s10382_s27 + $0x170] sm:$0xff] }
 0x285   : > { %4702 = vmatpush.bf16.msrb.mxu1 %v7702_v60  ;;  %v3639_v21 = vpop.f32.mrf.mxu1  ;;  %v8561_v60 = vld [vmem:[%s10382_s27 + $0xb8] sm:$0xff] }
 0x286   : > { %4715 = vmatpush.bf16.msrb.mxu2 %v7642_v13  ;;  %v3640_v49 = vadd.f32 %v3639_v21, %v3627_v20  ;;  %v3701_v0 = vmax.f32 %v3601_v28, 0.0  ;;  %v8559_v13 = vld [vmem:[%s10382_s27 + $0xa8] sm:$0xff]  ;;  %v8581_v28 = vld [vmem:[%s10382_s27 + $0x158] sm:$0xff] }
 0x287   : > { %4689 = vmatpush.bf16.msrb.mxu3 %v7638_v58  ;;  %v8555_v21 = vld [vmem:[%s10382_s27 + $0x88] sm:$0xff] }
 0x288   : > { %4729 = vmatpush.bf16.msrb.mxu0 %v7698_v62  ;;  %v3678_v15 = vpop.f32.mrf.mxu0 }
 0x289   : > { %4703 = vmatpush.bf16.msrb.mxu1 %v7694_v25  ;;  %v3835_v25 = vld [vmem:[%s9105_s1] sm:$0x3] }
 0x28a   : > { %4716 = vmatpush.bf16.msrb.mxu2 %v7634_v48  ;;  %v3843_v53 = vperm.slane %v3835_v25, 0  ;;  %v3844_v29 = vperm.slane %v3835_v25, 1 }
 0x28b   : > { %4690 = vmatpush.bf16.msrb.mxu3 %v7630_v26 }
 0x28c   : > { %5136 = vmatpush.bf16.msra.mxu0 %v8569_v5 }
 0x28d   : > { %5007 = vmatpush.bf16.msra.mxu1 %v8553_v27  ;;  %v3641_v50 = vpop.f32.mrf.mxu1 }
 0x28e   : > { %5123 = vmatpush.bf16.msra.mxu2 %v8561_v60  ;;  %v8585_v50 = vld [vmem:[%s10382_s27 + $0x178] sm:$0xff] }
 0x28f   : > { %4994 = vmatpush.bf16.msra.mxu3 %v8545_v39  ;;  %v8565_v39 = vld [vmem:[%s10382_s27 + $0xd8] sm:$0xff] }
 0x290   : > { %v3665_v35 = vpop.f32.mrf.mxu2  ;;  %v3680_v55 = vpop.f32.mrf.mxu0  ;;  %5137 = vmatpush.bf16.msra.mxu0 %v8568_v4  ;;  %v8579_v4 = vld [vmem:[%s10382_s27 + $0x148] sm:$0xff] }
 0x291   : > { %5008 = vmatpush.bf16.msra.mxu1 %v8552_v34  ;;  %v3652_v12 = vpop.f32.mrf.mxu3  ;;  %v8574_v55 = vld [vmem:[%s10382_s27 + $0x120] sm:$0xff] }
 0x292   : > { %v3653_v19 = vadd.f32 %v3652_v12, %v3640_v49  ;;  %5124 = vmatpush.bf16.msra.mxu2 %v8560_v6  ;;  %v8577_v49 = vld [vmem:[%s10382_s27 + $0x138] sm:$0xff]  ;;  %v8571_v6 = vld [vmem:[%s10382_s27 + $0x108] sm:$0xff] }
 0x293   : > { %4995 = vmatpush.bf16.msra.mxu3 %v8544_v40 }
 0x294   : > { %v3666_v63 = vadd.f32 %v3665_v35, %v3653_v19  ;;  %5138 = vmatpush.bf16.msra.mxu0 %v8567_v44  ;;  %v8576_v35 = vld [vmem:[%s10382_s27 + $0x130] sm:$0xff] }
 0x295   : > { %5009 = vmatpush.bf16.msra.mxu1 %v8551_v16  ;;  %v3691_v56 = vpop.f32.mrf.mxu1  ;;  %v8563_v16 = vld [vmem:[%s10382_s27 + $0xc8] sm:$0xff] }
 0x296   : > { %v3679_v51 = vadd.f32 %v3678_v15, %v3666_v63  ;;  %5125 = vmatpush.bf16.msra.mxu2 %v8559_v13  ;;  %v8583_v63 = vld [vmem:[%s10382_s27 + $0x168] sm:$0xff]  ;;  %v8578_v13 = vld [vmem:[%s10382_s27 + $0x140] sm:$0xff] }
 0x297   : > { %4996 = vmatpush.bf16.msra.mxu3 %v8543_v31 }
 0x298   : > { %v3692_v37 = vadd.f32 %v3691_v56, %v3679_v51  ;;  %v3667_v23 = vpop.f32.mrf.mxu2  ;;  %5139 = vmatpush.bf16.msra.mxu0 %v8566_v10  ;;  %v8573_v51 = vld [vmem:[%s10382_s27 + $0x118] sm:$0xff] }
 0x299   : > { %5010 = vmatpush.bf16.msra.mxu1 %v8550_v42  ;;  %v3654_v58 = vpop.f32.mrf.mxu3  ;;  %v8554_v42 = vld [vmem:[%s10382_s27 + $0x80] sm:$0xff]  ;;  %v8572_v23 = vld [vmem:[%s10382_s27 + $0x110] sm:$0xff] }
 0x29a   : > { %v3702_v1 = vmax.f32 %v3692_v37, 0.0  ;;  %5126 = vmatpush.bf16.msra.mxu2 %v8558_v17 }
 0x29b   : > { %4997 = vmatpush.bf16.msra.mxu3 %v8542_v18 }
 0x29c   : > { %v3706_v9 = vpack.c.bf16 %v3702_v1, %v3701_v0  ;;  %5140 = vmatpush.bf16.msra.mxu0 %v8565_v39  ;;  %v8580_v0 = vld [vmem:[%s10382_s27 + $0x150] sm:$0xff]  ;;  %v8593_v39 = vld [vmem:[%s10382_s27 + $0x1b8] sm:$0xff] }
 0x29d   : > { %5011 = vmatpush.bf16.msra.mxu1 %v8549_v46  ;;  %v3693_v8 = vpop.f32.mrf.mxu1 }
 0x29e   : > { %v4517_v7 = vunpack.c.l.b16 %v3706_v9  ;;  %v4518_v59 = vunpack.c.h.b16 %v3706_v9  ;;  %5127 = vmatpush.bf16.msra.mxu2 %v8557_v33 }
 0x29f   : > { %4998 = vmatpush.bf16.msra.mxu3 %v8541_v43 }
 0x2a0   : > { %v4519_v11 = vpack.c.b16 %v4517_v7, %v4517_v7  ;;  %v4520_v26 = vpack.c.b16 %v4518_v59, %v4518_v59  ;;  %5141 = vmatpush.bf16.msra.mxu0 %v8564_v30  ;;  %v8599_v30 = vld [vmem:[%s10382_s27 + $0x1e8] sm:$0xff] }
 0x2a1   : > { %5012 = vmatpush.bf16.msra.mxu1 %v8548_v24  ;;  %v8582_v24 = vld [vmem:[%s10382_s27 + $0x160] sm:$0xff] }
 0x2a2   : > { %4691 = vmatmul.bf16.vlgmr.msrb.gmra.mxu3 %v4519_v11  ;;  %4704 = vmatmul.bf16.vlgmr.msrb.gmra.mxu1 %v4520_v26 }
 0x2a3   : > { %4999 = vmatpush.bf16.msra.mxu3 %v8540_v61  ;;  %4717 = vmatmul.bf16.vlgmr.msrb.gmra.mxu2 %v4519_v11  ;;  %v8575_v61 = vld [vmem:[%s10382_s27 + $0x128] sm:$0xff] }
 0x2a4   : > { %4730 = vmatmul.bf16.vlgmr.msrb.gmra.mxu0 %v4520_v26  ;;  %5128 = vmatpush.bf16.msra.mxu2 %v8556_v45  ;;  %v8570_v26 = vld [vmem:[%s10382_s27 + $0x100] sm:$0xff]  ;;  %v8591_v45 = vld [vmem:[%s10382_s27 + $0x1a8] sm:$0xff] }
 0x2a5   : > { %5013 = vmatpush.bf16.msra.mxu1 %v8547_v57  ;;  %5142 = vmatpush.bf16.msra.mxu0 %v8563_v16 }
 0x2a7   : > { %5000 = vmatpush.bf16.msra.mxu3 %v8539_v3  ;;  %v3836_v3 = vld [vmem:[%s9105_s1 + $0x2] sm:$0x3] }
 0x2a8   : > { %v4074_v14 = vpop.f32.mrf.mxu0  ;;  %5129 = vmatpush.bf16.msra.mxu2 %v8555_v21  ;;  %v3845_v37 = vperm.slane %v3836_v3, 0  ;;  %v3846_v58 = vperm.slane %v3836_v3, 1  ;;  %v8586_v3 = vld [vmem:[%s10382_s27 + $0x180] sm:$0xff] }
 0x2a9   : > { %5014 = vmatpush.bf16.msra.mxu1 %v8546_v22  ;;  %v4048_v27 = vpop.f32.mrf.mxu1  ;;  %5143 = vmatpush.bf16.msra.mxu0 %v8562_v32 }
 0x2ab   : > { %5001 = vmatpush.bf16.msra.mxu3 %v8538_v2 }
 0x2ac   : > { %5130 = vmatpush.bf16.msra.mxu2 %v8554_v42 }
 0x2ad   : > { %5265 = vmatpush.bf16.msrb.mxu1 %v8585_v50 }
 0x2af   : > { %5252 = vmatpush.bf16.msrb.mxu3 %v8577_v49 }
 0x2b0   : > { %v4061_v40 = vpop.f32.mrf.mxu2  ;;  %v4076_v47 = vpop.f32.mrf.mxu0  ;;  %5381 = vmatpush.bf16.msrb.mxu2 %v8593_v39 }
 0x2b1   : > { %v4035_v48 = vpop.f32.mrf.mxu3  ;;  %v4062_v41 = vadd.f32 %v4061_v40, %v3844_v29  ;;  %v4050_v36 = vpop.f32.mrf.mxu1  ;;  %5266 = vmatpush.bf16.msrb.mxu1 %v8584_v54  ;;  %v8592_v29 = vld [vmem:[%s10382_s27 + $0x1b0] sm:$0xff]  ;;  %v8598_v54 = vld [vmem:[%s10382_s27 + $0x1e0] sm:$0xff] }
 0x2b2   : > { %v4036_v62 = vadd.f32 %v4035_v48, %v3843_v53  ;;  %v8600_v48 = vld [vmem:[%s10382_s27 + $0x1f0] sm:$0xff] }
 0x2b3   : > { %v4075_v31 = vadd.f32 %v4074_v14, %v4062_v41  ;;  %5253 = vmatpush.bf16.msrb.mxu3 %v8576_v35  ;;  %v8590_v35 = vld [vmem:[%s10382_s27 + $0x1a0] sm:$0xff] }
 0x2b4   : > { %v4049_v34 = vadd.f32 %v4048_v27, %v4036_v62  ;;  %v8601_v27 = vld [vmem:[%s10382_s27 + $0x1f8] sm:$0xff]  ;;  %5382 = vmatpush.bf16.msrb.mxu2 %v8592_v29 }
 0x2b5   : > { %v4736_v18 = vmax.f32 %v4075_v31, 0.0  ;;  %5267 = vmatpush.bf16.msrb.mxu1 %v8583_v63  ;;  %5394 = vmatpush.bf16.msrb.mxu0 %v8601_v27  ;;  %v3837_v62 = vld [vmem:[%s9105_s1 + $0x4] sm:$0x3] }
 0x2b6   : > { %v4735_v38 = vmax.f32 %v4049_v34, 0.0  ;;  %v3847_v34 = vperm.slane %v3837_v62, 0  ;;  %v3848_v36 = vperm.slane %v3837_v62, 1  ;;  %v8597_v63 = vld [vmem:[%s10382_s27 + $0x1d8] sm:$0xff] }
 0x2b7   : > { %5254 = vmatpush.bf16.msrb.mxu3 %v8575_v61  ;;  %v8589_v61 = vld [vmem:[%s10382_s27 + $0x198] sm:$0xff] }
 0x2b8   : > { %v4743_v20 = vpack.c.bf16 %v4736_v18, %v4735_v38  ;;  %v4063_v43 = vpop.f32.mrf.mxu2  ;;  %5383 = vmatpush.bf16.msrb.mxu2 %v8591_v45 }
 0x2b9   : > { %v4037_v15 = vpop.f32.mrf.mxu3  ;;  %5268 = vmatpush.bf16.msrb.mxu1 %v8582_v24  ;;  %5395 = vmatpush.bf16.msrb.mxu0 %v8600_v48  ;;  %v8596_v24 = vld [vmem:[%s10382_s27 + $0x1d0] sm:$0xff] }
 0x2ba   : > { %v4892_v46 = vunpack.c.l.b16 %v4743_v20  ;;  %v4893_v52 = vunpack.c.h.b16 %v4743_v20 }
 0x2bb   : > { %5255 = vmatpush.bf16.msrb.mxu3 %v8574_v55  ;;  %v8588_v55 = vld [vmem:[%s10382_s27 + $0x190] sm:$0xff] }
 0x2bc   : > { %v4894_v12 = vpack.c.b16 %v4892_v46, %v4892_v46  ;;  %v4895_v19 = vpack.c.b16 %v4893_v52, %v4893_v52  ;;  %5384 = vmatpush.bf16.msrb.mxu2 %v8590_v35 }
 0x2bd   : > { %5269 = vmatpush.bf16.msrb.mxu1 %v8581_v28  ;;  %5396 = vmatpush.bf16.msrb.mxu0 %v8599_v30  ;;  %v8595_v28 = vld [vmem:[%s10382_s27 + $0x1c8] sm:$0xff] }
 0x2be   : > { %5002 = vmatmul.bf16.vlgmr.msra.gmra.mxu3 %v4894_v12  ;;  %5015 = vmatmul.bf16.vlgmr.msra.gmra.mxu1 %v4895_v19  ;;  %v8672_v30 = vld [vmem:[%s10443_s9 + $0x1] ss:$0 sm:$0xff] }
 0x2bf   : > { %5256 = vmatpush.bf16.msrb.mxu3 %v8573_v51  ;;  %v8587_v51 = vld [vmem:[%s10382_s27 + $0x188] sm:$0xff] }
 0x2c0   : > { %5385 = vmatpush.bf16.msrb.mxu2 %v8589_v61 }
 0x2c1   : > { %5270 = vmatpush.bf16.msrb.mxu1 %v8580_v0  ;;  %5397 = vmatpush.bf16.msrb.mxu0 %v8598_v54 }
 0x2c3   : > { %5257 = vmatpush.bf16.msrb.mxu3 %v8572_v23 }
 0x2c4   : > { %5386 = vmatpush.bf16.msrb.mxu2 %v8588_v55 }
 0x2c5   : > { %5271 = vmatpush.bf16.msrb.mxu1 %v8579_v4  ;;  %5398 = vmatpush.bf16.msrb.mxu0 %v8597_v63 }
 0x2c7   : > { %5258 = vmatpush.bf16.msrb.mxu3 %v8571_v6 }
 0x2c8   : > { %v4293_v57 = vpop.f32.mrf.mxu0  ;;  %5387 = vmatpush.bf16.msrb.mxu2 %v8587_v51 }
 0x2c9   : > { %v4267_v56 = vpop.f32.mrf.mxu1  ;;  %5272 = vmatpush.bf16.msrb.mxu1 %v8578_v13  ;;  %5399 = vmatpush.bf16.msrb.mxu0 %v8596_v24 }
 0x2cb   : > { %5259 = vmatpush.bf16.msrb.mxu3 %v8570_v26 }
 0x2cc   : > { %5388 = vmatpush.bf16.msrb.mxu2 %v8586_v3 }
 0x2cd   : > { %5400 = vmatpush.bf16.msrb.mxu0 %v8595_v28 }
 0x2d0   : > { %v4280_v60 = vpop.f32.mrf.mxu2  ;;  %v4295_v59 = vpop.f32.mrf.mxu0 }
 0x2d1   : > { %v4254_v1 = vpop.f32.mrf.mxu3  ;;  %v4281_v5 = vadd.f32 %v4280_v60, %v3846_v58  ;;  %v4269_v9 = vpop.f32.mrf.mxu1 }
 0x2d2   : > { %v4255_v2 = vadd.f32 %v4254_v1, %v3845_v37  ;;  %v3838_v37 = vld [vmem:[%s9105_s1 + $0x6] sm:$0x3] }
 0x2d3   : > { %v4294_v7 = vadd.f32 %v4293_v57, %v4281_v5  ;;  %v3849_v23 = vperm.slane %v3838_v37, 0  ;;  %v3850_v0 = vperm.slane %v3838_v37, 1 }
 0x2d4   : > { %v4268_v22 = vadd.f32 %v4267_v56, %v4255_v2  ;;  %v8594_v56 = vld [vmem:[%s10382_s27 + $0x1c0] sm:$0xff] }
 0x2d5   : > { %v4738_v11 = vmax.f32 %v4294_v7, 0.0  ;;  %5401 = vmatpush.bf16.msrb.mxu0 %v8594_v56 }
 0x2d6   : > { %v4737_v8 = vmax.f32 %v4268_v22, 0.0 }
 0x2d8   : > { %v4744_v44 = vpack.c.bf16 %v4738_v11, %v4737_v8  ;;  %v4282_v10 = vpop.f32.mrf.mxu2 }
 0x2d9   : > { %v4256_v17 = vpop.f32.mrf.mxu3 }
 0x2da   : > { %v5021_v25 = vunpack.c.l.b16 %v4744_v44  ;;  %v5022_v33 = vunpack.c.h.b16 %v4744_v44 }
 0x2dc   : > { %v5023_v14 = vpack.c.b16 %v5021_v25, %v5021_v25  ;;  %v5024_v53 = vpack.c.b16 %v5022_v33, %v5022_v33  ;;  %v8671_v33 = vld [vmem:[%s10443_s9] ss:$0 sm:$0xff] }
 0x2de   : > { %5131 = vmatmul.bf16.vlgmr.msra.gmra.mxu2 %v5023_v14  ;;  %5144 = vmatmul.bf16.vlgmr.msra.gmra.mxu0 %v5024_v53 }
 0x2e8   : > { %v4512_v41 = vpop.f32.mrf.mxu0 }
 0x2e9   : > { %v4486_v40 = vpop.f32.mrf.mxu1 }
 0x2f0   : > { %v4499_v21 = vpop.f32.mrf.mxu2  ;;  %v4514_v15 = vpop.f32.mrf.mxu0 }
 0x2f1   : > { %v4473_v31 = vpop.f32.mrf.mxu3  ;;  %v4500_v16 = vadd.f32 %v4499_v21, %v3848_v36  ;;  %v4488_v18 = vpop.f32.mrf.mxu1  ;;  %v8673_v21 = vld [vmem:[%s10443_s9 + $0x2] ss:$0 sm:$0xff] }
 0x2f2   : > { %v4474_v47 = vadd.f32 %v4473_v31, %v3847_v34 }
 0x2f3   : > { %v4513_v20 = vadd.f32 %v4512_v41, %v4500_v16 }
 0x2f4   : > { %v4487_v38 = vadd.f32 %v4486_v40, %v4474_v47 }
 0x2f5   : > { %v4740_v32 = vmax.f32 %v4513_v20, 0.0 }
 0x2f6   : > { %v4739_v42 = vmax.f32 %v4487_v38, 0.0 }
 0x2f8   : > { %v4745_v43 = vpack.c.bf16 %v4740_v32, %v4739_v42  ;;  %v4501_v50 = vpop.f32.mrf.mxu2 }
 0x2f9   : > { %v4475_v49 = vpop.f32.mrf.mxu3 }
 0x2fa   : > { %v5150_v46 = vunpack.c.l.b16 %v4745_v43  ;;  %v5151_v52 = vunpack.c.h.b16 %v4745_v43  ;;  %v8674_v43 = vld [vmem:[%s10443_s9 + $0x3] ss:$0 sm:$0xff] }
 0x2fc   : > { %v5152_v12 = vpack.c.b16 %v5150_v46, %v5150_v46  ;;  %v5153_v19 = vpack.c.b16 %v5151_v52, %v5151_v52 }
 0x2fe   : > { %5260 = vmatmul.bf16.vlgmr.msrb.gmra.mxu3 %v5152_v12  ;;  %5273 = vmatmul.bf16.vlgmr.msrb.gmra.mxu1 %v5153_v19 }
 0x31f   : > { %v4705_v57 = vpop.f32.mrf.mxu1 }
 0x321   : > { %v4731_v58 = vpop.f32.mrf.mxu0 }
 0x325   : > { %v4692_v1 = vpop.f32.mrf.mxu3 }
 0x326   : > { %v4693_v2 = vadd.f32 %v4692_v1, %v3849_v23  ;;  %v4718_v60 = vpop.f32.mrf.mxu2 }
 0x327   : > { %v4719_v5 = vadd.f32 %v4718_v60, %v3850_v0  ;;  %v4707_v22 = vpop.f32.mrf.mxu1 }
 0x328   : > { %v4706_v9 = vadd.f32 %v4705_v57, %v4693_v2 }
 0x329   : > { %v4733_v6 = vpop.f32.mrf.mxu0  ;;  %v4732_v4 = vadd.f32 %v4731_v58, %v4719_v5 }
 0x32a   : > { %v4741_v7 = vmax.f32 %v4706_v9, 0.0 }
 0x32b   : > { %v4742_v59 = vmax.f32 %v4732_v4, 0.0 }
 0x32d   : > { %v4746_v8 = vpack.c.bf16 %v4742_v59, %v4741_v7  ;;  %v4694_v11 = vpop.f32.mrf.mxu3 }
 0x32e   : > { %v4720_v26 = vpop.f32.mrf.mxu2 }
 0x32f   : > { %v5279_v13 = vunpack.c.l.b16 %v4746_v8  ;;  %v5280_v44 = vunpack.c.h.b16 %v4746_v8 }
 0x331   : > { %v5281_v17 = vpack.c.b16 %v5279_v13, %v5279_v13  ;;  %v5282_v10 = vpack.c.b16 %v5280_v44, %v5280_v44 }
 0x333   : > { %5389 = vmatmul.bf16.vlgmr.msrb.gmra.mxu2 %v5281_v17  ;;  %5402 = vmatmul.bf16.vlgmr.msrb.gmra.mxu0 %v5282_v10 }
 0x33b   : > { %v5016_v25 = vpop.f32.mrf.mxu1 }
 0x341   : > { %v5003_v39 = vpop.f32.mrf.mxu3 }
 0x342   : > { %v5004_v27 = vadd.f32 %v8671_v33, %v5003_v39 }
 0x343   : > { %v5018_v14 = vpop.f32.mrf.mxu1 }
 0x344   : > { %v5017_v53 = vadd.f32 %v5016_v25, %v5004_v27 }
 0x346   : > { %v5408_v29 = vsel %vm5407_vm1, %v5017_v53, -inf }
 0x347   : > { %5409 = vmax.xlane.f32.xlu0 %v5408_v29 }
 0x349   : > { %v5005_v48 = vpop.f32.mrf.mxu3 }
 0x35b   : > { %v5145_v45 = vpop.f32.mrf.mxu0 }
 0x361   : > { %v5132_v62 = vpop.f32.mrf.mxu2 }
 0x362   : > { %v5133_v40 = vadd.f32 %v8672_v30, %v5132_v62 }
 0x363   : > { %v5147_v41 = vpop.f32.mrf.mxu0 }
 0x364   : > { %v5146_v34 = vadd.f32 %v5145_v45, %v5133_v40 }
 0x366   : > { %v5411_v36 = vsel %vm5407_vm1, %v5146_v34, -inf }
 0x367   : > { %5412 = vmax.xlane.f32.xlu0 %v5411_v36 }
 0x369   : > { %v5134_v31 = vpop.f32.mrf.mxu2 }
 0x37b   : > { %v5274_v47 = vpop.f32.mrf.mxu1 }
 0x381   : > { %v5261_v16 = vpop.f32.mrf.mxu3 }
 0x382   : > { %v5262_v38 = vadd.f32 %v8673_v21, %v5261_v16 }
 0x383   : > { %v5276_v18 = vpop.f32.mrf.mxu1 }
 0x384   : > { %v5275_v20 = vadd.f32 %v5274_v47, %v5262_v38 }
 0x386   : > { %v5414_v15 = vsel %vm5407_vm1, %v5275_v20, -inf }
 0x387   : > { %5415 = vmax.xlane.f32.xlu1 %v5414_v15 }
 0x389   : > { %v5263_v42 = vpop.f32.mrf.mxu3 }
 0x3b0   : > { %v5403_v32 = vpop.f32.mrf.mxu0 }
 0x3b6   : > { %v5390_v49 = vpop.f32.mrf.mxu2 }
 0x3b7   : > { %v5391_v50 = vadd.f32 %v8674_v43, %v5390_v49 }
 0x3b8   : > { %v5405_v52 = vpop.f32.mrf.mxu0 }
 0x3b9   : > { %v5404_v19 = vadd.f32 %v5403_v32, %v5391_v50 }
 0x3ba   : > { %v5410_v46 = vpop.xlane.xlu0 %5409 }
 0x3bb   : > { %v5420_v12 = vsub.f32 %v5017_v53, %v5410_v46  ;;  %v5417_v54 = vsel %vm5407_vm1, %v5404_v19, -inf }
 0x3bc   : > { %5418 = vmax.xlane.f32.xlu1 %v5417_v54 }
 0x3bd   : > { %v5424_v35 = vmul.f32 1.442695, %v5420_v12 }
 0x3be   : > { %v5392_v61 = vpop.f32.mrf.mxu2 }
 0x3bf   : > { %8675 = vpow2.f32 %v5424_v35 }
 0x3c5   : > { %v8676_v63 = vpop.eup %8675 }
 0x3c6   : > { %v5432_v55 = vsel %vm5407_vm1, %v8676_v63, 0.0 }
 0x3c7   : > { %5433 = vadd.xlane.f32.xlu2 %v5432_v55 }
 0x3da   : > { %v5413_v24 = vpop.xlane.xlu0 %5412 }
 0x3db   : > { %v5421_v51 = vsub.f32 %v5146_v34, %v5413_v24 }
 0x3dd   : > { %v5426_v28 = vmul.f32 1.442695, %v5421_v51 }
 0x3df   : > { %8677 = vpow2.f32 %v5426_v28 }
 0x3e5   : > { %v8678_v3 = vpop.eup %8677 }
 0x3e6   : > { %v5435_v56 = vsel %vm5407_vm1, %v8678_v3, 0.0 }
 0x3e7   : > { %5436 = vadd.xlane.f32.xlu2 %v5435_v56 }
 0x3fa   : > { %v5416_v57 = vpop.xlane.xlu1 %5415 }
 0x3fb   : > { %v5422_v37 = vsub.f32 %v5275_v20, %v5416_v57 }
 0x3fd   : > { %v5428_v58 = vmul.f32 1.442695, %v5422_v37 }
 0x3ff   : > { %8679 = vpow2.f32 %v5428_v58 }
 0x405   : > { %v8680_v23 = vpop.eup %8679 }
 0x406   : > { %v5438_v0 = vsel %vm5407_vm1, %v8680_v23, 0.0 }
 0x407   : > { %5439 = vadd.xlane.f32.xlu0 %v5438_v0 }
 0x42f   : > { %v5419_v1 = vpop.xlane.xlu1 %5418 }
 0x430   : > { %v5423_v2 = vsub.f32 %v5404_v19, %v5419_v1 }
 0x432   : > { %v5430_v60 = vmul.f32 1.442695, %v5423_v2 }
 0x434   : > { %8681 = vpow2.f32 %v5430_v60 }
 0x43a   : > { %v5434_v5 = vpop.xlane.xlu2 %5433  ;;  %v8682_v22 = vpop.eup %8681 }
 0x43b   : > { %8683 = vlog2.f32 %v5434_v5  ;;  %v5441_v9 = vsel %vm5407_vm1, %v8682_v22, 0.0 }
 0x43c   : > { %5442 = vadd.xlane.f32.xlu1 %v5441_v9 }
 0x441   : > { %v8684_v6 = vpop.eup %8683 }
 0x442   : > { %v5445_v4 = vmul.f32 0.6931472, %v8684_v6 }
 0x444   : > { %v5452_v7 = vsub.f32 %v5420_v12, %v5445_v4 }
 0x446   : > { %5456 = vst.msk [vmem:[%s515_s4] sm:$0x3] %vm5407_vm1, %v5452_v7 }
 0x45a   : > { %v5437_v59 = vpop.xlane.xlu2 %5436 }
 0x45b   : > { %8685 = vlog2.f32 %v5437_v59 }
 0x461   : > { %v8686_v8 = vpop.eup %8685 }
 0x462   : > { %v5447_v11 = vmul.f32 0.6931472, %v8686_v8 }
 0x464   : > { %v5453_v26 = vsub.f32 %v5421_v51, %v5447_v11 }
 0x466   : > { %5457 = vst.msk [vmem:[%s515_s4 + $0x2] sm:$0x3] %vm5407_vm1, %v5453_v26 }
 0x47a   : > { %v5440_v13 = vpop.xlane.xlu0 %5439 }
 0x47b   : > { %8687 = vlog2.f32 %v5440_v13 }
 0x481   : > { %v8688_v44 = vpop.eup %8687 }
 0x482   : > { %v5449_v17 = vmul.f32 0.6931472, %v8688_v44 }
 0x484   : > { %v5454_v10 = vsub.f32 %v5422_v37, %v5449_v17 }
 0x486   : > { %5458 = vst.msk [vmem:[%s515_s4 + $0x4] sm:$0x3] %vm5407_vm1, %v5454_v10 }
 0x4af   : > { %v5443_v25 = vpop.xlane.xlu1 %5442 }
 0x4b0   : > { %8689 = vlog2.f32 %v5443_v25 }
 0x4b6   : > { %v8690_v33 = vpop.eup %8689 }
 0x4b7   : > { %v5451_v39 = vmul.f32 0.6931472, %v8690_v33 }
 0x4b9   : > { %v5455_v27 = vsub.f32 %v5423_v2, %v5451_v39 }
 0x4bb   : > { %5459 = vst.msk [vmem:[%s515_s4 + $0x6] sm:$0x3] %vm5407_vm1, %v5455_v27 }
 0x4bc PF: > { %s10540_s27 = sld [smem:[#allocation14_spill]]  ;;  %s10543_s24 = smov %s8875_s25 }
 0x4bd   : > { %s10541_s23 = sld [smem:[#allocation13_spill]] }
 0x4be   : > { %s10542_s26 = sld [smem:[#allocation15_spill]] }
 0x4c2   : > { %p23_p7 = scmp.ge.s32.totalorder %s10540_s27, 4  }
 0x4c3   : > { %s10544_s25 = smov %s10541_s23 }
 0x4c4   :  { %25 = sbr.rel (!%p23_p7) target bundleno = 12 (0xc), region = 142 }
 0x4c9   :  { %5482 = vsyncpa [#allocation3], 1 }
 0x4ca   :  { %5484 = vsyncpa [#allocation3 + $0x1], 1 }
 0x4cb   :  { %5485 = vsyncpa [#allocation5], 1 }
 0x4cc   :  { %5487 = vsyncpa [#allocation5 + $0x1], 1 }
 0x4cd   :  { %5488 = vsyncpa [#allocation8], 1 }
 0x4ce   :  { %5490 = vsyncpa [#allocation8 + $0x1], 1 }

</bundles_post_ra>
